<compile_context>
chip_gen: v7x
topology: tpu7x:2x2x1
jax: 0.10.0
libtpu: 0.0.40
codegen_flags: <defaults>
</compile_context>

<pallas_src>
import functools

import jax
import jax.numpy as jnp
import numpy as np
from jax import lax
from jax.experimental import pallas as pl
from jax.experimental.pallas import tpu as pltpu


def _encoder_layer_kernel(compute_dtype, approx_recip,
                          q_ref, k_ref, v_ref, x_ref, kvalid_ref,
                          wo_ref, w1_ref, b1_ref, w2_ref, b2_ref,
                          g1_ref, be1_ref, g2_ref, be2_ref,
                          out_ref,
                          m_ref, l_ref, acc_ref):
    f32 = jnp.float32
    cd = compute_dtype
    ki = pl.program_id(2)

    @pl.when(ki == 0)
    def _init():
        m_ref[...] = jnp.full_like(m_ref, -jnp.inf)
        l_ref[...] = jnp.zeros_like(l_ref)
        acc_ref[...] = jnp.zeros_like(acc_ref)

    q = q_ref[0]             # (H, TQ, dk)  compute dtype, pre-scaled by 1/sqrt(dk)
    k = k_ref[0]             # (H, TK, dk)
    v = v_ref[0]             # (H, TK, dv)
    kvalid = kvalid_ref[0]   # (1, TK) f32; 1 = attend, 0 = padded key

    # scores for this KV tile (MXU, f32 accumulation); mask bias built in f32
    s = jnp.einsum("hqd,hkd->hqk", q, k, preferred_element_type=f32)  # (H,TQ,TK)
    s = s + jnp.where(kvalid > 0.5, 0.0, -1e30)[None, :, :]

    # online-softmax update
    m_prev = m_ref[...]
    m_new = jnp.maximum(m_prev, jnp.max(s, axis=-1, keepdims=True))
    alpha = jnp.exp(m_prev - m_new)
    p = jnp.exp(s - m_new)
    l_ref[...] = alpha * l_ref[...] + jnp.sum(p, axis=-1, keepdims=True)
    acc_ref[...] = alpha * acc_ref[...] + jnp.einsum(
        "hqk,hkd->hqd", p.astype(cd), v, preferred_element_type=f32)
    m_ref[...] = m_new

    @pl.when(ki == pl.num_programs(2) - 1)
    def _finalize():
        inv_l = pl.reciprocal(l_ref[...], approx=approx_recip)        # (H,TQ,1)
        ctx = acc_ref[...] * inv_l                                     # (H,TQ,dv) f32

        # per-head output projection, head reduction = plain VPU adds (no relayout)
        attn = jnp.einsum("hqd,hdm->hqm", ctx.astype(cd), wo_ref[...],
                          preferred_element_type=f32)                  # (H,TQ,D)
        attn = jnp.sum(attn, axis=0)                                   # (TQ, D)

        # residual + LayerNorm 1 (f32 statistics)
        x_q = x_ref[0].astype(f32)
        r1 = attn + x_q
        mu1 = jnp.mean(r1, axis=-1, keepdims=True)
        var1 = jnp.mean((r1 - mu1) ** 2, axis=-1, keepdims=True)
        ln1 = (r1 - mu1) * lax.rsqrt(var1 + 1e-5) * g1_ref[...] + be1_ref[...]

        # position-wise feed-forward
        h1 = jnp.dot(ln1.astype(cd), w1_ref[...],
                     preferred_element_type=f32) + b1_ref[...]
        h1 = jnp.maximum(h1, 0.0)
        ff = jnp.dot(h1.astype(cd), w2_ref[...],
                     preferred_element_type=f32) + b2_ref[...]

        # residual + LayerNorm 2 (f32 statistics)
        r2 = ff + ln1
        mu2 = jnp.mean(r2, axis=-1, keepdims=True)
        var2 = jnp.mean((r2 - mu2) ** 2, axis=-1, keepdims=True)
        ln2 = (r2 - mu2) * lax.rsqrt(var2 + 1e-5) * g2_ref[...] + be2_ref[...]

        out_ref[0] = ln2.astype(out_ref.dtype)


def encoder_layer(x, key_valid, params, *, num_heads, d_k, d_v,
                  compute_dtype=jnp.bfloat16, q_tile=None, kv_tile=None,
                  approx_reciprocal=True):
    """x: (B, S, D); key_valid: (B, S) with 1.0 = attend / 0.0 = padded key.

    `compute_dtype` is the MXU operand dtype (bf16 recommended on v6e/v7x);
    accumulation, softmax and LayerNorm statistics are always f32.
    """
    B, S, D = x.shape
    H, dk, dv = num_heads, d_k, d_v
    f32 = jnp.float32
    cd = compute_dtype
    d_ff = params["w1"].shape[1]

    # ---- tile selection (v7x-friendly defaults) ------------------------------
    if q_tile is None:
        q_tile = S if (S <= 128 or S % 128) else 128
    assert S % q_tile == 0 and (q_tile == S or q_tile % 8 == 0)
    if kv_tile is None:
        kv_tile = S
        for cand in (512, 256, 128):
            if S > cand and S % cand == 0:
                kv_tile = cand
                break
    assert S % kv_tile == 0
    assert kv_tile == S or kv_tile % 128 == 0, "kv_tile must be S or a multiple of 128"
    n_q, n_kv = S // q_tile, S // kv_tile

    # ---- Q/K/V projections ONCE per batch (plain XLA matmuls, f32 accum) -----
    xc = x.astype(cd)

    def proj(w):                       # (D, H*dh) -> (B, H, S, dh), compute dtype
        dh = w.shape[1] // H
        y = jnp.dot(xc.reshape(B * S, D), w.astype(cd), preferred_element_type=f32)
        return y.reshape(B, S, H, dh).transpose(0, 2, 1, 3).astype(cd)

    q = proj(params["wq"] * (1.0 / (dk ** 0.5)))   # softmax scale folded into q
    k = proj(params["wk"])
    v = proj(params["wv"])

    wo_h = params["wo"].reshape(H, dv, D).astype(cd)   # (H, dv, D)
    w1 = params["w1"].astype(cd)
    w2 = params["w2"].astype(cd)
    b1 = params["b1"].astype(f32)
    b2 = params["b2"].astype(f32)
    g1 = params["g1"].astype(f32)
    be1 = params["be1"].astype(f32)
    g2 = params["g2"].astype(f32)
    be2 = params["be2"].astype(f32)
    kvalid3 = key_valid.reshape(B, 1, S).astype(f32)

    weights = (wo_h, w1, b1, w2, b2, g1, be1, g2, be2)

    # ---- VMEM budget / cost hints ---------------------------------------------
    cd_b = np.dtype(cd).itemsize
    stream_bytes = 2 * (H * q_tile * dk * cd_b + H * kv_tile * (dk + dv) * cd_b
                        + 2 * q_tile * D * x.dtype.itemsize + kv_tile * 4)
    weight_bytes = sum(int(w.size) * w.dtype.itemsize for w in weights)
    scratch_bytes = 4 * H * q_tile * (2 + dv)
    work_bytes = 4 * (2 * H * q_tile * kv_tile + H * q_tile * D
                      + 3 * q_tile * max(D, d_ff))
    vmem_limit = max(32 << 20,
                     int(1.5 * (stream_bytes + 2 * weight_bytes
                                + scratch_bytes + work_bytes)) + (4 << 20))
    try:
        vmem_limit = min(vmem_limit,
                         int(0.9 * pltpu.get_tpu_info().vmem_capacity_bytes))
    except Exception:                                    # pragma: no cover
        vmem_limit = min(vmem_limit, 56 << 20)           # conservative (v7x-safe)

    cost = pl.CostEstimate(
        flops=int(2 * B * H * S * S * (dk + dv) + 2 * B * S * H * dv * D
                  + 4 * B * S * D * d_ff),
        transcendentals=int(B * H * S * S),
        bytes_accessed=int(sum(int(a.size) * a.dtype.itemsize
                               for a in (q, k, v, x, kvalid3))
                           + weight_bytes + B * S * D * x.dtype.itemsize))

    kernel = functools.partial(_encoder_layer_kernel, cd, approx_reciprocal)

    def build(single_buffer_weights):
        def weight_spec(a):
            nd = a.ndim
            kw = {}
            if single_buffer_weights:
                # constant index_map -> double buffering buys nothing, halve VMEM
                kw["pipeline_mode"] = pl.Buffered(1)
            return pl.BlockSpec(a.shape, lambda b, qi, ki, _n=nd: (0,) * _n, **kw)

        in_specs = [
            pl.BlockSpec((1, H, q_tile, dk), lambda b, qi, ki: (b, 0, qi, 0)),  # q
            pl.BlockSpec((1, H, kv_tile, dk), lambda b, qi, ki: (b, 0, ki, 0)),  # k
            pl.BlockSpec((1, H, kv_tile, dv), lambda b, qi, ki: (b, 0, ki, 0)),  # v
            pl.BlockSpec((1, q_tile, D), lambda b, qi, ki: (b, qi, 0)),          # x (residual)
            pl.BlockSpec((1, 1, kv_tile), lambda b, qi, ki: (b, 0, ki)),         # key_valid
        ] + [weight_spec(w) for w in weights]

        return pl.pallas_call(
            kernel,
            out_shape=jax.ShapeDtypeStruct((B, S, D), x.dtype),
            grid=(B, n_q, n_kv),
            in_specs=in_specs,
            out_specs=pl.BlockSpec((1, q_tile, D), lambda b, qi, ki: (b, qi, 0)),
            scratch_shapes=[pltpu.VMEM((H, q_tile, 1), f32),   # m
                            pltpu.VMEM((H, q_tile, 1), f32),   # l
                            pltpu.VMEM((H, q_tile, dv), f32)], # acc
            compiler_params=pltpu.CompilerParams(
                dimension_semantics=("parallel", "parallel", "arbitrary"),
                vmem_limit_bytes=vmem_limit),
            cost_estimate=cost,
        )

    args = (q, k, v, x, kvalid3) + weights
    try:
        return build(True)(*args)
    except Exception:
        # pipeline_mode=pl.Buffered(1) unsupported on this jax build ->
        # fall back to default (double-buffered) weight specs.
        return build(False)(*args)


def _reference(x, key_valid, p, *, num_heads, d_k, d_v):
    """Pure-JAX f32 reference matching the PyTorch forward (eval mode)."""
    B, S, D = x.shape
    q = (x @ p["wq"]).reshape(B, S, num_heads, d_k).transpose(0, 2, 1, 3)
    k = (x @ p["wk"]).reshape(B, S, num_heads, d_k).transpose(0, 2, 1, 3)
    v = (x @ p["wv"]).reshape(B, S, num_heads, d_v).transpose(0, 2, 1, 3)
    s = jnp.einsum("bhqd,bhkd->bhqk", q, k) / (d_k ** 0.5)
    s = s + jnp.where(key_valid[:, None, None, :] > 0.5, 0.0, -1e30)
    a = jax.nn.softmax(s, axis=-1)
    ctx = jnp.einsum("bhqk,bhkd->bhqd", a, v).transpose(0, 2, 1, 3).reshape(B, S, -1)
    attn_out = ctx @ p["wo"]

    def ln(z, g, b):
        mu = jnp.mean(z, -1, keepdims=True)
        var = jnp.mean((z - mu) ** 2, -1, keepdims=True)
        return (z - mu) / jnp.sqrt(var + 1e-5) * g + b

    out1 = ln(attn_out + x, p["g1"], p["be1"])
    ff = jnp.maximum(out1 @ p["w1"] + p["b1"], 0.0) @ p["w2"] + p["b2"]
    return ln(ff + out1, p["g2"], p["be2"])


if __name__ == "__main__":
    num_heads, d_model, d_k, d_v, d_ff = 4, 32, 8, 8, 64
    key = jax.random.PRNGKey(0)
    ks = jax.random.split(key, 10)

    params = {
        # pre-transposed so we compute x @ W  (torch Linear computes x @ W.T)
        "wq": jax.random.normal(ks[0], (d_model, num_heads * d_k), jnp.float32) * 0.1,
        "wk": jax.random.normal(ks[1], (d_model, num_heads * d_k), jnp.float32) * 0.1,
        "wv": jax.random.normal(ks[2], (d_model, num_heads * d_v), jnp.float32) * 0.1,
        "wo": jax.random.normal(ks[3], (num_heads * d_v, d_model), jnp.float32) * 0.1,
        "w1": jax.random.normal(ks[4], (d_model, d_ff), jnp.float32) * 0.1,
        "b1": jax.random.normal(ks[5], (1, d_ff), jnp.float32) * 0.1,
        "w2": jax.random.normal(ks[6], (d_ff, d_model), jnp.float32) * 0.1,
        "b2": jax.random.normal(ks[7], (1, d_model), jnp.float32) * 0.1,
        "g1": jnp.ones((1, d_model), jnp.float32),
        "be1": jnp.zeros((1, d_model), jnp.float32),
        "g2": jnp.ones((1, d_model), jnp.float32),
        "be2": jnp.zeros((1, d_model), jnp.float32),
    }
    mha_kw = dict(num_heads=num_heads, d_k=d_k, d_v=d_v)

    # ---- test 1: tiny shapes (single q/kv tile), padded batch ------------------
    B, S = 2, 8
    x = jax.random.normal(ks[8], (B, S, d_model), jnp.float32)
    valid_len = jnp.array([S, S - 2])
    key_valid = (jnp.arange(S)[None, :] < valid_len[:, None]).astype(jnp.float32)
    ref = _reference(x, key_valid, params, **mha_kw)

    out_f32 = jax.block_until_ready(encoder_layer(
        x, key_valid, params, compute_dtype=jnp.float32,
        approx_reciprocal=False, **mha_kw))
    np.testing.assert_allclose(np.asarray(out_f32), np.asarray(ref),
                               rtol=2e-3, atol=2e-3)

    out_bf16 = jax.block_until_ready(encoder_layer(
        x, key_valid, params, compute_dtype=jnp.bfloat16, **mha_kw))
    np.testing.assert_allclose(np.asarray(out_bf16), np.asarray(ref),
                               rtol=7e-2, atol=7e-2)

    # ---- test 2: query/key tiling (4 q-tiles x 2 kv-tiles) + a fully-masked
    #              KV tile for one batch row (exercises the online-softmax path).
    B2, S2 = 2, 256
    x2 = jax.random.normal(ks[9], (B2, S2, d_model), jnp.float32)
    valid_len2 = jnp.array([S2, 100])          # batch 1: second KV tile all padded
    key_valid2 = (jnp.arange(S2)[None, :] < valid_len2[:, None]).astype(jnp.float32)
    ref2 = _reference(x2, key_valid2, params, **mha_kw)

    out2_f32 = jax.block_until_ready(encoder_layer(
        x2, key_valid2, params, compute_dtype=jnp.float32,
        q_tile=64, kv_tile=128, approx_reciprocal=False, **mha_kw))
    np.testing.assert_allclose(np.asarray(out2_f32), np.asarray(ref2),
                               rtol=2e-3, atol=2e-3)

    out2_bf16 = jax.block_until_ready(encoder_layer(
        x2, key_valid2, params, compute_dtype=jnp.bfloat16,
        q_tile=64, kv_tile=128, **mha_kw))
    np.testing.assert_allclose(np.asarray(out2_bf16), np.asarray(ref2),
                               rtol=1e-1, atol=1e-1)

    # NOTE: dropout is identity in eval mode; attention-score stashing
    # (save_attn_scores_to_visualize) is a training-time side effect and is not
    # reproduced.
    print("KERNEL_OK")
</pallas_src>

<mosaic_0001>
module attributes {stable_mosaic.version = 11 : i64} {
  func.func @_encoder_layer_kernel(%arg0: i32, %arg1: i32, %arg2: i32, %arg3: memref<1x4x8x8xf32, #tpu.memory_space<vmem>>, %arg4: memref<1x4x8x8xf32, #tpu.memory_space<vmem>>, %arg5: memref<1x4x8x8xf32, #tpu.memory_space<vmem>>, %arg6: memref<1x8x32xf32, #tpu.memory_space<vmem>>, %arg7: memref<1x1x8xf32, #tpu.memory_space<vmem>>, %arg8: memref<4x8x32xf32, #tpu.memory_space<vmem>>, %arg9: memref<32x64xf32, #tpu.memory_space<vmem>>, %arg10: memref<1x64xf32, #tpu.memory_space<vmem>>, %arg11: memref<64x32xf32, #tpu.memory_space<vmem>>, %arg12: memref<1x32xf32, #tpu.memory_space<vmem>>, %arg13: memref<1x32xf32, #tpu.memory_space<vmem>>, %arg14: memref<1x32xf32, #tpu.memory_space<vmem>>, %arg15: memref<1x32xf32, #tpu.memory_space<vmem>>, %arg16: memref<1x32xf32, #tpu.memory_space<vmem>>, %arg17: memref<1x8x32xf32, #tpu.memory_space<vmem>>, %arg18: memref<4x8x1xf32, #tpu.memory_space<vmem>>, %arg19: memref<4x8x1xf32, #tpu.memory_space<vmem>>, %arg20: memref<4x8x8xf32, #tpu.memory_space<vmem>>) attributes {dimension_semantics = [#tpu.dimension_semantics<parallel>, #tpu.dimension_semantics<parallel>, #tpu.dimension_semantics<arbitrary>], iteration_bounds = array<i64: 2, 1, 1>, scalar_prefetch = 0 : i64, scratch_operands = 3 : i64, tpu.core_type = #tpu.core_type<tc>, window_params = [{transform_indices = @transform_0, window_bounds = array<i64: 1, 4, 8, 8>}, {transform_indices = @transform_1, window_bounds = array<i64: 1, 4, 8, 8>}, {transform_indices = @transform_2, window_bounds = array<i64: 1, 4, 8, 8>}, {transform_indices = @transform_3, window_bounds = array<i64: 1, 8, 32>}, {transform_indices = @transform_4, window_bounds = array<i64: 1, 1, 8>}, {pipeline_mode = #tpu.pipeline_mode<synchronous>, transform_indices = @transform_5, window_bounds = array<i64: 4, 8, 32>}, {pipeline_mode = #tpu.pipeline_mode<synchronous>, transform_indices = @transform_6, window_bounds = array<i64: 32, 64>}, {pipeline_mode = #tpu.pipeline_mode<synchronous>, transform_indices = @transform_7, window_bounds = array<i64: 1, 64>}, {pipeline_mode = #tpu.pipeline_mode<synchronous>, transform_indices = @transform_8, window_bounds = array<i64: 64, 32>}, {pipeline_mode = #tpu.pipeline_mode<synchronous>, transform_indices = @transform_9, window_bounds = array<i64: 1, 32>}, {pipeline_mode = #tpu.pipeline_mode<synchronous>, transform_indices = @transform_10, window_bounds = array<i64: 1, 32>}, {pipeline_mode = #tpu.pipeline_mode<synchronous>, transform_indices = @transform_11, window_bounds = array<i64: 1, 32>}, {pipeline_mode = #tpu.pipeline_mode<synchronous>, transform_indices = @transform_12, window_bounds = array<i64: 1, 32>}, {pipeline_mode = #tpu.pipeline_mode<synchronous>, transform_indices = @transform_13, window_bounds = array<i64: 1, 32>}, {transform_indices = @transform_14, window_bounds = array<i64: 1, 8, 32>}]} {
    %c0_i32 = arith.constant 0 : i32
    %0 = arith.cmpi eq, %arg2, %c0_i32 : i32
    %1 = arith.extui %0 : i1 to i32
    %c0_i32_0 = arith.constant 0 : i32
    %2 = arith.cmpi ne, %1, %c0_i32_0 : i32
    scf.if %2 {
      %cst_41 = arith.constant 0xFF800000 : f32
      %45 = vector.broadcast %cst_41 : f32 to vector<4x8x1xf32>
      %c0_42 = arith.constant 0 : index
      %c0_43 = arith.constant 0 : index
      %c0_44 = arith.constant 0 : index
      %46 = vector.load %arg18[%c0_42, %c0_43, %c0_44] : memref<4x8x1xf32, #tpu.memory_space<vmem>>, vector<4x8x1xf32>
      tpu.vector_store %arg18[%c0_42, %c0_43, %c0_44], %45 {strides = array<i32>} : memref<4x8x1xf32, #tpu.memory_space<vmem>>, vector<4x8x1xf32>,
      %cst_45 = arith.constant 0.000000e+00 : f32
      %47 = vector.broadcast %cst_45 : f32 to vector<4x8x1xf32>
      %c0_46 = arith.constant 0 : index
      %c0_47 = arith.constant 0 : index
      %c0_48 = arith.constant 0 : index
      %48 = vector.load %arg19[%c0_46, %c0_47, %c0_48] : memref<4x8x1xf32, #tpu.memory_space<vmem>>, vector<4x8x1xf32>
      tpu.vector_store %arg19[%c0_46, %c0_47, %c0_48], %47 {strides = array<i32>} : memref<4x8x1xf32, #tpu.memory_space<vmem>>, vector<4x8x1xf32>,
      %cst_49 = arith.constant 0.000000e+00 : f32
      %49 = vector.broadcast %cst_49 : f32 to vector<4x8x8xf32>
      %c0_50 = arith.constant 0 : index
      %c0_51 = arith.constant 0 : index
      %c0_52 = arith.constant 0 : index
      %50 = vector.load %arg20[%c0_50, %c0_51, %c0_52] : memref<4x8x8xf32, #tpu.memory_space<vmem>>, vector<4x8x8xf32>
      tpu.vector_store %arg20[%c0_50, %c0_51, %c0_52], %49 {strides = array<i32>} : memref<4x8x8xf32, #tpu.memory_space<vmem>>, vector<4x8x8xf32>,
    } else {
    }
    %c0 = arith.constant 0 : index
    %c0_1 = arith.constant 0 : index
    %c0_2 = arith.constant 0 : index
    %c0_3 = arith.constant 0 : index
    %3 = vector.load %arg3[%c0, %c0_1, %c0_2, %c0_3] : memref<1x4x8x8xf32, #tpu.memory_space<vmem>>, vector<1x4x8x8xf32>
    %4 = vector.shape_cast %3 : vector<1x4x8x8xf32> to vector<4x8x8xf32>
    %c0_4 = arith.constant 0 : index
    %c0_5 = arith.constant 0 : index
    %c0_6 = arith.constant 0 : index
    %c0_7 = arith.constant 0 : index
    %5 = vector.load %arg4[%c0_4, %c0_5, %c0_6, %c0_7] : memref<1x4x8x8xf32, #tpu.memory_space<vmem>>, vector<1x4x8x8xf32>
    %6 = vector.shape_cast %5 : vector<1x4x8x8xf32> to vector<4x8x8xf32>
    %c0_8 = arith.constant 0 : index
    %c0_9 = arith.constant 0 : index
    %c0_10 = arith.constant 0 : index
    %c0_11 = arith.constant 0 : index
    %7 = vector.load %arg5[%c0_8, %c0_9, %c0_10, %c0_11] : memref<1x4x8x8xf32, #tpu.memory_space<vmem>>, vector<1x4x8x8xf32>
    %8 = vector.shape_cast %7 : vector<1x4x8x8xf32> to vector<4x8x8xf32>
    %c0_12 = arith.constant 0 : index
    %c0_13 = arith.constant 0 : index
    %c0_14 = arith.constant 0 : index
    %9 = vector.load %arg7[%c0_12, %c0_13, %c0_14] : memref<1x1x8xf32, #tpu.memory_space<vmem>>, vector<1x1x8xf32>
    %10 = vector.shape_cast %9 : vector<1x1x8xf32> to vector<1x8xf32>
    "tpu.trace_start"() <{level = 10 : i32, message = "hqd,hkd->hqk"}> : () -> ()
    %cst = arith.constant dense<0.000000e+00> : vector<4x8x8xf32>
    %11 = tpu.matmul %4, %6, %cst {dimension_numbers = #tpu.dot_dimension_numbers<[2], [2], [1], [1], [0, 0, 0, 1, 1, 1], [0], [0]>} : vector<4x8x8xf32>, vector<4x8x8xf32>, vector<4x8x8xf32> -> vector<4x8x8xf32>
    %cst_15 = arith.constant 5.000000e-01 : f32
    "tpu.trace_stop"() : () -> ()
    %12 = vector.broadcast %cst_15 : f32 to vector<1x8xf32>
    %13 = arith.cmpf ogt, %10, %12 : vector<1x8xf32>
    %cst_16 = arith.constant 0.000000e+00 : f32
    %cst_17 = arith.constant -1.000000e+30 : f32
    %14 = vector.broadcast %cst_16 : f32 to vector<1x8xf32>
    %15 = vector.broadcast %cst_17 : f32 to vector<1x8xf32>
    %16 = arith.select %13, %14, %15 : vector<1x8xi1>, vector<1x8xf32>
    %17 = vector.shape_cast %16 : vector<1x8xf32> to vector<1x1x8xf32>
    %18 = vector.broadcast %17 : vector<1x1x8xf32> to vector<4x8x8xf32>
    %19 = arith.addf %11, %18 : vector<4x8x8xf32>
    %c0_18 = arith.constant 0 : index
    %c0_19 = arith.constant 0 : index
    %c0_20 = arith.constant 0 : index
    %20 = vector.load %arg18[%c0_18, %c0_19, %c0_20] : memref<4x8x1xf32, #tpu.memory_space<vmem>>, vector<4x8x1xf32>
    %cst_21 = arith.constant dense<0xFF800000> : vector<4x8xf32>
    %21 = vector.multi_reduction <maximumf>, %19, %cst_21 [2] : vector<4x8x8xf32> to vector<4x8xf32>
    %22 = vector.shape_cast %21 : vector<4x8xf32> to vector<4x8x1xf32>
    %23 = arith.maximumf %20, %22 : vector<4x8x1xf32>
    %24 = arith.subf %20, %23 : vector<4x8x1xf32>
    %25 = math.exp %24 : vector<4x8x1xf32>
    %26 = vector.broadcast %23 : vector<4x8x1xf32> to vector<4x8x8xf32>
    %27 = arith.subf %19, %26 : vector<4x8x8xf32>
    %28 = math.exp %27 : vector<4x8x8xf32>
    %c0_22 = arith.constant 0 : index
    %c0_23 = arith.constant 0 : index
    %c0_24 = arith.constant 0 : index
    %29 = vector.load %arg19[%c0_22, %c0_23, %c0_24] : memref<4x8x1xf32, #tpu.memory_space<vmem>>, vector<4x8x1xf32>
    %30 = arith.mulf %25, %29 : vector<4x8x1xf32>
    %cst_25 = arith.constant dense<0.000000e+00> : vector<4x8xf32>
    %31 = vector.multi_reduction <add>, %28, %cst_25 [2] : vector<4x8x8xf32> to vector<4x8xf32>
    %32 = vector.shape_cast %31 : vector<4x8xf32> to vector<4x8x1xf32>
    %33 = arith.addf %30, %32 : vector<4x8x1xf32>
    %c0_26 = arith.constant 0 : index
    %c0_27 = arith.constant 0 : index
    %c0_28 = arith.constant 0 : index
    %34 = vector.load %arg19[%c0_26, %c0_27, %c0_28] : memref<4x8x1xf32, #tpu.memory_space<vmem>>, vector<4x8x1xf32>
    tpu.vector_store %arg19[%c0_26, %c0_27, %c0_28], %33 {strides = array<i32>} : memref<4x8x1xf32, #tpu.memory_space<vmem>>, vector<4x8x1xf32>,
    %c0_29 = arith.constant 0 : index
    %c0_30 = arith.constant 0 : index
    %c0_31 = arith.constant 0 : index
    %35 = vector.load %arg20[%c0_29, %c0_30, %c0_31] : memref<4x8x8xf32, #tpu.memory_space<vmem>>, vector<4x8x8xf32>
    %36 = vector.broadcast %25 : vector<4x8x1xf32> to vector<4x8x8xf32>
    %37 = arith.mulf %36, %35 : vector<4x8x8xf32>
    "tpu.trace_start"() <{level = 10 : i32, message = "hqk,hkd->hqd"}> : () -> ()
    %cst_32 = arith.constant dense<0.000000e+00> : vector<4x8x8xf32>
    %38 = tpu.matmul %28, %8, %cst_32 {dimension_numbers = #tpu.dot_dimension_numbers<[2], [1], [1], [2], [0, 0, 0, 1, 1, 2], [0], [0]>} : vector<4x8x8xf32>, vector<4x8x8xf32>, vector<4x8x8xf32> -> vector<4x8x8xf32>
    "tpu.trace_stop"() : () -> ()
    %39 = arith.addf %37, %38 : vector<4x8x8xf32>
    %c0_33 = arith.constant 0 : index
    %c0_34 = arith.constant 0 : index
    %c0_35 = arith.constant 0 : index
    %40 = vector.load %arg20[%c0_33, %c0_34, %c0_35] : memref<4x8x8xf32, #tpu.memory_space<vmem>>, vector<4x8x8xf32>
    tpu.vector_store %arg20[%c0_33, %c0_34, %c0_35], %39 {strides = array<i32>} : memref<4x8x8xf32, #tpu.memory_space<vmem>>, vector<4x8x8xf32>,
    %c0_36 = arith.constant 0 : index
    %c0_37 = arith.constant 0 : index
    %c0_38 = arith.constant 0 : index
    %41 = vector.load %arg18[%c0_36, %c0_37, %c0_38] : memref<4x8x1xf32, #tpu.memory_space<vmem>>, vector<4x8x1xf32>
    tpu.vector_store %arg18[%c0_36, %c0_37, %c0_38], %23 {strides = array<i32>} : memref<4x8x1xf32, #tpu.memory_space<vmem>>, vector<4x8x1xf32>,
    %c0_i32_39 = arith.constant 0 : i32
    %42 = arith.cmpi eq, %arg2, %c0_i32_39 : i32
    %43 = arith.extui %42 : i1 to i32
    %c0_i32_40 = arith.constant 0 : i32
    %44 = arith.cmpi ne, %43, %c0_i32_40 : i32
    scf.if %44 {
      %c0_41 = arith.constant 0 : index
      %c0_42 = arith.constant 0 : index
      %c0_43 = arith.constant 0 : index
      %45 = vector.load %arg19[%c0_41, %c0_42, %c0_43] : memref<4x8x1xf32, #tpu.memory_space<vmem>>, vector<4x8x1xf32>
      %46 = tpu.reciprocal %45 : vector<4x8x1xf32> -> vector<4x8x1xf32>
      %c0_44 = arith.constant 0 : index
      %c0_45 = arith.constant 0 : index
      %c0_46 = arith.constant 0 : index
      %47 = vector.load %arg20[%c0_44, %c0_45, %c0_46] : memref<4x8x8xf32, #tpu.memory_space<vmem>>, vector<4x8x8xf32>
      %48 = vector.broadcast %46 : vector<4x8x1xf32> to vector<4x8x8xf32>
      %49 = arith.mulf %47, %48 : vector<4x8x8xf32>
      %c0_47 = arith.constant 0 : index
      %c0_48 = arith.constant 0 : index
      %c0_49 = arith.constant 0 : index
      %50 = vector.load %arg8[%c0_47, %c0_48, %c0_49] : memref<4x8x32xf32, #tpu.memory_space<vmem>>, vector<4x8x32xf32>
      "tpu.trace_start"() <{level = 10 : i32, message = "hqd,hdm->hqm"}> : () -> ()
      %cst_50 = arith.constant dense<0.000000e+00> : vector<4x8x32xf32>
      %51 = tpu.matmul %49, %50, %cst_50 {dimension_numbers = #tpu.dot_dimension_numbers<[2], [1], [1], [2], [0, 0, 0, 1, 1, 2], [0], [0]>} : vector<4x8x8xf32>, vector<4x8x32xf32>, vector<4x8x32xf32> -> vector<4x8x32xf32>
      "tpu.trace_stop"() : () -> ()
      %cst_51 = arith.constant dense<0.000000e+00> : vector<8x32xf32>
      %52 = vector.multi_reduction <add>, %51, %cst_51 [0] : vector<4x8x32xf32> to vector<8x32xf32>
      %c0_52 = arith.constant 0 : index
      %c0_53 = arith.constant 0 : index
      %c0_54 = arith.constant 0 : index
      %53 = vector.load %arg6[%c0_52, %c0_53, %c0_54] : memref<1x8x32xf32, #tpu.memory_space<vmem>>, vector<1x8x32xf32>
      %54 = vector.shape_cast %53 : vector<1x8x32xf32> to vector<8x32xf32>
      %55 = arith.addf %52, %54 : vector<8x32xf32>
      %cst_55 = arith.constant dense<0.000000e+00> : vector<8xf32>
      %56 = vector.multi_reduction <add>, %55, %cst_55 [1] : vector<8x32xf32> to vector<8xf32>
      %57 = vector.shape_cast %56 : vector<8xf32> to vector<8x1xf32>
      %cst_56 = arith.constant 3.200000e+01 : f32
      %58 = vector.broadcast %cst_56 : f32 to vector<8x1xf32>
      %59 = arith.divf %57, %58 : vector<8x1xf32>
      %60 = vector.broadcast %59 : vector<8x1xf32> to vector<8x32xf32>
      %61 = arith.subf %55, %60 : vector<8x32xf32>
      %62 = arith.mulf %61, %61 : vector<8x32xf32>
      %cst_57 = arith.constant dense<0.000000e+00> : vector<8xf32>
      %63 = vector.multi_reduction <add>, %62, %cst_57 [1] : vector<8x32xf32> to vector<8xf32>
      %64 = vector.shape_cast %63 : vector<8xf32> to vector<8x1xf32>
      %cst_58 = arith.constant 3.200000e+01 : f32
      %65 = vector.broadcast %cst_58 : f32 to vector<8x1xf32>
      %66 = arith.divf %64, %65 : vector<8x1xf32>
      %67 = vector.broadcast %59 : vector<8x1xf32> to vector<8x32xf32>
      %68 = arith.subf %55, %67 : vector<8x32xf32>
      %cst_59 = arith.constant 9.99999974E-6 : f32
      %69 = vector.broadcast %cst_59 : f32 to vector<8x1xf32>
      %70 = arith.addf %66, %69 : vector<8x1xf32>
      %71 = math.rsqrt %70 : vector<8x1xf32>
      %72 = vector.broadcast %71 : vector<8x1xf32> to vector<8x32xf32>
      %73 = arith.mulf %68, %72 : vector<8x32xf32>
      %c0_60 = arith.constant 0 : index
      %c0_61 = arith.constant 0 : index
      %74 = vector.load %arg13[%c0_60, %c0_61] : memref<1x32xf32, #tpu.memory_space<vmem>>, vector<1x32xf32>
      %75 = vector.broadcast %74 : vector<1x32xf32> to vector<8x32xf32>
      %76 = arith.mulf %73, %75 : vector<8x32xf32>
      %c0_62 = arith.constant 0 : index
      %c0_63 = arith.constant 0 : index
      %77 = vector.load %arg14[%c0_62, %c0_63] : memref<1x32xf32, #tpu.memory_space<vmem>>, vector<1x32xf32>
      %78 = vector.broadcast %77 : vector<1x32xf32> to vector<8x32xf32>
      %79 = arith.addf %76, %78 : vector<8x32xf32>
      %c0_64 = arith.constant 0 : index
      %c0_65 = arith.constant 0 : index
      %80 = vector.load %arg9[%c0_64, %c0_65] : memref<32x64xf32, #tpu.memory_space<vmem>>, vector<32x64xf32>
      %cst_66 = arith.constant dense<0.000000e+00> : vector<8x64xf32>
      %81 = tpu.matmul %79, %80, %cst_66 {dimension_numbers = #tpu.dot_dimension_numbers<[1], [0], [0], [1], [0, 0, 1, 1], [], []>} : vector<8x32xf32>, vector<32x64xf32>, vector<8x64xf32> -> vector<8x64xf32>
      %c0_67 = arith.constant 0 : index
      %c0_68 = arith.constant 0 : index
      %82 = vector.load %arg10[%c0_67, %c0_68] : memref<1x64xf32, #tpu.memory_space<vmem>>, vector<1x64xf32>
      %83 = vector.broadcast %82 : vector<1x64xf32> to vector<8x64xf32>
      %84 = arith.addf %81, %83 : vector<8x64xf32>
      %cst_69 = arith.constant 0.000000e+00 : f32
      %85 = vector.broadcast %cst_69 : f32 to vector<8x64xf32>
      %86 = arith.maximumf %84, %85 : vector<8x64xf32>
      %c0_70 = arith.constant 0 : index
      %c0_71 = arith.constant 0 : index
      %87 = vector.load %arg11[%c0_70, %c0_71] : memref<64x32xf32, #tpu.memory_space<vmem>>, vector<64x32xf32>
      %cst_72 = arith.constant dense<0.000000e+00> : vector<8x32xf32>
      %88 = tpu.matmul %86, %87, %cst_72 {dimension_numbers = #tpu.dot_dimension_numbers<[1], [0], [0], [1], [0, 0, 1, 1], [], []>} : vector<8x64xf32>, vector<64x32xf32>, vector<8x32xf32> -> vector<8x32xf32>
      %c0_73 = arith.constant 0 : index
      %c0_74 = arith.constant 0 : index
      %89 = vector.load %arg12[%c0_73, %c0_74] : memref<1x32xf32, #tpu.memory_space<vmem>>, vector<1x32xf32>
      %90 = vector.broadcast %89 : vector<1x32xf32> to vector<8x32xf32>
      %91 = arith.addf %88, %90 : vector<8x32xf32>
      %92 = arith.addf %91, %79 : vector<8x32xf32>
      %cst_75 = arith.constant dense<0.000000e+00> : vector<8xf32>
      %93 = vector.multi_reduction <add>, %92, %cst_75 [1] : vector<8x32xf32> to vector<8xf32>
      %94 = vector.shape_cast %93 : vector<8xf32> to vector<8x1xf32>
      %cst_76 = arith.constant 3.200000e+01 : f32
      %95 = vector.broadcast %cst_76 : f32 to vector<8x1xf32>
      %96 = arith.divf %94, %95 : vector<8x1xf32>
      %97 = vector.broadcast %96 : vector<8x1xf32> to vector<8x32xf32>
      %98 = arith.subf %92, %97 : vector<8x32xf32>
      %99 = arith.mulf %98, %98 : vector<8x32xf32>
      %cst_77 = arith.constant dense<0.000000e+00> : vector<8xf32>
      %100 = vector.multi_reduction <add>, %99, %cst_77 [1] : vector<8x32xf32> to vector<8xf32>
      %101 = vector.shape_cast %100 : vector<8xf32> to vector<8x1xf32>
      %cst_78 = arith.constant 3.200000e+01 : f32
      %102 = vector.broadcast %cst_78 : f32 to vector<8x1xf32>
      %103 = arith.divf %101, %102 : vector<8x1xf32>
      %104 = vector.broadcast %96 : vector<8x1xf32> to vector<8x32xf32>
      %105 = arith.subf %92, %104 : vector<8x32xf32>
      %cst_79 = arith.constant 9.99999974E-6 : f32
      %106 = vector.broadcast %cst_79 : f32 to vector<8x1xf32>
      %107 = arith.addf %103, %106 : vector<8x1xf32>
      %108 = math.rsqrt %107 : vector<8x1xf32>
      %109 = vector.broadcast %108 : vector<8x1xf32> to vector<8x32xf32>
      %110 = arith.mulf %105, %109 : vector<8x32xf32>
      %c0_80 = arith.constant 0 : index
      %c0_81 = arith.constant 0 : index
      %111 = vector.load %arg15[%c0_80, %c0_81] : memref<1x32xf32, #tpu.memory_space<vmem>>, vector<1x32xf32>
      %112 = vector.broadcast %111 : vector<1x32xf32> to vector<8x32xf32>
      %113 = arith.mulf %110, %112 : vector<8x32xf32>
      %c0_82 = arith.constant 0 : index
      %c0_83 = arith.constant 0 : index
      %114 = vector.load %arg16[%c0_82, %c0_83] : memref<1x32xf32, #tpu.memory_space<vmem>>, vector<1x32xf32>
      %115 = vector.broadcast %114 : vector<1x32xf32> to vector<8x32xf32>
      %116 = arith.addf %113, %115 : vector<8x32xf32>
      %c0_84 = arith.constant 0 : index
      %c0_85 = arith.constant 0 : index
      %c0_86 = arith.constant 0 : index
      %117 = vector.load %arg17[%c0_84, %c0_85, %c0_86] : memref<1x8x32xf32, #tpu.memory_space<vmem>>, vector<1x8x32xf32>
      %118 = vector.shape_cast %117 : vector<1x8x32xf32> to vector<8x32xf32>
      %119 = vector.shape_cast %116 : vector<8x32xf32> to vector<1x8x32xf32>
      tpu.vector_store %arg17[%c0_84, %c0_85, %c0_86], %119 {strides = array<i32>} : memref<1x8x32xf32, #tpu.memory_space<vmem>>, vector<1x8x32xf32>,
    } else {
    }
    return
  }
  func.func @transform_0(%arg0: i32, %arg1: i32, %arg2: i32) -> (i32, i32, i32, i32) {
    %c0_i32 = arith.constant 0 : i32
    %c0_i32_0 = arith.constant 0 : i32
    %c0_i32_1 = arith.constant 0 : i32
    return %arg0, %c0_i32, %arg1, %c0_i32_0 : i32, i32, i32, i32
  }
  func.func @transform_1(%arg0: i32, %arg1: i32, %arg2: i32) -> (i32, i32, i32, i32) {
    %c0_i32 = arith.constant 0 : i32
    %c0_i32_0 = arith.constant 0 : i32
    %c0_i32_1 = arith.constant 0 : i32
    return %arg0, %c0_i32, %arg2, %c0_i32_0 : i32, i32, i32, i32
  }
  func.func @transform_2(%arg0: i32, %arg1: i32, %arg2: i32) -> (i32, i32, i32, i32) {
    %c0_i32 = arith.constant 0 : i32
    %c0_i32_0 = arith.constant 0 : i32
    %c0_i32_1 = arith.constant 0 : i32
    return %arg0, %c0_i32, %arg2, %c0_i32_0 : i32, i32, i32, i32
  }
  func.func @transform_3(%arg0: i32, %arg1: i32, %arg2: i32) -> (i32, i32, i32) {
    %c0_i32 = arith.constant 0 : i32
    %c0_i32_0 = arith.constant 0 : i32
    return %arg0, %arg1, %c0_i32 : i32, i32, i32
  }
  func.func @transform_4(%arg0: i32, %arg1: i32, %arg2: i32) -> (i32, i32, i32) {
    %c0_i32 = arith.constant 0 : i32
    %c0_i32_0 = arith.constant 0 : i32
    return %arg0, %c0_i32, %arg2 : i32, i32, i32
  }
  func.func @transform_5(%arg0: i32, %arg1: i32, %arg2: i32) -> (i32, i32, i32) {
    %c0_i32 = arith.constant 0 : i32
    %c0_i32_0 = arith.constant 0 : i32
    %c0_i32_1 = arith.constant 0 : i32
    %c0_i32_2 = arith.constant 0 : i32
    return %c0_i32, %c0_i32_0, %c0_i32_1 : i32, i32, i32
  }
  func.func @transform_6(%arg0: i32, %arg1: i32, %arg2: i32) -> (i32, i32) {
    %c0_i32 = arith.constant 0 : i32
    %c0_i32_0 = arith.constant 0 : i32
    %c0_i32_1 = arith.constant 0 : i32
    return %c0_i32, %c0_i32_0 : i32, i32
  }
  func.func @transform_7(%arg0: i32, %arg1: i32, %arg2: i32) -> (i32, i32) {
    %c0_i32 = arith.constant 0 : i32
    %c0_i32_0 = arith.constant 0 : i32
    %c0_i32_1 = arith.constant 0 : i32
    return %c0_i32, %c0_i32_0 : i32, i32
  }
  func.func @transform_8(%arg0: i32, %arg1: i32, %arg2: i32) -> (i32, i32) {
    %c0_i32 = arith.constant 0 : i32
    %c0_i32_0 = arith.constant 0 : i32
    %c0_i32_1 = arith.constant 0 : i32
    return %c0_i32, %c0_i32_0 : i32, i32
  }
  func.func @transform_9(%arg0: i32, %arg1: i32, %arg2: i32) -> (i32, i32) {
    %c0_i32 = arith.constant 0 : i32
    %c0_i32_0 = arith.constant 0 : i32
    %c0_i32_1 = arith.constant 0 : i32
    return %c0_i32, %c0_i32_0 : i32, i32
  }
  func.func @transform_10(%arg0: i32, %arg1: i32, %arg2: i32) -> (i32, i32) {
    %c0_i32 = arith.constant 0 : i32
    %c0_i32_0 = arith.constant 0 : i32
    %c0_i32_1 = arith.constant 0 : i32
    return %c0_i32, %c0_i32_0 : i32, i32
  }
  func.func @transform_11(%arg0: i32, %arg1: i32, %arg2: i32) -> (i32, i32) {
    %c0_i32 = arith.constant 0 : i32
    %c0_i32_0 = arith.constant 0 : i32
    %c0_i32_1 = arith.constant 0 : i32
    return %c0_i32, %c0_i32_0 : i32, i32
  }
  func.func @transform_12(%arg0: i32, %arg1: i32, %arg2: i32) -> (i32, i32) {
    %c0_i32 = arith.constant 0 : i32
    %c0_i32_0 = arith.constant 0 : i32
    %c0_i32_1 = arith.constant 0 : i32
    return %c0_i32, %c0_i32_0 : i32, i32
  }
  func.func @transform_13(%arg0: i32, %arg1: i32, %arg2: i32) -> (i32, i32) {
    %c0_i32 = arith.constant 0 : i32
    %c0_i32_0 = arith.constant 0 : i32
    %c0_i32_1 = arith.constant 0 : i32
    return %c0_i32, %c0_i32_0 : i32, i32
  }
  func.func @transform_14(%arg0: i32, %arg1: i32, %arg2: i32) -> (i32, i32, i32) {
    %c0_i32 = arith.constant 0 : i32
    %c0_i32_0 = arith.constant 0 : i32
    return %arg0, %arg1, %c0_i32 : i32, i32, i32
  }
}

module attributes {stable_mosaic.version = 11 : i64} {
  func.func @_encoder_layer_kernel(%arg0: i32, %arg1: i32, %arg2: i32, %arg3: memref<1x4x8x8xf32, #tpu.memory_space<vmem>>, %arg4: memref<1x4x8x8xf32, #tpu.memory_space<vmem>>, %arg5: memref<1x4x8x8xf32, #tpu.memory_space<vmem>>, %arg6: memref<1x8x32xf32, #tpu.memory_space<vmem>>, %arg7: memref<1x1x8xf32, #tpu.memory_space<vmem>>, %arg8: memref<4x8x32xf32, #tpu.memory_space<vmem>>, %arg9: memref<32x64xf32, #tpu.memory_space<vmem>>, %arg10: memref<1x64xf32, #tpu.memory_space<vmem>>, %arg11: memref<64x32xf32, #tpu.memory_space<vmem>>, %arg12: memref<1x32xf32, #tpu.memory_space<vmem>>, %arg13: memref<1x32xf32, #tpu.memory_space<vmem>>, %arg14: memref<1x32xf32, #tpu.memory_space<vmem>>, %arg15: memref<1x32xf32, #tpu.memory_space<vmem>>, %arg16: memref<1x32xf32, #tpu.memory_space<vmem>>, %arg17: memref<1x8x32xf32, #tpu.memory_space<vmem>>, %arg18: memref<4x8x1xf32, #tpu.memory_space<vmem>>, %arg19: memref<4x8x1xf32, #tpu.memory_space<vmem>>, %arg20: memref<4x8x8xf32, #tpu.memory_space<vmem>>) attributes {dimension_semantics = [#tpu.dimension_semantics<parallel>, #tpu.dimension_semantics<parallel>, #tpu.dimension_semantics<arbitrary>], iteration_bounds = array<i64: 2, 1, 1>, scalar_prefetch = 0 : i64, scratch_operands = 3 : i64, tpu.core_type = #tpu.core_type<tc>, window_params = [{transform_indices = @transform_0, window_bounds = array<i64: 1, 4, 8, 8>}, {transform_indices = @transform_1, window_bounds = array<i64: 1, 4, 8, 8>}, {transform_indices = @transform_2, window_bounds = array<i64: 1, 4, 8, 8>}, {transform_indices = @transform_3, window_bounds = array<i64: 1, 8, 32>}, {transform_indices = @transform_4, window_bounds = array<i64: 1, 1, 8>}, {pipeline_mode = #tpu.pipeline_mode<synchronous>, transform_indices = @transform_5, window_bounds = array<i64: 4, 8, 32>}, {pipeline_mode = #tpu.pipeline_mode<synchronous>, transform_indices = @transform_6, window_bounds = array<i64: 32, 64>}, {pipeline_mode = #tpu.pipeline_mode<synchronous>, transform_indices = @transform_7, window_bounds = array<i64: 1, 64>}, {pipeline_mode = #tpu.pipeline_mode<synchronous>, transform_indices = @transform_8, window_bounds = array<i64: 64, 32>}, {pipeline_mode = #tpu.pipeline_mode<synchronous>, transform_indices = @transform_9, window_bounds = array<i64: 1, 32>}, {pipeline_mode = #tpu.pipeline_mode<synchronous>, transform_indices = @transform_10, window_bounds = array<i64: 1, 32>}, {pipeline_mode = #tpu.pipeline_mode<synchronous>, transform_indices = @transform_11, window_bounds = array<i64: 1, 32>}, {pipeline_mode = #tpu.pipeline_mode<synchronous>, transform_indices = @transform_12, window_bounds = array<i64: 1, 32>}, {pipeline_mode = #tpu.pipeline_mode<synchronous>, transform_indices = @transform_13, window_bounds = array<i64: 1, 32>}, {transform_indices = @transform_14, window_bounds = array<i64: 1, 8, 32>}]} {
    %c0_i32 = arith.constant 0 : i32
    %0 = arith.cmpi eq, %arg2, %c0_i32 : i32
    %1 = arith.extui %0 : i1 to i32
    %c0_i32_0 = arith.constant 0 : i32
    %2 = arith.cmpi ne, %1, %c0_i32_0 : i32
    scf.if %2 {
      %cst_41 = arith.constant 0xFF800000 : f32
      %45 = vector.broadcast %cst_41 : f32 to vector<4x8x1xf32>
      %c0_42 = arith.constant 0 : index
      %c0_43 = arith.constant 0 : index
      %c0_44 = arith.constant 0 : index
      %46 = vector.load %arg18[%c0_42, %c0_43, %c0_44] : memref<4x8x1xf32, #tpu.memory_space<vmem>>, vector<4x8x1xf32>
      tpu.vector_store %arg18[%c0_42, %c0_43, %c0_44], %45 {strides = array<i32>} : memref<4x8x1xf32, #tpu.memory_space<vmem>>, vector<4x8x1xf32>,
      %cst_45 = arith.constant 0.000000e+00 : f32
      %47 = vector.broadcast %cst_45 : f32 to vector<4x8x1xf32>
      %c0_46 = arith.constant 0 : index
      %c0_47 = arith.constant 0 : index
      %c0_48 = arith.constant 0 : index
      %48 = vector.load %arg19[%c0_46, %c0_47, %c0_48] : memref<4x8x1xf32, #tpu.memory_space<vmem>>, vector<4x8x1xf32>
      tpu.vector_store %arg19[%c0_46, %c0_47, %c0_48], %47 {strides = array<i32>} : memref<4x8x1xf32, #tpu.memory_space<vmem>>, vector<4x8x1xf32>,
      %cst_49 = arith.constant 0.000000e+00 : f32
      %49 = vector.broadcast %cst_49 : f32 to vector<4x8x8xf32>
      %c0_50 = arith.constant 0 : index
      %c0_51 = arith.constant 0 : index
      %c0_52 = arith.constant 0 : index
      %50 = vector.load %arg20[%c0_50, %c0_51, %c0_52] : memref<4x8x8xf32, #tpu.memory_space<vmem>>, vector<4x8x8xf32>
      tpu.vector_store %arg20[%c0_50, %c0_51, %c0_52], %49 {strides = array<i32>} : memref<4x8x8xf32, #tpu.memory_space<vmem>>, vector<4x8x8xf32>,
    } else {
    }
    %c0 = arith.constant 0 : index
    %c0_1 = arith.constant 0 : index
    %c0_2 = arith.constant 0 : index
    %c0_3 = arith.constant 0 : index
    %3 = vector.load %arg3[%c0, %c0_1, %c0_2, %c0_3] : memref<1x4x8x8xf32, #tpu.memory_space<vmem>>, vector<1x4x8x8xf32>
    %4 = vector.shape_cast %3 : vector<1x4x8x8xf32> to vector<4x8x8xf32>
    %c0_4 = arith.constant 0 : index
    %c0_5 = arith.constant 0 : index
    %c0_6 = arith.constant 0 : index
    %c0_7 = arith.constant 0 : index
    %5 = vector.load %arg4[%c0_4, %c0_5, %c0_6, %c0_7] : memref<1x4x8x8xf32, #tpu.memory_space<vmem>>, vector<1x4x8x8xf32>
    %6 = vector.shape_cast %5 : vector<1x4x8x8xf32> to vector<4x8x8xf32>
    %c0_8 = arith.constant 0 : index
    %c0_9 = arith.constant 0 : index
    %c0_10 = arith.constant 0 : index
    %c0_11 = arith.constant 0 : index
    %7 = vector.load %arg5[%c0_8, %c0_9, %c0_10, %c0_11] : memref<1x4x8x8xf32, #tpu.memory_space<vmem>>, vector<1x4x8x8xf32>
    %8 = vector.shape_cast %7 : vector<1x4x8x8xf32> to vector<4x8x8xf32>
    %c0_12 = arith.constant 0 : index
    %c0_13 = arith.constant 0 : index
    %c0_14 = arith.constant 0 : index
    %9 = vector.load %arg7[%c0_12, %c0_13, %c0_14] : memref<1x1x8xf32, #tpu.memory_space<vmem>>, vector<1x1x8xf32>
    %10 = vector.shape_cast %9 : vector<1x1x8xf32> to vector<1x8xf32>
    "tpu.trace_start"() <{level = 10 : i32, message = "hqd,hkd->hqk"}> : () -> ()
    %cst = arith.constant dense<0.000000e+00> : vector<4x8x8xf32>
    %11 = tpu.matmul %4, %6, %cst {dimension_numbers = #tpu.dot_dimension_numbers<[2], [2], [1], [1], [0, 0, 0, 1, 1, 1], [0], [0]>} : vector<4x8x8xf32>, vector<4x8x8xf32>, vector<4x8x8xf32> -> vector<4x8x8xf32>
    %cst_15 = arith.constant 5.000000e-01 : f32
    "tpu.trace_stop"() : () -> ()
    %12 = vector.broadcast %cst_15 : f32 to vector<1x8xf32>
    %13 = arith.cmpf ogt, %10, %12 : vector<1x8xf32>
    %cst_16 = arith.constant 0.000000e+00 : f32
    %cst_17 = arith.constant -1.000000e+30 : f32
    %14 = vector.broadcast %cst_16 : f32 to vector<1x8xf32>
    %15 = vector.broadcast %cst_17 : f32 to vector<1x8xf32>
    %16 = arith.select %13, %14, %15 : vector<1x8xi1>, vector<1x8xf32>
    %17 = vector.shape_cast %16 : vector<1x8xf32> to vector<1x1x8xf32>
    %18 = vector.broadcast %17 : vector<1x1x8xf32> to vector<4x8x8xf32>
    %19 = arith.addf %11, %18 : vector<4x8x8xf32>
    %c0_18 = arith.constant 0 : index
    %c0_19 = arith.constant 0 : index
    %c0_20 = arith.constant 0 : index
    %20 = vector.load %arg18[%c0_18, %c0_19, %c0_20] : memref<4x8x1xf32, #tpu.memory_space<vmem>>, vector<4x8x1xf32>
    %cst_21 = arith.constant dense<0xFF800000> : vector<4x8xf32>
    %21 = vector.multi_reduction <maximumf>, %19, %cst_21 [2] : vector<4x8x8xf32> to vector<4x8xf32>
    %22 = vector.shape_cast %21 : vector<4x8xf32> to vector<4x8x1xf32>
    %23 = arith.maximumf %20, %22 : vector<4x8x1xf32>
    %24 = arith.subf %20, %23 : vector<4x8x1xf32>
    %25 = math.exp %24 : vector<4x8x1xf32>
    %26 = vector.broadcast %23 : vector<4x8x1xf32> to vector<4x8x8xf32>
    %27 = arith.subf %19, %26 : vector<4x8x8xf32>
    %28 = math.exp %27 : vector<4x8x8xf32>
    %c0_22 = arith.constant 0 : index
    %c0_23 = arith.constant 0 : index
    %c0_24 = arith.constant 0 : index
    %29 = vector.load %arg19[%c0_22, %c0_23, %c0_24] : memref<4x8x1xf32, #tpu.memory_space<vmem>>, vector<4x8x1xf32>
    %30 = arith.mulf %25, %29 : vector<4x8x1xf32>
    %cst_25 = arith.constant dense<0.000000e+00> : vector<4x8xf32>
    %31 = vector.multi_reduction <add>, %28, %cst_25 [2] : vector<4x8x8xf32> to vector<4x8xf32>
    %32 = vector.shape_cast %31 : vector<4x8xf32> to vector<4x8x1xf32>
    %33 = arith.addf %30, %32 : vector<4x8x1xf32>
    %c0_26 = arith.constant 0 : index
    %c0_27 = arith.constant 0 : index
    %c0_28 = arith.constant 0 : index
    %34 = vector.load %arg19[%c0_26, %c0_27, %c0_28] : memref<4x8x1xf32, #tpu.memory_space<vmem>>, vector<4x8x1xf32>
    tpu.vector_store %arg19[%c0_26, %c0_27, %c0_28], %33 {strides = array<i32>} : memref<4x8x1xf32, #tpu.memory_space<vmem>>, vector<4x8x1xf32>,
    %c0_29 = arith.constant 0 : index
    %c0_30 = arith.constant 0 : index
    %c0_31 = arith.constant 0 : index
    %35 = vector.load %arg20[%c0_29, %c0_30, %c0_31] : memref<4x8x8xf32, #tpu.memory_space<vmem>>, vector<4x8x8xf32>
    %36 = vector.broadcast %25 : vector<4x8x1xf32> to vector<4x8x8xf32>
    %37 = arith.mulf %36, %35 : vector<4x8x8xf32>
    "tpu.trace_start"() <{level = 10 : i32, message = "hqk,hkd->hqd"}> : () -> ()
    %cst_32 = arith.constant dense<0.000000e+00> : vector<4x8x8xf32>
    %38 = tpu.matmul %28, %8, %cst_32 {dimension_numbers = #tpu.dot_dimension_numbers<[2], [1], [1], [2], [0, 0, 0, 1, 1, 2], [0], [0]>} : vector<4x8x8xf32>, vector<4x8x8xf32>, vector<4x8x8xf32> -> vector<4x8x8xf32>
    "tpu.trace_stop"() : () -> ()
    %39 = arith.addf %37, %38 : vector<4x8x8xf32>
    %c0_33 = arith.constant 0 : index
    %c0_34 = arith.constant 0 : index
    %c0_35 = arith.constant 0 : index
    %40 = vector.load %arg20[%c0_33, %c0_34, %c0_35] : memref<4x8x8xf32, #tpu.memory_space<vmem>>, vector<4x8x8xf32>
    tpu.vector_store %arg20[%c0_33, %c0_34, %c0_35], %39 {strides = array<i32>} : memref<4x8x8xf32, #tpu.memory_space<vmem>>, vector<4x8x8xf32>,
    %c0_36 = arith.constant 0 : index
    %c0_37 = arith.constant 0 : index
    %c0_38 = arith.constant 0 : index
    %41 = vector.load %arg18[%c0_36, %c0_37, %c0_38] : memref<4x8x1xf32, #tpu.memory_space<vmem>>, vector<4x8x1xf32>
    tpu.vector_store %arg18[%c0_36, %c0_37, %c0_38], %23 {strides = array<i32>} : memref<4x8x1xf32, #tpu.memory_space<vmem>>, vector<4x8x1xf32>,
    %c0_i32_39 = arith.constant 0 : i32
    %42 = arith.cmpi eq, %arg2, %c0_i32_39 : i32
    %43 = arith.extui %42 : i1 to i32
    %c0_i32_40 = arith.constant 0 : i32
    %44 = arith.cmpi ne, %43, %c0_i32_40 : i32
    scf.if %44 {
      %c0_41 = arith.constant 0 : index
      %c0_42 = arith.constant 0 : index
      %c0_43 = arith.constant 0 : index
      %45 = vector.load %arg19[%c0_41, %c0_42, %c0_43] : memref<4x8x1xf32, #tpu.memory_space<vmem>>, vector<4x8x1xf32>
      %46 = tpu.reciprocal %45 : vector<4x8x1xf32> -> vector<4x8x1xf32>
      %c0_44 = arith.constant 0 : index
      %c0_45 = arith.constant 0 : index
      %c0_46 = arith.constant 0 : index
      %47 = vector.load %arg20[%c0_44, %c0_45, %c0_46] : memref<4x8x8xf32, #tpu.memory_space<vmem>>, vector<4x8x8xf32>
      %48 = vector.broadcast %46 : vector<4x8x1xf32> to vector<4x8x8xf32>
      %49 = arith.mulf %47, %48 : vector<4x8x8xf32>
      %c0_47 = arith.constant 0 : index
      %c0_48 = arith.constant 0 : index
      %c0_49 = arith.constant 0 : index
      %50 = vector.load %arg8[%c0_47, %c0_48, %c0_49] : memref<4x8x32xf32, #tpu.memory_space<vmem>>, vector<4x8x32xf32>
      "tpu.trace_start"() <{level = 10 : i32, message = "hqd,hdm->hqm"}> : () -> ()
      %cst_50 = arith.constant dense<0.000000e+00> : vector<4x8x32xf32>
      %51 = tpu.matmul %49, %50, %cst_50 {dimension_numbers = #tpu.dot_dimension_numbers<[2], [1], [1], [2], [0, 0, 0, 1, 1, 2], [0], [0]>} : vector<4x8x8xf32>, vector<4x8x32xf32>, vector<4x8x32xf32> -> vector<4x8x32xf32>
      "tpu.trace_stop"() : () -> ()
      %cst_51 = arith.constant dense<0.000000e+00> : vector<8x32xf32>
      %52 = vector.multi_reduction <add>, %51, %cst_51 [0] : vector<4x8x32xf32> to vector<8x32xf32>
      %c0_52 = arith.constant 0 : index
      %c0_53 = arith.constant 0 : index
      %c0_54 = arith.constant 0 : index
      %53 = vector.load %arg6[%c0_52, %c0_53, %c0_54] : memref<1x8x32xf32, #tpu.memory_space<vmem>>, vector<1x8x32xf32>
      %54 = vector.shape_cast %53 : vector<1x8x32xf32> to vector<8x32xf32>
      %55 = arith.addf %52, %54 : vector<8x32xf32>
      %cst_55 = arith.constant dense<0.000000e+00> : vector<8xf32>
      %56 = vector.multi_reduction <add>, %55, %cst_55 [1] : vector<8x32xf32> to vector<8xf32>
      %57 = vector.shape_cast %56 : vector<8xf32> to vector<8x1xf32>
      %cst_56 = arith.constant 3.200000e+01 : f32
      %58 = vector.broadcast %cst_56 : f32 to vector<8x1xf32>
      %59 = arith.divf %57, %58 : vector<8x1xf32>
      %60 = vector.broadcast %59 : vector<8x1xf32> to vector<8x32xf32>
      %61 = arith.subf %55, %60 : vector<8x32xf32>
      %62 = arith.mulf %61, %61 : vector<8x32xf32>
      %cst_57 = arith.constant dense<0.000000e+00> : vector<8xf32>
      %63 = vector.multi_reduction <add>, %62, %cst_57 [1] : vector<8x32xf32> to vector<8xf32>
      %64 = vector.shape_cast %63 : vector<8xf32> to vector<8x1xf32>
      %cst_58 = arith.constant 3.200000e+01 : f32
      %65 = vector.broadcast %cst_58 : f32 to vector<8x1xf32>
      %66 = arith.divf %64, %65 : vector<8x1xf32>
      %67 = vector.broadcast %59 : vector<8x1xf32> to vector<8x32xf32>
      %68 = arith.subf %55, %67 : vector<8x32xf32>
      %cst_59 = arith.constant 9.99999974E-6 : f32
      %69 = vector.broadcast %cst_59 : f32 to vector<8x1xf32>
      %70 = arith.addf %66, %69 : vector<8x1xf32>
      %71 = math.rsqrt %70 : vector<8x1xf32>
      %72 = vector.broadcast %71 : vector<8x1xf32> to vector<8x32xf32>
      %73 = arith.mulf %68, %72 : vector<8x32xf32>
      %c0_60 = arith.constant 0 : index
      %c0_61 = arith.constant 0 : index
      %74 = vector.load %arg13[%c0_60, %c0_61] : memref<1x32xf32, #tpu.memory_space<vmem>>, vector<1x32xf32>
      %75 = vector.broadcast %74 : vector<1x32xf32> to vector<8x32xf32>
      %76 = arith.mulf %73, %75 : vector<8x32xf32>
      %c0_62 = arith.constant 0 : index
      %c0_63 = arith.constant 0 : index
      %77 = vector.load %arg14[%c0_62, %c0_63] : memref<1x32xf32, #tpu.memory_space<vmem>>, vector<1x32xf32>
      %78 = vector.broadcast %77 : vector<1x32xf32> to vector<8x32xf32>
      %79 = arith.addf %76, %78 : vector<8x32xf32>
      %c0_64 = arith.constant 0 : index
      %c0_65 = arith.constant 0 : index
      %80 = vector.load %arg9[%c0_64, %c0_65] : memref<32x64xf32, #tpu.memory_space<vmem>>, vector<32x64xf32>
      %cst_66 = arith.constant dense<0.000000e+00> : vector<8x64xf32>
      %81 = tpu.matmul %79, %80, %cst_66 {dimension_numbers = #tpu.dot_dimension_numbers<[1], [0], [0], [1], [0, 0, 1, 1], [], []>} : vector<8x32xf32>, vector<32x64xf32>, vector<8x64xf32> -> vector<8x64xf32>
      %c0_67 = arith.constant 0 : index
      %c0_68 = arith.constant 0 : index
      %82 = vector.load %arg10[%c0_67, %c0_68] : memref<1x64xf32, #tpu.memory_space<vmem>>, vector<1x64xf32>
      %83 = vector.broadcast %82 : vector<1x64xf32> to vector<8x64xf32>
      %84 = arith.addf %81, %83 : vector<8x64xf32>
      %cst_69 = arith.constant 0.000000e+00 : f32
      %85 = vector.broadcast %cst_69 : f32 to vector<8x64xf32>
      %86 = arith.maximumf %84, %85 : vector<8x64xf32>
      %c0_70 = arith.constant 0 : index
      %c0_71 = arith.constant 0 : index
      %87 = vector.load %arg11[%c0_70, %c0_71] : memref<64x32xf32, #tpu.memory_space<vmem>>, vector<64x32xf32>
      %cst_72 = arith.constant dense<0.000000e+00> : vector<8x32xf32>
      %88 = tpu.matmul %86, %87, %cst_72 {dimension_numbers = #tpu.dot_dimension_numbers<[1], [0], [0], [1], [0, 0, 1, 1], [], []>} : vector<8x64xf32>, vector<64x32xf32>, vector<8x32xf32> -> vector<8x32xf32>
      %c0_73 = arith.constant 0 : index
      %c0_74 = arith.constant 0 : index
      %89 = vector.load %arg12[%c0_73, %c0_74] : memref<1x32xf32, #tpu.memory_space<vmem>>, vector<1x32xf32>
      %90 = vector.broadcast %89 : vector<1x32xf32> to vector<8x32xf32>
      %91 = arith.addf %88, %90 : vector<8x32xf32>
      %92 = arith.addf %91, %79 : vector<8x32xf32>
      %cst_75 = arith.constant dense<0.000000e+00> : vector<8xf32>
      %93 = vector.multi_reduction <add>, %92, %cst_75 [1] : vector<8x32xf32> to vector<8xf32>
      %94 = vector.shape_cast %93 : vector<8xf32> to vector<8x1xf32>
      %cst_76 = arith.constant 3.200000e+01 : f32
      %95 = vector.broadcast %cst_76 : f32 to vector<8x1xf32>
      %96 = arith.divf %94, %95 : vector<8x1xf32>
      %97 = vector.broadcast %96 : vector<8x1xf32> to vector<8x32xf32>
      %98 = arith.subf %92, %97 : vector<8x32xf32>
      %99 = arith.mulf %98, %98 : vector<8x32xf32>
      %cst_77 = arith.constant dense<0.000000e+00> : vector<8xf32>
      %100 = vector.multi_reduction <add>, %99, %cst_77 [1] : vector<8x32xf32> to vector<8xf32>
      %101 = vector.shape_cast %100 : vector<8xf32> to vector<8x1xf32>
      %cst_78 = arith.constant 3.200000e+01 : f32
      %102 = vector.broadcast %cst_78 : f32 to vector<8x1xf32>
      %103 = arith.divf %101, %102 : vector<8x1xf32>
      %104 = vector.broadcast %96 : vector<8x1xf32> to vector<8x32xf32>
      %105 = arith.subf %92, %104 : vector<8x32xf32>
      %cst_79 = arith.constant 9.99999974E-6 : f32
      %106 = vector.broadcast %cst_79 : f32 to vector<8x1xf32>
      %107 = arith.addf %103, %106 : vector<8x1xf32>
      %108 = math.rsqrt %107 : vector<8x1xf32>
      %109 = vector.broadcast %108 : vector<8x1xf32> to vector<8x32xf32>
      %110 = arith.mulf %105, %109 : vector<8x32xf32>
      %c0_80 = arith.constant 0 : index
      %c0_81 = arith.constant 0 : index
      %111 = vector.load %arg15[%c0_80, %c0_81] : memref<1x32xf32, #tpu.memory_space<vmem>>, vector<1x32xf32>
      %112 = vector.broadcast %111 : vector<1x32xf32> to vector<8x32xf32>
      %113 = arith.mulf %110, %112 : vector<8x32xf32>
      %c0_82 = arith.constant 0 : index
      %c0_83 = arith.constant 0 : index
      %114 = vector.load %arg16[%c0_82, %c0_83] : memref<1x32xf32, #tpu.memory_space<vmem>>, vector<1x32xf32>
      %115 = vector.broadcast %114 : vector<1x32xf32> to vector<8x32xf32>
      %116 = arith.addf %113, %115 : vector<8x32xf32>
      %c0_84 = arith.constant 0 : index
      %c0_85 = arith.constant 0 : index
      %c0_86 = arith.constant 0 : index
      %117 = vector.load %arg17[%c0_84, %c0_85, %c0_86] : memref<1x8x32xf32, #tpu.memory_space<vmem>>, vector<1x8x32xf32>
      %118 = vector.shape_cast %117 : vector<1x8x32xf32> to vector<8x32xf32>
      %119 = vector.shape_cast %116 : vector<8x32xf32> to vector<1x8x32xf32>
      tpu.vector_store %arg17[%c0_84, %c0_85, %c0_86], %119 {strides = array<i32>} : memref<1x8x32xf32, #tpu.memory_space<vmem>>, vector<1x8x32xf32>,
    } else {
    }
    return
  }
  func.func @transform_0(%arg0: i32, %arg1: i32, %arg2: i32) -> (i32, i32, i32, i32) {
    %c0_i32 = arith.constant 0 : i32
    %c0_i32_0 = arith.constant 0 : i32
    %c0_i32_1 = arith.constant 0 : i32
    return %arg0, %c0_i32, %arg1, %c0_i32_0 : i32, i32, i32, i32
  }
  func.func @transform_1(%arg0: i32, %arg1: i32, %arg2: i32) -> (i32, i32, i32, i32) {
    %c0_i32 = arith.constant 0 : i32
    %c0_i32_0 = arith.constant 0 : i32
    %c0_i32_1 = arith.constant 0 : i32
    return %arg0, %c0_i32, %arg2, %c0_i32_0 : i32, i32, i32, i32
  }
  func.func @transform_2(%arg0: i32, %arg1: i32, %arg2: i32) -> (i32, i32, i32, i32) {
    %c0_i32 = arith.constant 0 : i32
    %c0_i32_0 = arith.constant 0 : i32
    %c0_i32_1 = arith.constant 0 : i32
    return %arg0, %c0_i32, %arg2, %c0_i32_0 : i32, i32, i32, i32
  }
  func.func @transform_3(%arg0: i32, %arg1: i32, %arg2: i32) -> (i32, i32, i32) {
    %c0_i32 = arith.constant 0 : i32
    %c0_i32_0 = arith.constant 0 : i32
    return %arg0, %arg1, %c0_i32 : i32, i32, i32
  }
  func.func @transform_4(%arg0: i32, %arg1: i32, %arg2: i32) -> (i32, i32, i32) {
    %c0_i32 = arith.constant 0 : i32
    %c0_i32_0 = arith.constant 0 : i32
    return %arg0, %c0_i32, %arg2 : i32, i32, i32
  }
  func.func @transform_5(%arg0: i32, %arg1: i32, %arg2: i32) -> (i32, i32, i32) {
    %c0_i32 = arith.constant 0 : i32
    %c0_i32_0 = arith.constant 0 : i32
    %c0_i32_1 = arith.constant 0 : i32
    %c0_i32_2 = arith.constant 0 : i32
    return %c0_i32, %c0_i32_0, %c0_i32_1 : i32, i32, i32
  }
  func.func @transform_6(%arg0: i32, %arg1: i32, %arg2: i32) -> (i32, i32) {
    %c0_i32 = arith.constant 0 : i32
    %c0_i32_0 = arith.constant 0 : i32
    %c0_i32_1 = arith.constant 0 : i32
    return %c0_i32, %c0_i32_0 : i32, i32
  }
  func.func @transform_7(%arg0: i32, %arg1: i32, %arg2: i32) -> (i32, i32) {
    %c0_i32 = arith.constant 0 : i32
    %c0_i32_0 = arith.constant 0 : i32
    %c0_i32_1 = arith.constant 0 : i32
    return %c0_i32, %c0_i32_0 : i32, i32
  }
  func.func @transform_8(%arg0: i32, %arg1: i32, %arg2: i32) -> (i32, i32) {
    %c0_i32 = arith.constant 0 : i32
    %c0_i32_0 = arith.constant 0 : i32
    %c0_i32_1 = arith.constant 0 : i32
    return %c0_i32, %c0_i32_0 : i32, i32
  }
  func.func @transform_9(%arg0: i32, %arg1: i32, %arg2: i32) -> (i32, i32) {
    %c0_i32 = arith.constant 0 : i32
    %c0_i32_0 = arith.constant 0 : i32
    %c0_i32_1 = arith.constant 0 : i32
    return %c0_i32, %c0_i32_0 : i32, i32
  }
  func.func @transform_10(%arg0: i32, %arg1: i32, %arg2: i32) -> (i32, i32) {
    %c0_i32 = arith.constant 0 : i32
    %c0_i32_0 = arith.constant 0 : i32
    %c0_i32_1 = arith.constant 0 : i32
    return %c0_i32, %c0_i32_0 : i32, i32
  }
  func.func @transform_11(%arg0: i32, %arg1: i32, %arg2: i32) -> (i32, i32) {
    %c0_i32 = arith.constant 0 : i32
    %c0_i32_0 = arith.constant 0 : i32
    %c0_i32_1 = arith.constant 0 : i32
    return %c0_i32, %c0_i32_0 : i32, i32
  }
  func.func @transform_12(%arg0: i32, %arg1: i32, %arg2: i32) -> (i32, i32) {
    %c0_i32 = arith.constant 0 : i32
    %c0_i32_0 = arith.constant 0 : i32
    %c0_i32_1 = arith.constant 0 : i32
    return %c0_i32, %c0_i32_0 : i32, i32
  }
  func.func @transform_13(%arg0: i32, %arg1: i32, %arg2: i32) -> (i32, i32) {
    %c0_i32 = arith.constant 0 : i32
    %c0_i32_0 = arith.constant 0 : i32
    %c0_i32_1 = arith.constant 0 : i32
    return %c0_i32, %c0_i32_0 : i32, i32
  }
  func.func @transform_14(%arg0: i32, %arg1: i32, %arg2: i32) -> (i32, i32, i32) {
    %c0_i32 = arith.constant 0 : i32
    %c0_i32_0 = arith.constant 0 : i32
    return %arg0, %arg1, %c0_i32 : i32, i32, i32
  }
}

</mosaic_0001>

<bundles_post_ra>
// kernel: tpu_custom_call.1
= control target key start
LH: loop header
LB: loop body
LE: loop exit
PB: predicated region body
PF: predicated region fallthrough
CT: control target
= control target key end

     0   :  { %s3334_s0 = inlined_call_operand.vmem [shape: f32[2,4,8,8], index: 0, kind: input, shape index: {}]   ;;  %s3335_s1 = inlined_call_operand.hbm [shape: f32[2,4,8,8], index: 1, kind: input, shape index: {}]   ;;  %s3336_s2 = inlined_call_operand.hbm [shape: f32[2,4,8,8], index: 2, kind: input, shape index: {}]   ;;  %s3337_s3 = inlined_call_operand.hbm [shape: f32[2,8,32], index: 3, kind: input, shape index: {}]   ;;  %s3338_s4 = inlined_call_operand.vmem [shape: f32[2,1,8], index: 4, kind: input, shape index: {}]   ;;  %s3339_s5 = inlined_call_operand.vmem [shape: f32[4,8,32], index: 5, kind: input, shape index: {}]   ;;  %s3340_s6 = inlined_call_operand.hbm [shape: f32[32,64], index: 6, kind: input, shape index: {}]   ;;  %s3341_s7 = inlined_call_operand.vmem [shape: f32[1,64], index: 7, kind: input, shape index: {}]   ;;  %s3342_s8 = inlined_call_operand.vmem [shape: f32[64,32], index: 8, kind: input, shape index: {}]   ;;  %s3343_s9 = inlined_call_operand.vmem [shape: f32[1,32], index: 9, kind: input, shape index: {}]   ;;  %s3344_s10 = inlined_call_operand.vmem [shape: f32[1,32], index: 10, kind: input, shape index: {}]   ;;  %s3345_s11 = inlined_call_operand.vmem [shape: f32[1,32], index: 11, kind: input, shape index: {}]   ;;  %s3346_s12 = inlined_call_operand.vmem [shape: f32[1,32], index: 12, kind: input, shape index: {}]   ;;  %s3347_s13 = inlined_call_operand.vmem [shape: f32[1,32], index: 13, kind: input, shape index: {}]   ;;  %s3348_s14 = inlined_call_operand.hbm [shape: f32[2,8,32], index: 14, kind: output, shape index: {}]  }
   0x1   :  { %3373 = sst [smem:[#allocation25_spill]] %s3335_s1 }
   0x2   :  { %3374 = sst [smem:[#allocation26_spill]] %s3336_s2 }
   0x3   :  { %3375 = sst [smem:[#allocation27_spill]] %s3341_s7 }
   0x4   :  { %3376 = sst [smem:[#allocation28_spill]] %s3343_s9 }
   0x5   :  { %3377 = sst [smem:[#allocation29_spill]] %s3344_s10 }
   0x6   :  { %3378 = sst [smem:[#allocation30_spill]] %s3345_s11 }
   0x7   :  { %3379 = sst [smem:[#allocation31_spill]] %s3346_s12 }
   0x8   :  { %3380 = sst [smem:[#allocation32_spill]] %s3347_s13 }
   0x9   :  { %3381 = sst [smem:[#allocation33_spill]] %s3348_s14 }
   0xa   :  { %19 = vsyncpa [#allocation6], 0 }
   0xb   :  { %21 = vsyncpa [#allocation6 + $0x1], 0 }
   0xc   :  { %22 = vsyncpa [#allocation9], 0 }
   0xd   :  { %24 = vsyncpa [#allocation9 + $0x1], 0 }
   0xe   :  { %25 = vsyncpa [#allocation12], 0 }
   0xf   :  { %26 = vsyncpa [#allocation7], 0 }
  0x10   :  { %28 = vsyncpa [#allocation7 + $0x1], 0  ;;  %s2812_s29 = smov 0   ;;  %s2814_s30 = smov 0  }
  0x11   :  { %s2816_s15 = smov 0   ;;  %s2818_s16 = smov 0  }
  0x12   :  { %s2820_s17 = smov 0   ;;  %s2822_s18 = smov 0  }
  0x13 LB: > { %3382 = sst [smem:[#allocation18_spill]] %s2702_s29  ;;  %s53_s19 = sadd.s32 1, %s2718_s17  ;;  %s2722_s18 = sphi %s2822_s18, %s34_s18   ;;  %s2718_s17 = sphi %s2820_s17, %s3430_s17   ;;  %s2714_s16 = sphi %s2818_s16, %s3429_s16   ;;  %s2710_s15 = sphi %s2816_s15, %s3425_s15   ;;  %s2706_s30 = sphi %s2814_s30, %s3428_s30   ;;  %s2702_s29 = sphi %s2812_s29, %s3427_s29  }
  0x14   : > { %3383 = sst [smem:[#allocation19_spill]] %s2710_s15  ;;  %s90_s20 = sadd.s32 1, %s2710_s15 }
  0x15   : > { %3384 = sst [smem:[#allocation20_spill]] %s2722_s18  ;;  %p55_p0 = scmp.ge.s32.totalorder %s53_s19, 2 }
  0x16   : > { %p3353_p1 = scmp.ne.s32.totalorder %s2710_s15, %s2706_s30  ;;  %p98_p2 = scmp.eq.s32.totalorder %s2722_s18, 0 }
  0x17   : > { %s3432_s19 = smov (%p55_p0, %s53_s19), 0  ;;  %p2424_p6 = scmp.lt.s32.totalorder %s2722_s18, 2 }
  0x18   : > { %3385 = sst [smem:[#allocation21_spill]] %s3432_s19  ;;  %p99_p3 = por %p98_p2, %p3353_p1 }
  0x19   : > { %s85_s21 = ssub.s32 %s2718_s17, %s3432_s19  ;;  %s2857_s22 = sand.u32 1, %s2710_s15  }
  0x1a   : > { %p88_p5 = scmp.eq.s32.totalorder %s85_s21, 0  ;;  %s3352_s23 = sshll.u32 %s2718_s17, 9 }
  0x1b   : > { %s3351_s25 = sshll.u32 %s2857_s22, 5  ;;  %p2864_p7 = pnand %p2424_p6, %p99_p3 }
  0x1c   : > { %s2861_s24 = scalar_select %p88_p5, %s2710_s15, %s90_s20  }
  0x1d   : > { %s3387_s26 = scalar_select %p2864_p7, 1, 0 }
  0x1e   : > { %3386 = sst [smem:[#allocation22_spill]] %s2861_s24  ;;  %s498_s27 = sand.u32 1, %s2722_s18  }
  0x1f   : > { %s3388_s2 = sld [smem:[#allocation26_spill]]  ;;  %s502_s20 = scalar_lea.vmem [#allocation8], %s3351_s25 }
  0x20   : > { %s510_s24 = sshll.u32 %s502_s20, 4  ;;  %s2880_s14 = scalar_lea.sflag [#allocation9], %s498_s27  ;;  %s2878_s24 = int_to_ptr.vmem [resolvable:$true] %s510_s24 }
  0x21   : > { %p2886_p9 = pneg %p2864_p7 }
  0x23   : > { %s3389_s12 = scalar_select %p2886_p9, 1, 0 }
  0x25   : > { %s2874_s21 = scalar_lea.hbm %s3388_s2, %s3352_s23  ;;  %s2519_s25 = scalar_lea.hbm %s3388_s2, 1024 }
  0x26   : > { %s2514_s13 = scalar_lea.hbm %s2874_s21, 512  ;;  %p2520_p12 = scmp.lt.u32.totalorder %s2874_s21, %s3388_s2 }
  0x27   : > { %p2515_p8 = scmp.ne.s32.totalorder %s2874_s21, %s2514_s13  ;;  %p2521_p13 = scmp.lt.u32.totalorder %s2519_s25, %s2514_s13 }
  0x28   : > { %p2523_p2 = scmp.lt.u32.totalorder %s2514_s13, %s2874_s21 }
  0x29   : > { %p2517_p10 = pnand %p2886_p9, %p2515_p8  ;;  %p2522_p0 = por %p2521_p13, %p2520_p12 }
  0x2b   : > { %p2518_p11 = pneg %p2517_p10  ;;  %p2524_p3 = por %p2523_p2, %p2522_p0 }
  0x2d   : > { %p2525_p5 = pnand %p2524_p3, %p2518_p11 }
  0x2f   : > { %2528 = shalt.err (!%p2525_p5)
}
  0x30   : > { %s2529_s27 = scalar_lea.vmem %s2878_s24, 512  ;;  %s2724_s19 = smov [#allocation8]  }
  0x31   : > { %p2530_p6 = scmp.ne.s32.totalorder %s2878_s24, %s2529_s27  ;;  %s2534_s28 = sshll.u32 %s2724_s19, 4  ;;  %s2535_s28 = int_to_ptr.vmem [resolvable:$false] %s2534_s28 }
  0x32   : > { %s2536_s23 = scalar_lea.vmem %s2535_s28, 1024  ;;  %p2537_p4 = scmp.lt.s32.totalorder %s2878_s24, %s2535_s28 }
  0x33   : > { %p2532_p8 = pnand %p2530_p6, %p2886_p9  ;;  %p2538_p1 = scmp.lt.s32.totalorder %s2536_s23, %s2529_s27 }
  0x35   : > { %p2533_p10 = pneg %p2532_p8  ;;  %p2539_p12 = por %p2538_p1, %p2537_p4 }
  0x37   : > { %p2540_p13 = pnand %p2539_p12, %p2533_p10 }
  0x39   : > { %2543 = shalt.err (!%p2540_p13)
}
  0x3a   : > { %s3354_s13 = smov 128   ;;  %s3356_s25 = smov 8  }
  0x3b   : > { %2415 = dma.hbm_to_vmem [thread:$0]  (!%p2864_p7), %s2874_s21, 512, %s2878_s24, %s2880_s14, %s3354_s13, %s3354_s13, %s3356_s25  }
  0x3c   : > { %s2914_s20 = sadd.s32 4294967295, %s2722_s18   ;;  %s2196_s27 = sadd.s32 4294967294, %s2722_s18  }
  0x3d   : > { %p103_p1 = scmp.ne.s32.totalorder %s2706_s30, %s2702_s29  ;;  %p3365_p4 = scmp.eq.s32.totalorder %s2914_s20, 0 }
  0x3e   : > { %p402_p11 = scmp.eq.s32.totalorder %s2914_s20, 1  ;;  %p408_p0 = scmp.eq.s32.totalorder %s2196_s27, 1 }
  0x3f   : > { %p2197_p2 = scmp.ge.s32.totalorder %s2722_s18, 1  ;;  %p2924_p3 = por %p3365_p4, %p103_p1 }
  0x40   : > { %p3391_p5 = scmp.ne.s32.totalorder %s2710_s15, %s2706_s30  ;;  %p2935_p8 = por %p408_p0, %p103_p1 }
  0x41   : > { %s3390_s19 = scalar_select %p2924_p3, 1, 0 }
  0x42   : > { %p2931_p6 = por %p402_p11, %p3391_p5  ;;  %p415_p10 = scmp.lt.s32.totalorder %s2722_s18, 3 }
  0x43   : > { %s3394_s21 = scalar_select %p2935_p8, 1, 0 }
  0x44   : > { %s3392_s24 = scalar_select %p2931_p6, 1, 0 }
  0x45   : > { %3395 = sst [smem:[#allocation24_spill]] %s3394_s21  ;;  %p2940_p12 = pnand %p2197_p2, %p415_p10 }
  0x46   : > { %3393 = sst [smem:[#allocation23_spill]] %s3392_s24  ;;  %s2727_s23 = smov [#allocation11]  }
  0x47   : > { %s3396_s28 = scalar_select %p2940_p12, 1, 0 }
  0x48   : > { %s430_s27 = sshll.u32 %s2727_s23, 4  ;;  %p2405_p13 = pneg %p2940_p12  ;;  %s2944_s27 = int_to_ptr.vmem [resolvable:$true] %s430_s27 }
  0x49   : > { %s3397_s13 = sshll.u32 %s2718_s17, 9  ;;  %s3398_s1 = sld [smem:[#allocation25_spill]] }
  0x4a   : > { %s3399_s29 = sshll.u32 %s2857_s22, 5  ;;  %p2959_p1 = pnand %p2405_p13, %p3365_p4 }
  0x4b   : > { %s480_s18 = scalar_lea.vmem [#allocation5], %s3399_s29  ;;  %s477_s24 = scalar_lea.sflag [#allocation6], %s2857_s22 }
  0x4c   : > { %s488_s21 = sshll.u32 %s480_s18, 4  ;;  %s2963_s21 = int_to_ptr.vmem [resolvable:$true] %s488_s21 }
  0x4d   : > { %s3400_s23 = scalar_select %p2959_p1, 1, 0 }
  0x4f   : > { %s2953_s15 = scalar_lea.hbm %s3398_s1, %s3397_s13  ;;  %s2549_s25 = scalar_lea.hbm %s3398_s1, 1024 }
  0x50   : > { %s2544_s9 = scalar_lea.hbm %s2953_s15, 512  ;;  %p2550_p5 = scmp.lt.u32.totalorder %s2953_s15, %s3398_s1 }
  0x51   : > { %p2545_p11 = scmp.ne.s32.totalorder %s2953_s15, %s2544_s9  ;;  %p2551_p10 = scmp.lt.u32.totalorder %s2549_s25, %s2544_s9 }
  0x52   : > { %p2553_p4 = scmp.lt.u32.totalorder %s2544_s9, %s2953_s15 }
  0x53   : > { %p2547_p0 = pnand %p2545_p11, %p2886_p9  ;;  %p2552_p13 = por %p2551_p10, %p2550_p5 }
  0x55   : > { %p2548_p2 = pneg %p2547_p0  ;;  %p2554_p8 = por %p2553_p4, %p2552_p13 }
  0x57   : > { %p2555_p6 = pnand %p2554_p8, %p2548_p2 }
  0x59   : > { %2558 = shalt.err (!%p2555_p6)
}
  0x5a   : > { %s2559_s18 = scalar_lea.vmem %s2963_s21, 512  ;;  %s2728_s2 = smov [#allocation5]  }
  0x5b   : > { %p2560_p11 = scmp.ne.s32.totalorder %s2963_s21, %s2559_s18  ;;  %s2564_s13 = sshll.u32 %s2728_s2, 4  ;;  %s2565_s13 = int_to_ptr.vmem [resolvable:$false] %s2564_s13 }
  0x5c   : > { %s2566_s7 = scalar_lea.vmem %s2565_s13, 1024  ;;  %p2567_p12 = scmp.lt.s32.totalorder %s2963_s21, %s2565_s13 }
  0x5d   : > { %p2562_p0 = pnand %p2560_p11, %p2886_p9  ;;  %p2568_p1 = scmp.lt.s32.totalorder %s2566_s7, %s2559_s18 }
  0x5f   : > { %p2563_p3 = pneg %p2562_p0  ;;  %p2569_p5 = por %p2568_p1, %p2567_p12 }
  0x61   : > { %p2570_p10 = pnand %p2569_p5, %p2563_p3 }
  0x63   : > { %2573 = shalt.err (!%p2570_p10)
}
  0x64   : > { %s3401_s9 = smov 8   ;;  %s3402_s25 = smov 128  }
  0x65   : > { %2412 = dma.hbm_to_vmem [thread:$0]  (!%p2864_p7), %s2953_s15, 512, %s2963_s21, %s477_s24, %s3402_s25, %s3402_s25, %s3401_s9  }
  0x66   : > { %s2206_s29 = sshll.u32 %s2857_s22, 3  ;;  %s2574_s18 = scalar_lea.hbm %s3340_s6, 512 }
  0x67   : > { %p2575_p4 = scmp.ne.s32.totalorder %s3340_s6, %s2574_s18  ;;  %p3403_p3 = scmp.ne.s32.totalorder %s3400_s23, 0 }
  0x68   : > { %p2581_p1 = scmp.lt.u32.totalorder %s2574_s18, %s3340_s6 }
  0x69   : > { %p2576_p6 = pneg %p3403_p3 }
  0x6b   : > { %p2577_p8 = pnand %p2576_p6, %p2575_p4 }
  0x6d   : > { %p2578_p12 = pneg %p2577_p8 }
  0x6f   : > { %p2583_p2 = pnand %p2581_p1, %p2578_p12 }
  0x71   : > { %2586 = shalt.err (!%p2583_p2)
}
  0x72   : > { %s2587_s15 = scalar_lea.vmem %s2944_s27, 512  ;;  %p2595_p5 = scmp.lt.s32.totalorder %s2944_s27, %s2944_s27 }
  0x73   : > { %p2588_p13 = scmp.ne.s32.totalorder %s2944_s27, %s2587_s15  ;;  %p2596_p10 = scmp.lt.s32.totalorder %s2587_s15, %s2587_s15 }
  0x75   : > { %p2590_p11 = pnand %p2588_p13, %p2576_p6  ;;  %p2597_p7 = por %p2596_p10, %p2595_p5 }
  0x77   : > { %p2591_p0 = pneg %p2590_p11 }
  0x79   : > { %p2598_p9 = pnand %p2597_p7, %p2591_p0 }
  0x7b   : > { %2601 = shalt.err (!%p2598_p9)
}
  0x7c   : > { %2408 = dma.hbm_to_vmem [thread:$0]  (!%p3403_p3), %s3340_s6, 512, %s2944_s27, [#allocation12], %s3402_s25, %s3402_s25, %s3401_s9  }
  0x7d   : > { %s2207_s11 = sshll.u32 %s2718_s17, 7  ;;  %s524_s23 = scalar_lea.vmem [#allocation10], %s2206_s29 }
  0x7e   : > { %s3021_s21 = scalar_lea.hbm %s3337_s3, %s2207_s11  ;;  %s532_s2 = sshll.u32 %s524_s23, 4  ;;  %s533_s2 = int_to_ptr.vmem [resolvable:$true] %s532_s2 }
  0x7f   : > { %s2602_s18 = scalar_lea.hbm %s3021_s21, 128  ;;  %p3404_p9 = scmp.ne.s32.totalorder %s3389_s12, 0 }
  0x80   : > { %p2603_p7 = scmp.ne.s32.totalorder %s3021_s21, %s2602_s18  ;;  %s2607_s9 = scalar_lea.hbm %s3337_s3, 256 }
  0x81   : > { %p2608_p3 = scmp.lt.u32.totalorder %s3021_s21, %s3337_s3  ;;  %p2609_p8 = scmp.lt.u32.totalorder %s2607_s9, %s2602_s18 }
  0x82   : > { %p2605_p4 = pnand %p2603_p7, %p3404_p9  ;;  %p2611_p1 = scmp.lt.u32.totalorder %s2602_s18, %s3021_s21 }
  0x83   : > { %p2610_p12 = por %p2609_p8, %p2608_p3 }
  0x84   : > { %p2606_p6 = pneg %p2605_p4 }
  0x85   : > { %p2612_p2 = por %p2611_p1, %p2610_p12 }
  0x87   : > { %p2613_p13 = pnand %p2612_p2, %p2606_p6 }
  0x89   : > { %2616 = shalt.err (!%p2613_p13)
}
  0x8a   : > { %s2617_s29 = scalar_lea.vmem %s533_s2, 128  ;;  %s2729_s15 = smov [#allocation10]  }
  0x8b   : > { %p2618_p11 = scmp.ne.s32.totalorder %s533_s2, %s2617_s29  ;;  %s2622_s1 = sshll.u32 %s2729_s15, 4  ;;  %s2623_s1 = int_to_ptr.vmem [resolvable:$false] %s2622_s1 }
  0x8c   : > { %s2624_s10 = scalar_lea.vmem %s2623_s1, 256  ;;  %p2625_p10 = scmp.lt.s32.totalorder %s533_s2, %s2623_s1 }
  0x8d   : > { %p2620_p0 = pnand %p2618_p11, %p3404_p9  ;;  %p2626_p7 = scmp.lt.s32.totalorder %s2624_s10, %s2617_s29 }
  0x8f   : > { %p2621_p5 = pneg %p2620_p0  ;;  %p2627_p4 = por %p2626_p7, %p2625_p10 }
  0x91   : > { %p2628_p3 = pnand %p2627_p4, %p2621_p5 }
  0x93   : > { %2631 = shalt.err (!%p2628_p3)
}
  0x94   : > { %p3405_p8 = scmp.ne.s32.totalorder %s3387_s26, 0  ;;  %p3406_p6 = scmp.ne.s32.totalorder %s3396_s28, 0 }
  0x95   : > { %s3044_s12 = sand.u32 (!%p3406_p6), 1, %s2706_s30   ;;  %p3407_p9 = scmp.ne.s32.totalorder (!%p3406_p6), %s3390_s19, 0 }
  0x96   : > { %2418 = dma.hbm_to_vmem [thread:$0]  (!%p3405_p8), %s3021_s21, 128, %s533_s2, %s2880_s14  }
  0x97   : > { %550 = sbr.rel (%p3406_p6) target bundleno = 2269 (0x8dd), region = 76  ;;  %s2209_s11 = sshll.u32 (!%p3406_p6), %s3044_s12, 5 }
  0x98   : > { %s553_s22 = scalar_lea.sflag (!%p3406_p6), [#allocation6], %s3044_s12  ;;  %s3048_s24 = scalar_lea.vmem (!%p3406_p6), [#allocation5], %s2209_s11 }
  0x9e   : > { %2685 = dma.done.wait (%p3407_p9), %s553_s22, 512  }
  0x9f   : > { %2687 = vsyncadd (%p3407_p9), %s553_s22, 4294966784  ;;  %s561_s14 = sand.u32 1, %s2914_s20   ;;  %s3055_s28 = scalar_lea.vmem [#allocation8], %s2209_s11 }
  0xa0   : > { %s562_s26 = scalar_lea.sflag [#allocation9], %s561_s14 }
  0xa1   : > { %2689 = dma.done.wait (%p3407_p9), %s562_s26, 640  }
  0xa2   : > { %2691 = vsyncadd (%p3407_p9), %s562_s26, 4294966656  ;;  %s2211_s21 = sshll.u32 %s3044_s12, 3  ;;  %p3408_p12 = scmp.eq.s32.totalorder %s2914_s20, 0 }
  0xa3   : > { %s3064_s23 = scalar_lea.vmem [#allocation10], %s2211_s21 }
  0xa4   : > { %2693 = dma.done.wait (%p3408_p12), [#allocation12], 512   ;;  %p3409_p1 = pmov %p3408_p12 }
  0xa5   : > { %vm674_vm0 = vcmask 64512   ;;  %p647_p2 = scmp.lt.s32.totalorder %s2714_s16, 1  ;;  %v2730_v0 = vmov 0.0   ;;  %vm2731_vm1 = vmmov 0   ;;  %v683_v1 = vld [vmem:[%s3048_s24] sm:$0xff]  ;;  %v684_v3 = vld [vmem:[%s3048_s24 + $0x8] sm:$0xff]  ;;  %v695_v10 = vlaneseq }
  0xa6   : > { %2695 = vsyncadd (%p3409_p1), [#allocation12], 4294966784  ;;  %2285 = vmatprep.subr.mxu0 %v2730_v0  ;;  %675 = vst.msk [vmem:[#allocation4] sm:$0xff] %vm674_vm0, %v2730_v0  ;;  %2287 = vmatprep.mubr.msk.f32.mxu0 %vm2731_vm1, %v2730_v0  ;;  %v686_v4 = vld [vmem:[%s3048_s24 + $0x18] sm:$0xff]  ;;  %v685_v7 = vld [vmem:[%s3048_s24 + $0x10] sm:$0xff]  ;;  %vm665_vm2 = vcmask 7168  }
  0xa7   : > { %676 = vst.msk [vmem:[#allocation4 + $0x8] sm:$0xff] %vm674_vm0, %v2730_v0  ;;  %677 = vst.msk [vmem:[#allocation4 + $0x10] sm:$0xff] %vm674_vm0, %v2730_v0  ;;  %s3083_s20 = scalar_select %p647_p2, %s2714_s16, 1  ;;  %2300 = vmatprep.subr.mxu1 %v2730_v0  ;;  %2302 = vmatprep.mubr.msk.f32.mxu1 %vm2731_vm1, %v2730_v0  ;;  %v2732_v9 = vmov -inf   ;;  %v696_v12 = vshrl.u32 %v695_v10, 7  ;;  %v2734_v33 = vmov 0  }
  0xa8   : > { %678 = vst.msk [vmem:[#allocation4 + $0x18] sm:$0xff] %vm674_vm0, %v2730_v0  ;;  %2286 = vmatpush3.xpose.msk.msra.mxu0 %vm674_vm0, %v683_v1  ;;  %2301 = vmatpush3.xpose.msk.msra.mxu1 %vm674_vm0, %v686_v4  ;;  %v2733_v14 = vmov -1e+30   ;;  %v687_v50 = vld [vmem:[%s3055_s28] sm:$0xff]  ;;  %v688_v51 = vld [vmem:[%s3055_s28 + $0x8] sm:$0xff]  ;;  %v689_v63 = vld [vmem:[%s3055_s28 + $0x10] sm:$0xff] }
  0xa9   : > { %s2246_s19 = sshll.u32 %s3083_s20, 5  ;;  %2290 = vmatprep.subr.mxu0 %v2730_v0  ;;  %2310 = vmatprep.subr.mxu1 %v2730_v0  ;;  %666 = vst.msk [vmem:[#allocation2] sm:$0xff] %vm665_vm2, %v2732_v9  ;;  %667 = vst.msk [vmem:[#allocation2 + $0x8] sm:$0xff] %vm665_vm2, %v2732_v9  ;;  %s660_s25 = scalar_lea.vmem %s3338_s4, %s3083_s20  ;;  %v697_v13 = vsub.s32 0, %v696_v12  ;;  %v690_v4 = vld [vmem:[%s3055_s28 + $0x18] sm:$0xff]  ;;  %vm1765_vm4 = vcmask 261120  }
  0xaa   : > { %s654_s13 = scalar_lea.vmem %s3334_s0, %s2246_s19  ;;  %668 = vst.msk [vmem:[#allocation2 + $0x10] sm:$0xff] %vm665_vm2, %v2732_v9  ;;  %669 = vst.msk [vmem:[#allocation2 + $0x18] sm:$0xff] %vm665_vm2, %v2732_v9  ;;  %v691_v11 = vld [vmem:[%s660_s25] sm:$0x1]  ;;  %2484 = vset.pattern.permute.xlu0 %v2734_v33  ;;  %2485 = vset.pattern.permute.xlu1 %v2734_v33  ;;  %s3410_s15 = sld [smem:[#allocation29_spill]]  ;;  %vm1905_vm5 = vcmask 523264  }
  0xab   : > { %v679_v2 = vld [vmem:[%s654_s13] sm:$0xff]  ;;  %v682_v5 = vld [vmem:[%s654_s13 + $0x18] sm:$0xff]  ;;  %v680_v6 = vld [vmem:[%s654_s13 + $0x8] sm:$0xff]  ;;  %670 = vst.msk [vmem:[#allocation3] sm:$0xff] %vm665_vm2, %v2730_v0  ;;  %vm692_vm3 = vcmp.gt.f32.partialorder %v691_v11, 0.5  ;;  %s3411_s11 = sld [smem:[#allocation30_spill]] }
  0xac   : > { %2288 = vmatmul.mubr.msk.f32.vlgmr.msra.gmra.mrb[0].mxu0 %vm674_vm0, %v679_v2  ;;  %2303 = vmatmul.mubr.msk.f32.vlgmr.msra.gmra.mrb[0].mxu1 %vm674_vm0, %v682_v5  ;;  %v681_v8 = vld [vmem:[%s654_s13 + $0x10] sm:$0xff]  ;;  %671 = vst.msk [vmem:[#allocation3 + $0x8] sm:$0xff] %vm665_vm2, %v2730_v0  ;;  %672 = vst.msk [vmem:[#allocation3 + $0x10] sm:$0xff] %vm665_vm2, %v2730_v0  ;;  %v693_v15 = vsel %vm692_vm3, 0.0, %v2733_v14  ;;  %s3412_s20 = sld [smem:[#allocation27_spill]]  ;;  %s3413_s18 = sld [smem:[#allocation28_spill]] }
  0xad   : > { %2291 = vmatpush3.xpose.msk.msra.mxu0 %vm674_vm0, %v684_v3  ;;  %2292 = vmatprep.mubr.msk.f32.mxu0 %vm2731_vm1, %v2730_v0  ;;  %673 = vst.msk [vmem:[#allocation3 + $0x18] sm:$0xff] %vm665_vm2, %v2730_v0  ;;  %v698_v16 = vrot.slane %v693_v15, %v697_v13  ;;  %s3414_s13 = sld [smem:[#allocation23_spill]]  ;;  %s2241_s1 = sshll.u32 %s2714_s16, 7 }
  0xae   : > { %2295 = vmatprep.subr.mxu0 %v2730_v0  ;;  %2312 = vmatprep.mubr.msk.f32.mxu1 %vm2731_vm1, %v2730_v0  ;;  %s3415_s25 = sld [smem:[#allocation31_spill]]  ;;  %s646_s10 = scalar_lea.vmem [#allocation13], %s2211_s21 }
  0xaf   : > { %2311 = vmatpush3.msra.mxu1 %v688_v51  ;;  %s3417_s14 = sld [smem:[#allocation33_spill]]  ;;  %s2011_s28 = scalar_lea.sflag [#allocation7], %s3044_s12 }
  0xb0   : > { %2293 = vmatmul.mubr.msk.f32.vlgmr.msra.gmra.mrb[2].mxu0 %vm674_vm0, %v680_v6  ;;  %v3139_v34 = vld [vmem:[#allocation2] sm:$0xff]  ;;  %v3144_v37 = vld [vmem:[#allocation2 + $0x8] sm:$0xff]  ;;  %2320 = vmatprep.subr.mxu1 %v2730_v0  ;;  %s2736_s16 = smov [#allocation13]  }
  0xb1   : > { %2296 = vmatpush3.xpose.msk.msra.mxu0 %vm674_vm0, %v685_v7  ;;  %2297 = vmatprep.mubr.msk.f32.mxu0 %vm2731_vm1, %v2730_v0  ;;  %v3152_v41 = vld [vmem:[#allocation2 + $0x10] sm:$0xff]  ;;  %v3157_v45 = vld [vmem:[#allocation2 + $0x18] sm:$0xff]  ;;  %s2636_s21 = sshll.u32 %s2736_s16, 4  ;;  %s2637_s21 = int_to_ptr.vmem [resolvable:$false] %s2636_s21 }
  0xb2   : > { %2305 = vmatprep.subr.mxu0 %v2730_v0 }
  0xb3   : > { %p3418_p11 = scmp.ne.s32.totalorder %s3414_s13, 0 }
  0xb4   : > { %2298 = vmatmul.mubr.msk.f32.vlgmr.msra.gmra.mrb[4].mxu0 %vm674_vm0, %v681_v8 }
  0xb5   : > { %2307 = vmatprep.mubr.msk.f32.mxu0 %vm2731_vm1, %v2730_v0  ;;  %2306 = vmatpush3.msra.mxu0 %v687_v50  ;;  %s3284_s26 = scalar_lea.hbm %s3417_s14, %s2241_s1 }
  0xb6   : > { %2315 = vmatprep.subr.mxu0 %v2730_v0 }
 0x17f   : > { %v773_v17 = vpop.f32.mrb[0].mxu0  ;;  %v1001_v20 = vpop.f32.mrb[0].mxu1 }
 0x180   : > { %v774_v18 = vadd.f32 %v773_v17, %v698_v16  ;;  %v2289_v19 = vpop.f32.mrb[1].mxu0  ;;  %v3133_v22 = vadd.f32 %v1001_v20, %v698_v16  ;;  %v2304_v23 = vpop.f32.mrb[1].mxu1 }
 0x181   : > { %v1069_v19 = vld [vmem:[#allocation3] sm:$0xff] }
 0x182   : > { %v1009_v21 = vsel %vm674_vm0, %v774_v18, -inf  ;;  %v1018_v32 = vsel %vm674_vm0, %v3133_v22, -inf }
 0x183   : > { %1010 = vmax.xlane.f32.xlu0 %v1009_v21  ;;  %v849_v24 = vpop.f32.mrb[2].mxu0 }
 0x184   : > { %v850_v25 = vadd.f32 %v849_v24, %v698_v16  ;;  %v2294_v26 = vpop.f32.mrb[3].mxu0 }
 0x185   : > { %v1071_v26 = vld [vmem:[#allocation3 + $0x10] sm:$0xff] }
 0x186   : > { %v1012_v27 = vsel %vm674_vm0, %v850_v25, -inf }
 0x187   : > { %1013 = vmax.xlane.f32.xlu0 %v1012_v27  ;;  %v925_v28 = vpop.f32.mrb[4].mxu0 }
 0x188   : > { %v926_v29 = vadd.f32 %v925_v28, %v698_v16  ;;  %v2299_v30 = vpop.f32.mrb[5].mxu0 }
 0x189   : > { %v1072_v30 = vld [vmem:[#allocation3 + $0x18] sm:$0xff] }
 0x18a   : > { %v1015_v31 = vsel %vm674_vm0, %v926_v29, -inf }
 0x18b   : > { %1016 = vmax.xlane.f32.xlu1 %v1015_v31 }
 0x18f   : > { %1019 = vmax.xlane.f32.xlu1 %v1018_v32 }
 0x210   : > { %v1011_v35 = vpop.xlane.xlu0 %1010 }
 0x211   : > { %v3142_v36 = vmax.f32 %v3139_v34, %v1011_v35 }
 0x213   : > { %v1025_v38 = vsub.f32 %v3139_v34, %v3142_v36  ;;  %1426 = vst.msk [vmem:[#allocation2] sm:$0xff] %vm665_vm2, %v3142_v36  ;;  %1039 = vperm.xlu0 %2484, %v3142_v36  }
 0x214   : > { %v1014_v39 = vpop.xlane.xlu0 %1013 }
 0x215   : > { %v1022_v40 = vmax.f32 %v3144_v37, %v1014_v39  ;;  %v1029_v12 = vmul.f32 1.442695, %v1025_v38 }
 0x217   : > { %v1026_v42 = vsub.f32 %v3144_v37, %v1022_v40  ;;  %1427 = vst.msk [vmem:[#allocation2 + $0x8] sm:$0xff] %vm665_vm2, %v1022_v40  ;;  %1044 = vperm.xlu1 %2485, %v1022_v40   ;;  %v1469_v40 = vld [vmem:[%s3339_s5] sm:$0xff] }
 0x218   : > { %v1017_v43 = vpop.xlane.xlu1 %1016 }
 0x219   : > { %v1023_v44 = vmax.f32 %v3152_v41, %v1017_v43  ;;  %v1031_v10 = vmul.f32 1.442695, %v1026_v42  ;;  %v1470_v42 = vld [vmem:[%s3339_s5 + $0x8] sm:$0xff] }
 0x21b   : > { %v1027_v46 = vsub.f32 %v3152_v41, %v1023_v44  ;;  %1428 = vst.msk [vmem:[#allocation2 + $0x10] sm:$0xff] %vm665_vm2, %v1023_v44  ;;  %1049 = vperm.xlu1 %2485, %v1023_v44  }
 0x21c   : > { %v1020_v47 = vpop.xlane.xlu1 %1019 }
 0x21d   : > { %v1024_v48 = vmax.f32 %v3157_v45, %v1020_v47  ;;  %v1033_v13 = vmul.f32 1.442695, %v1027_v46 }
 0x21f   : > { %v1028_v49 = vsub.f32 %v3157_v45, %v1024_v48  ;;  %1429 = vst.msk [vmem:[#allocation2 + $0x18] sm:$0xff] %vm665_vm2, %v1024_v48  ;;  %1054 = vperm.xlu1 %2485, %v1024_v48   ;;  %v1098_v45 = vld [vmem:[#allocation4] sm:$0xff]  ;;  %v1099_v48 = vld [vmem:[#allocation4 + $0x8] sm:$0xff] }
 0x221   : > { %v1035_v14 = vmul.f32 1.442695, %v1028_v49 }
 0x292   : > { %v1040_v52 = vpop.permute.xlu0 %1039 }
 0x293   : > { %v1057_v53 = vsub.f32 %v774_v18, %v1040_v52 }
 0x295   : > { %v1061_v54 = vmul.f32 1.442695, %v1057_v53 }
 0x296   : > { %v1045_v55 = vpop.permute.xlu1 %1044 }
 0x297   : > { %2486 = vpow2.f32 %v1061_v54  ;;  %v1058_v56 = vsub.f32 %v850_v25, %v1045_v55  ;;  %v1100_v55 = vld [vmem:[#allocation4 + $0x10] sm:$0xff] }
 0x299   : > { %v1063_v57 = vmul.f32 1.442695, %v1058_v56 }
 0x29a   : > { %v1050_v58 = vpop.permute.xlu1 %1049 }
 0x29b   : > { %2488 = vpow2.f32 %v1063_v57  ;;  %v1059_v59 = vsub.f32 %v926_v29, %v1050_v58 }
 0x29d   : > { %v1065_v60 = vmul.f32 1.442695, %v1059_v59 }
 0x29e   : > { %v1055_v61 = vpop.permute.xlu1 %1054 }
 0x29f   : > { %2490 = vpow2.f32 %v1065_v60  ;;  %v1060_v62 = vsub.f32 %v3133_v22, %v1055_v61  ;;  %v1070_v22 = vld [vmem:[#allocation3 + $0x8] sm:$0xff]  ;;  %v1101_v60 = vld [vmem:[#allocation4 + $0x18] sm:$0xff] }
 0x2a1   : > { %v2487_v1 = vpop.eup %2486  ;;  %v1067_v2 = vmul.f32 1.442695, %v1060_v62 }
 0x2a2   : > { %2308 = vmatmul.mubr.msk.f32.vlgmr.msra.gmra.mrb[6].mxu0 %vm674_vm0, %v2487_v1  ;;  %v1077_v3 = vsel %vm674_vm0, %v2487_v1, 0.0 }
 0x2a3   : > { %2492 = vpow2.f32 %v1067_v2  ;;  %1078 = vadd.xlane.f32.xlu1 %v1077_v3  ;;  %2316 = vmatpush3.msra.mxu0 %v689_v63 }
 0x2a4   : > { %2317 = vmatprep.mubr.msk.f32.mxu0 %vm2731_vm1, %v2730_v0  ;;  %2325 = vmatprep.subr.mxu0 %v2730_v0  ;;  %2494 = vpow2.f32 %v1031_v10 }
 0x2a5   : > { %v2489_v5 = vpop.eup %2488  ;;  %2496 = vpow2.f32 %v1029_v12 }
 0x2a6   : > { %2313 = vmatmul.mubr.msk.f32.vlgmr.msra.gmra.mrb[2].mxu1 %vm674_vm0, %v2489_v5  ;;  %v1080_v6 = vsel %vm674_vm0, %v2489_v5, 0.0  ;;  %2498 = vpow2.f32 %v1033_v13  ;;  %v1472_v13 = vld [vmem:[%s3339_s5 + $0x18] sm:$0xff] }
 0x2a7   : > { %1081 = vadd.xlane.f32.xlu0 %v1080_v6  ;;  %2321 = vmatpush3.msra.mxu1 %v690_v4  ;;  %2500 = vpow2.f32 %v1035_v14 }
 0x2a8   : > { %2322 = vmatprep.mubr.msk.f32.mxu1 %vm2731_vm1, %v2730_v0  ;;  %2330 = vmatprep.subr.mxu1 %v2730_v0 }
 0x2a9   : > { %v2491_v7 = vpop.eup %2490 }
 0x2aa   : > { %2318 = vmatmul.mubr.msk.f32.vlgmr.msra.gmra.mrb[8].mxu0 %vm674_vm0, %v2491_v7  ;;  %v1083_v8 = vsel %vm674_vm0, %v2491_v7, 0.0 }
 0x2ab   : > { %1084 = vadd.xlane.f32.xlu1 %v1083_v8  ;;  %2327 = vmatprep.mubr.msk.f32.mxu0 %vm2731_vm1, %v2730_v0 }
 0x2ac   : > { %2326 = vmatpush3.msra.mxu0 %v1469_v40 }
 0x2ad   : > { %v2493_v9 = vpop.eup %2492  ;;  %2335 = vmatprep.subr.mxu0 %v2730_v0 }
 0x2ae   : > { %2323 = vmatmul.mubr.msk.f32.vlgmr.msra.gmra.mrb[4].mxu1 %vm674_vm0, %v2493_v9  ;;  %v1086_v11 = vsel %vm674_vm0, %v2493_v9, 0.0  ;;  %v2495_v15 = vpop.eup %2494  ;;  %v1471_v9 = vld [vmem:[%s3339_s5 + $0x10] sm:$0xff] }
 0x2af   : > { %1087 = vadd.xlane.f32.xlu1 %v1086_v11  ;;  %2332 = vmatprep.mubr.msk.f32.mxu1 %vm2731_vm1, %v2730_v0  ;;  %v2497_v16 = vpop.eup %2496  ;;  %v1074_v24 = vmul.f32 %v2495_v15, %v1070_v22 }
 0x2b0   : > { %v2499_v17 = vpop.eup %2498  ;;  %v1073_v20 = vmul.f32 %v2497_v16, %v1069_v19  ;;  %2331 = vmatpush3.msra.mxu1 %v1470_v42  ;;  %v1805_v42 = vld [vmem:[#allocation11] sm:$0xff] }
 0x2b1   : > { %v2501_v18 = vpop.eup %2500  ;;  %v1075_v28 = vmul.f32 %v2499_v17, %v1071_v26  ;;  %2340 = vmatprep.subr.mxu1 %v2730_v0 }
 0x2b2   : > { %v1076_v33 = vmul.f32 %v2501_v18, %v1072_v30 }
 0x2bd   : > { %1109 = vperm.xlu0 %2484, %v2495_v15  }
 0x2c0   : > { %1104 = vperm.xlu1 %2485, %v2497_v16  }
 0x2c4   : > { %1114 = vperm.xlu1 %2485, %v2499_v17  }
 0x2c8   : > { %1119 = vperm.xlu1 %2485, %v2501_v18  }
 0x330   : > { %v1079_v21 = vpop.xlane.xlu1 %1078 }
 0x331   : > { %v1089_v23 = vadd.f32 %v1079_v21, %v1073_v20 }
 0x333   : > { %1094 = vst.msk [vmem:[#allocation3] sm:$0xff] %vm665_vm2, %v1089_v23 }
 0x334   : > { %v1082_v25 = vpop.xlane.xlu0 %1081 }
 0x335   : > { %v1090_v27 = vadd.f32 %v1082_v25, %v1074_v24 }
 0x337   : > { %1095 = vst.msk [vmem:[#allocation3 + $0x8] sm:$0xff] %vm665_vm2, %v1090_v27 }
 0x338   : > { %v1085_v29 = vpop.xlane.xlu1 %1084 }
 0x339   : > { %v1091_v31 = vadd.f32 %v1085_v29, %v1075_v28 }
 0x33a   : > { %v1433_v32 = vld [vmem:[#allocation3] sm:$0xff] }
 0x33b   : > { %1096 = vst.msk [vmem:[#allocation3 + $0x10] sm:$0xff] %vm665_vm2, %v1091_v31  ;;  %2502 = vrcp.f32 %v1433_v32 }
 0x33c   : > { %v1088_v34 = vpop.xlane.xlu1 %1087  ;;  %v1110_v49 = vpop.permute.xlu0 %1109 }
 0x33d   : > { %v1092_v35 = vadd.f32 %v1088_v34, %v1076_v33  ;;  %v1123_v54 = vmul.f32 %v1110_v49, %v1099_v48  ;;  %v1773_v33 = vld [vmem:[%s3064_s23] sm:$0xff] }
 0x33e   : > { %v1434_v36 = vld [vmem:[#allocation3 + $0x8] sm:$0xff]  ;;  %v1890_v49 = vld [vmem:[%s3342_s8] sm:$0xff] }
 0x33f   : > { %1097 = vst.msk [vmem:[#allocation3 + $0x18] sm:$0xff] %vm665_vm2, %v1092_v35  ;;  %2504 = vrcp.f32 %v1434_v36 }
 0x340   : > { %v1105_v46 = vpop.permute.xlu1 %1104 }
 0x341   : > { %v1122_v47 = vmul.f32 %v1105_v46, %v1098_v45  ;;  %v2735_v45 = vmov 0.0|0.0   ;;  %v1807_v46 = vld [vmem:[#allocation11 + $0x10] sm:$0xff] }
 0x342   : > { %v1435_v37 = vld [vmem:[#allocation3 + $0x10] sm:$0xff] }
 0x343   : > { %2506 = vrcp.f32 %v1435_v37 }
 0x344   : > { %v1115_v53 = vpop.permute.xlu1 %1114 }
 0x345   : > { %v2503_v38 = vpop.eup %2502  ;;  %v1124_v59 = vmul.f32 %v1115_v53, %v1100_v55  ;;  %v1893_v53 = vld [vmem:[%s3342_s8 + $0x18] sm:$0xff]  ;;  %v1894_v55 = vld [vmem:[%s3342_s8 + $0x20] sm:$0xff] }
 0x346   : > { %1447 = vperm.xlu1 %2485, %v2503_v38   ;;  %v1436_v39 = vld [vmem:[#allocation3 + $0x18] sm:$0xff] }
 0x347   : > { %2508 = vrcp.f32 %v1436_v39 }
 0x348   : > { %v1120_v61 = vpop.permute.xlu1 %1119 }
 0x349   : > { %v2505_v41 = vpop.eup %2504  ;;  %v1125_v2 = vmul.f32 %v1120_v61, %v1101_v60 }
 0x34a   : > { %1452 = vperm.xlu0 %2484, %v2505_v41  }
 0x34d   : > { %v2507_v43 = vpop.eup %2506 }
 0x34e   : > { %1457 = vperm.xlu1 %2485, %v2507_v43   ;;  %v1806_v43 = vld [vmem:[#allocation11 + $0x8] sm:$0xff] }
 0x351   : > { %v2509_v44 = vpop.eup %2508 }
 0x352   : > { %1462 = vperm.xlu0 %2484, %v2509_v44   ;;  %v2376_v44 = vpack.c.bf16 %v1806_v43, %v1805_v42 }
 0x375   : > { %v1195_v50 = vpop.f32.mrb[6].mxu0 }
 0x376   : > { %v1418_v51 = vadd.f32 %v1195_v50, %v1122_v47  ;;  %v2309_v52 = vpop.f32.mrb[7].mxu0  ;;  %v1808_v47 = vld [vmem:[#allocation11 + $0x18] sm:$0xff] }
 0x377   : > { %v2379_v48 = vpack.c.bf16 %v1808_v47, %v1807_v46  ;;  %v1891_v50 = vld [vmem:[%s3342_s8 + $0x8] sm:$0xff] }
 0x378   : > { %1422 = vst.msk [vmem:[#allocation4] sm:$0xff] %vm674_vm0, %v1418_v51  ;;  %v1892_v51 = vld [vmem:[%s3342_s8 + $0x10] sm:$0xff]  ;;  %v2382_v52 = vpack.c.bf16 %v1891_v50, %v1890_v49 }
 0x379   : > { %v1268_v56 = vpop.f32.mrb[2].mxu1 }
 0x37a   : > { %v1419_v57 = vadd.f32 %v1268_v56, %v1123_v54  ;;  %v2314_v58 = vpop.f32.mrb[3].mxu1  ;;  %v2385_v54 = vpack.c.bf16 %v1893_v53, %v1892_v51  ;;  %v1895_v56 = vld [vmem:[%s3342_s8 + $0x28] sm:$0xff] }
 0x37c   : > { %1423 = vst.msk [vmem:[#allocation4 + $0x8] sm:$0xff] %vm674_vm0, %v1419_v57  ;;  %v2388_v57 = vpack.c.bf16 %v1895_v56, %v1894_v55 }
 0x37d   : > { %v1341_v62 = vpop.f32.mrb[8].mxu0 }
 0x37e   : > { %v1420_v63 = vadd.f32 %v1341_v62, %v1124_v59  ;;  %v2319_v1 = vpop.f32.mrb[9].mxu0  ;;  %v2232_v62 = vld [vmem:[%s3410_s15] ss:$0 sm:$0xff]  ;;  %s3416_s15 = sld [smem:[#allocation32_spill]] }
 0x37f   : > { %v1441_v6 = vld [vmem:[#allocation4] sm:$0xff] }
 0x380   : > { %1424 = vst.msk [vmem:[#allocation4 + $0x10] sm:$0xff] %vm674_vm0, %v1420_v63  ;;  %v2233_v1 = vld [vmem:[%s3411_s11] ss:$0 sm:$0xff]  ;;  %s2025_s11 = sshll.u32 %s646_s10, 4  ;;  %s3286_s11 = int_to_ptr.vmem [resolvable:$true] %s2025_s11 }
 0x381   : > { %v1414_v3 = vpop.f32.mrb[4].mxu1  ;;  %s2632_s23 = scalar_lea.vmem %s3286_s11, 128  ;;  %p2639_p10 = scmp.lt.s32.totalorder %s3286_s11, %s2637_s21 }
 0x382   : > { %v1421_v4 = vadd.f32 %v1414_v3, %v1125_v2  ;;  %v2324_v5 = vpop.f32.mrb[5].mxu1  ;;  %p2633_p13 = scmp.ne.s32.totalorder %s3286_s11, %s2632_s23 }
 0x383   : > { %v1442_v10 = vld [vmem:[#allocation4 + $0x8] sm:$0xff]  ;;  %v1897_v5 = vld [vmem:[%s3342_s8 + $0x38] sm:$0xff] }
 0x384   : > { %1425 = vst.msk [vmem:[#allocation4 + $0x18] sm:$0xff] %vm674_vm0, %v1421_v4  ;;  %v1896_v4 = vld [vmem:[%s3342_s8 + $0x30] sm:$0xff]  ;;  %p2634_p0 = pnand %p2633_p13, %p3418_p11 }
 0x386   : > { %p2635_p5 = pneg %p2634_p0 }
 0x387   : > { %v1443_v14 = vld [vmem:[#allocation4 + $0x10] sm:$0xff] }
 0x38b   : > { %v1444_v18 = vld [vmem:[#allocation4 + $0x18] sm:$0xff] }
 0x3c5   : > { %v1448_v7 = vpop.permute.xlu1 %1447 }
 0x3c6   : > { %v1465_v8 = vmul.f32 %v1448_v7, %v1441_v6  ;;  %v2391_v6 = vpack.c.bf16 %v1897_v5, %v1896_v4  ;;  %v2234_v7 = vld [vmem:[%s3412_s20] ss:$0 sm:$0xff]  ;;  %s2638_s20 = scalar_lea.vmem %s2637_s21, 256 }
 0x3c7   : > { %p2640_p7 = scmp.lt.s32.totalorder %s2638_s20, %s2632_s23 }
 0x3c8   : > { %2328 = vmatmul.mubr.msk.f32.vlgmr.msra.gmra.mrb[10].mxu0 %vm674_vm0, %v1465_v8 }
 0x3c9   : > { %v1453_v11 = vpop.permute.xlu0 %1452  ;;  %2336 = vmatpush3.msra.mxu0 %v1471_v9  ;;  %2337 = vmatprep.mubr.msk.f32.mxu0 %vm2731_vm1, %v2730_v0  ;;  %p2641_p4 = por %p2640_p7, %p2639_p10 }
 0x3ca   : > { %v1466_v12 = vmul.f32 %v1453_v11, %v1442_v10  ;;  %2375 = vmatprep.subr.bf16.mxu0 %v2735_v45 }
 0x3cb   : > { %p2642_p3 = pnand %p2641_p4, %p2635_p5 }
 0x3cc   : > { %2333 = vmatmul.mubr.msk.f32.vlgmr.msra.gmra.mrb[6].mxu1 %vm674_vm0, %v1466_v12  ;;  %v2236_v12 = vld [vmem:[%s3413_s18] ss:$0 sm:$0xff] }
 0x3cd   : > { %v1458_v15 = vpop.permute.xlu1 %1457  ;;  %2341 = vmatpush3.msra.mxu1 %v1472_v13  ;;  %2342 = vmatprep.mubr.msk.f32.mxu1 %vm2731_vm1, %v2730_v0 }
 0x3ce   : > { %v1467_v16 = vmul.f32 %v1458_v15, %v1443_v14  ;;  %2381 = vmatprep.subr.bf16.mxu1 %v2735_v45 }
 0x3d0   : > { %2338 = vmatmul.mubr.msk.f32.vlgmr.msra.gmra.mrb[12].mxu0 %vm674_vm0, %v1467_v16 }
 0x3d1   : > { %v1463_v17 = vpop.permute.xlu0 %1462  ;;  %2353 = vmatprep.mubr.msk.f32.mxu0 %vm2731_vm1, %v2730_v0  ;;  %2377 = vmatpush3.bf16.msra.mxu0 %v2376_v44 }
 0x3d2   : > { %v1468_v19 = vmul.f32 %v1463_v17, %v1444_v18  ;;  %2378 = vmatprep.subr.bf16.mxu0 %v2735_v45 }
 0x3d4   : > { %2343 = vmatmul.mubr.msk.f32.vlgmr.msra.gmra.mrb[8].mxu1 %vm674_vm0, %v1468_v19 }
 0x3d5   : > { %2372 = vmatprep.mubr.msk.f32.mxu1 %vm2731_vm1, %v2730_v0  ;;  %2380 = vmatpush3.bf16.msra.mxu0 %v2379_v48 }
 0x3d6   : > { %2383 = vmatpush3.bf16.msra.mxu1 %v2382_v52 }
 0x3d7   : > { %2384 = vmatprep.subr.bf16.mxu1 %v2735_v45 }
 0x3da   : > { %2386 = vmatpush3.bf16.msra.mxu1 %v2385_v54 }
 0x3db   : > { %2387 = vmatprep.subr.bf16.mxu1 %v2735_v45 }
 0x3de   : > { %2389 = vmatpush3.bf16.msra.mxu1 %v2388_v57 }
 0x3df   : > { %2390 = vmatprep.subr.bf16.mxu1 %v2735_v45 }
 0x3e2   : > { %2392 = vmatpush3.bf16.msra.mxu1 %v2391_v6 }
 0x49b   : > { %v1542_v20 = vpop.f32.mrb[10].mxu0 }
 0x49c   : > { %v2329_v21 = vpop.f32.mrb[11].mxu0  ;;  %v1766_v23 = vsel %vm1765_vm4, %v1542_v20, 0.0 }
 0x49f   : > { %v1615_v22 = vpop.f32.mrb[6].mxu1 }
 0x4a0   : > { %v1767_v24 = vsel %vm1765_vm4, %v1615_v22, 0.0  ;;  %v2334_v25 = vpop.f32.mrb[7].mxu1 }
 0x4a1   : > { %v1768_v26 = vadd.f32 %v1767_v24, %v1766_v23 }
 0x4a3   : > { %v1688_v27 = vpop.f32.mrb[12].mxu0 }
 0x4a4   : > { %v1769_v28 = vsel %vm1765_vm4, %v1688_v27, 0.0  ;;  %v2339_v29 = vpop.f32.mrb[13].mxu0  ;;  %v2238_v27 = vld [vmem:[%s3415_s25] ss:$0 sm:$0xff] }
 0x4a5   : > { %v1770_v30 = vadd.f32 %v1769_v28, %v1768_v26  ;;  %v2239_v29 = vld [vmem:[%s3416_s15] ss:$0 sm:$0xff] }
 0x4a7   : > { %v1761_v31 = vpop.f32.mrb[8].mxu1 }
 0x4a8   : > { %v1771_v32 = vsel %vm1765_vm4, %v1761_v31, 0.0  ;;  %v2344_v0 = vpop.f32.mrb[9].mxu1 }
 0x4a9   : > { %v1772_v34 = vadd.f32 %v1771_v32, %v1770_v30 }
 0x4ab   : > { %v1774_v35 = vadd.f32 %v1773_v33, %v1772_v34 }
 0x4ad   : > { %v1775_v36 = vsel %vm1765_vm4, %v1774_v35, 0.0 }
 0x4ae   : > { %1776 = vadd.xlane.f32.xlu1 %v1775_v36 }
 0x53b   : > { %v1777_v37 = vpop.xlane.xlu1 %1776 }
 0x53c   : > { %v1779_v38 = vmul.f32 0.03125, %v1777_v37 }
 0x53e   : > { %v1780_v39 = vsub.f32 %v1774_v35, %v1779_v38 }
 0x540   : > { %v1781_v40 = vmul.f32 %v1780_v39, %v1780_v39 }
 0x542   : > { %v1782_v41 = vsel %vm1765_vm4, %v1781_v40, 0.0 }
 0x543   : > { %1783 = vadd.xlane.f32.xlu0 %v1782_v41 }
 0x5d0   : > { %v1784_v58 = vpop.xlane.xlu0 %1783 }
 0x5d1   : > { %v1785_v59 = vmul.f32 0.03125, %v1784_v58 }
 0x5d3   : > { %v1786_v60 = vadd.f32 1e-05, %v1785_v59 }
 0x5d5   : > { %2510 = vrsqrt.f32 %v1786_v60 }
 0x5df   : > { %v2511_v61 = vpop.eup %2510 }
 0x5e0   : > { %v1788_v63 = vmul.f32 %v2511_v61, %v1780_v39 }
 0x5e2   : > { %v1796_v2 = vmul.f32 %v2232_v62, %v1788_v63 }
 0x5e4   : > { %v1804_v3 = vadd.f32 %v2233_v1, %v1796_v2 }
 0x5e6   : > { %2354 = vmatmul.mubr.msk.f32.vlgmr.msra.gmra.mrb[14].mxu0 %vm1765_vm4, %v1804_v3 }
 0x6b9   : > { %v1885_v8 = vpop.f32.mrb[14].mxu0 }
 0x6ba   : > { %v1886_v9 = vadd.f32 %v2234_v7, %v1885_v8  ;;  %v2355_v10 = vpop.f32.mrb[15].mxu0 }
 0x6bc   : > { %v1889_v11 = vmax.f32 %v1886_v9, 0.0 }
 0x6be   : > { %2373 = vmatmul.mubr.msk.f32.vlgmr.msra.gmra.mrb[10].mxu1 %vm1905_vm5, %v1889_v11 }
 0x791   : > { %v1975_v13 = vpop.f32.mrb[10].mxu1 }
 0x792   : > { %v1976_v14 = vadd.f32 %v2236_v12, %v1975_v13  ;;  %v2374_v15 = vpop.f32.mrb[11].mxu1 }
 0x794   : > { %v1979_v16 = vadd.f32 %v1976_v14, %v1804_v3 }
 0x796   : > { %v1980_v17 = vsel %vm1765_vm4, %v1979_v16, 0.0 }
 0x797   : > { %1981 = vadd.xlane.f32.xlu0 %v1980_v17 }
 0x824   : > { %v1982_v18 = vpop.xlane.xlu0 %1981 }
 0x825   : > { %v1983_v19 = vmul.f32 0.03125, %v1982_v18 }
 0x827   : > { %v1984_v20 = vsub.f32 %v1979_v16, %v1983_v19 }
 0x829   : > { %v1985_v21 = vmul.f32 %v1984_v20, %v1984_v20 }
 0x82b   : > { %v1986_v22 = vsel %vm1765_vm4, %v1985_v21, 0.0 }
 0x82c   : > { %1987 = vadd.xlane.f32.xlu1 %v1986_v22 }
 0x8b9   : > { %v1988_v23 = vpop.xlane.xlu1 %1987 }
 0x8ba   : > { %v1989_v24 = vmul.f32 0.03125, %v1988_v23 }
 0x8bc   : > { %v1990_v25 = vadd.f32 1e-05, %v1989_v24 }
 0x8be   : > { %2512 = vrsqrt.f32 %v1990_v25 }
 0x8c8   : > { %v2513_v26 = vpop.eup %2512 }
 0x8c9   : > { %v1992_v28 = vmul.f32 %v2513_v26, %v1984_v20 }
 0x8cb   : > { %v2000_v30 = vmul.f32 %v2238_v27, %v1992_v28 }
 0x8cd   : > { %v2008_v31 = vadd.f32 %v2239_v29, %v2000_v30 }
 0x8cf   : > { %2009 = vst.msk [vmem:[%s646_s10] sm:$0xff] %vm1765_vm4, %v2008_v31 }
 0x8d0   : > { %2645 = shalt.err (!%p2642_p3)
}
 0x8d1   : > { %s2646_s12 = scalar_lea.hbm %s3284_s26, 128  ;;  %s2650_s18 = scalar_lea.hbm %s3417_s14, 256 }
 0x8d2   : > { %p2647_p8 = scmp.ne.s32.totalorder %s3284_s26, %s2646_s12  ;;  %p2651_p12 = scmp.lt.u32.totalorder %s3284_s26, %s3417_s14 }
 0x8d3   : > { %p2652_p1 = scmp.lt.u32.totalorder %s2650_s18, %s2646_s12  ;;  %p2654_p13 = scmp.lt.u32.totalorder %s2646_s12, %s3284_s26 }
 0x8d4   : > { %p2648_p6 = pnand %p2647_p8, %p3418_p11 }
 0x8d5   : > { %p2653_p2 = por %p2652_p1, %p2651_p12 }
 0x8d6   : > { %p2649_p9 = pneg %p2648_p6 }
 0x8d7   : > { %p2655_p0 = por %p2654_p13, %p2653_p2 }
 0x8d9   : > { %p2656_p5 = pnand %p2655_p0, %p2649_p9 }
 0x8db   : > { %2659 = shalt.err (!%p2656_p5)
}
 0x8dc   : > { %2403 = dma.vmem_to_hbm [thread:$0]  (%p3418_p11), %s3286_s11, 128, %s3284_s26, %s2011_s28  }
 0x8dd PF: > { %s3419_s25 = sld [smem:[#allocation18_spill]]  ;;  %s3420_s7 = sld [smem:[#allocation24_spill]] }
 0x8de   : > { %s3421_s29 = sld [smem:[#allocation20_spill]] }
 0x8e3   : > { %s2037_s15 = sand.u32 1, %s3419_s25   ;;  %p3422_p10 = scmp.ne.s32.totalorder %s3420_s7, 0 }
 0x8e4   : > { %p3423_p7 = scmp.ge.s32.totalorder %s3421_s29, 2  ;;  %s2038_s1 = scalar_lea.sflag [#allocation7], %s2037_s15 }
 0x8e6   : > { %p2420_p4 = pnand %p3423_p7, %p3422_p10 }
 0x8e8   : > { %2697 = dma.done.wait (!%p2420_p4), %s2038_s1, 128  }
 0x8e9   : > { %2699 = vsyncadd (!%p2420_p4), %s2038_s1, 4294967168  ;;  %s34_s18 = sadd.s32 1, %s3421_s29   ;;  %s3424_s10 = sld [smem:[#allocation19_spill]] }
 0x8ea   : > { %p31_p3 = scmp.ge.s32.totalorder %s34_s18, 4   ;;  %s3425_s15 = sld [smem:[#allocation22_spill]] }
 0x8eb   : > { %s3426_s13 = sld [smem:[#allocation21_spill]]  ;;  %s3427_s29 = smov %s2706_s30 }
 0x8ec   : > { %s3429_s16 = smov %s2718_s17  ;;  %33 = sbr.rel (!%p31_p3) target bundleno = 19 (0x13), region = 163 }
 0x8ef   : > { %s3428_s30 = smov %s3424_s10 }
 0x8f1   : > { %s3430_s17 = smov %s3426_s13 }
 0x8f3   :  { %2043 = vsyncpa [#allocation6], 1 }
 0x8f4   :  { %2045 = vsyncpa [#allocation6 + $0x1], 1 }
 0x8f5   :  { %2046 = vsyncpa [#allocation9], 1 }
 0x8f6   :  { %2048 = vsyncpa [#allocation9 + $0x1], 1 }
 0x8f7   :  { %2049 = vsyncpa [#allocation12], 1 }
 0x8f8   :  { %2050 = vsyncpa [#allocation7], 1 }
 0x8f9   :  { %2052 = vsyncpa [#allocation7 + $0x1], 1 }

// kernel: tpu_custom_call.1
= control target key start
LH: loop header
LB: loop body
LE: loop exit
PB: predicated region body
PF: predicated region fallthrough
CT: control target
= control target key end

     0   :  { %s3334_s0 = inlined_call_operand.vmem [shape: f32[2,4,8,8], index: 0, kind: input, shape index: {}]   ;;  %s3335_s1 = inlined_call_operand.hbm [shape: f32[2,4,8,8], index: 1, kind: input, shape index: {}]   ;;  %s3336_s2 = inlined_call_operand.hbm [shape: f32[2,4,8,8], index: 2, kind: input, shape index: {}]   ;;  %s3337_s3 = inlined_call_operand.hbm [shape: f32[2,8,32], index: 3, kind: input, shape index: {}]   ;;  %s3338_s4 = inlined_call_operand.vmem [shape: f32[2,1,8], index: 4, kind: input, shape index: {}]   ;;  %s3339_s5 = inlined_call_operand.vmem [shape: f32[4,8,32], index: 5, kind: input, shape index: {}]   ;;  %s3340_s6 = inlined_call_operand.hbm [shape: f32[32,64], index: 6, kind: input, shape index: {}]   ;;  %s3341_s7 = inlined_call_operand.vmem [shape: f32[1,64], index: 7, kind: input, shape index: {}]   ;;  %s3342_s8 = inlined_call_operand.vmem [shape: f32[64,32], index: 8, kind: input, shape index: {}]   ;;  %s3343_s9 = inlined_call_operand.vmem [shape: f32[1,32], index: 9, kind: input, shape index: {}]   ;;  %s3344_s10 = inlined_call_operand.vmem [shape: f32[1,32], index: 10, kind: input, shape index: {}]   ;;  %s3345_s11 = inlined_call_operand.vmem [shape: f32[1,32], index: 11, kind: input, shape index: {}]   ;;  %s3346_s12 = inlined_call_operand.vmem [shape: f32[1,32], index: 12, kind: input, shape index: {}]   ;;  %s3347_s13 = inlined_call_operand.vmem [shape: f32[1,32], index: 13, kind: input, shape index: {}]   ;;  %s3348_s14 = inlined_call_operand.hbm [shape: f32[2,8,32], index: 14, kind: output, shape index: {}]  }
   0x1   :  { %3373 = sst [smem:[#allocation25_spill]] %s3335_s1 }
   0x2   :  { %3374 = sst [smem:[#allocation26_spill]] %s3336_s2 }
   0x3   :  { %3375 = sst [smem:[#allocation27_spill]] %s3341_s7 }
   0x4   :  { %3376 = sst [smem:[#allocation28_spill]] %s3343_s9 }
   0x5   :  { %3377 = sst [smem:[#allocation29_spill]] %s3344_s10 }
   0x6   :  { %3378 = sst [smem:[#allocation30_spill]] %s3345_s11 }
   0x7   :  { %3379 = sst [smem:[#allocation31_spill]] %s3346_s12 }
   0x8   :  { %3380 = sst [smem:[#allocation32_spill]] %s3347_s13 }
   0x9   :  { %3381 = sst [smem:[#allocation33_spill]] %s3348_s14 }
   0xa   :  { %19 = vsyncpa [#allocation6], 0 }
   0xb   :  { %21 = vsyncpa [#allocation6 + $0x1], 0 }
   0xc   :  { %22 = vsyncpa [#allocation9], 0 }
   0xd   :  { %24 = vsyncpa [#allocation9 + $0x1], 0 }
   0xe   :  { %25 = vsyncpa [#allocation12], 0 }
   0xf   :  { %26 = vsyncpa [#allocation7], 0 }
  0x10   :  { %28 = vsyncpa [#allocation7 + $0x1], 0  ;;  %s2812_s29 = smov 0   ;;  %s2814_s30 = smov 0  }
  0x11   :  { %s2816_s15 = smov 0   ;;  %s2818_s16 = smov 0  }
  0x12   :  { %s2820_s17 = smov 0   ;;  %s2822_s18 = smov 0  }
  0x13 LB: > { %3382 = sst [smem:[#allocation18_spill]] %s2702_s29  ;;  %s53_s19 = sadd.s32 1, %s2718_s17  ;;  %s2722_s18 = sphi %s2822_s18, %s34_s18   ;;  %s2718_s17 = sphi %s2820_s17, %s3430_s17   ;;  %s2714_s16 = sphi %s2818_s16, %s3429_s16   ;;  %s2710_s15 = sphi %s2816_s15, %s3425_s15   ;;  %s2706_s30 = sphi %s2814_s30, %s3428_s30   ;;  %s2702_s29 = sphi %s2812_s29, %s3427_s29  }
  0x14   : > { %3383 = sst [smem:[#allocation19_spill]] %s2710_s15  ;;  %s90_s20 = sadd.s32 1, %s2710_s15 }
  0x15   : > { %3384 = sst [smem:[#allocation20_spill]] %s2722_s18  ;;  %p55_p0 = scmp.ge.s32.totalorder %s53_s19, 2 }
  0x16   : > { %p3353_p1 = scmp.ne.s32.totalorder %s2710_s15, %s2706_s30  ;;  %p98_p2 = scmp.eq.s32.totalorder %s2722_s18, 0 }
  0x17   : > { %s3432_s19 = smov (%p55_p0, %s53_s19), 0  ;;  %p2424_p6 = scmp.lt.s32.totalorder %s2722_s18, 2 }
  0x18   : > { %3385 = sst [smem:[#allocation21_spill]] %s3432_s19  ;;  %p99_p3 = por %p98_p2, %p3353_p1 }
  0x19   : > { %s85_s21 = ssub.s32 %s2718_s17, %s3432_s19  ;;  %s2857_s22 = sand.u32 1, %s2710_s15  }
  0x1a   : > { %p88_p5 = scmp.eq.s32.totalorder %s85_s21, 0  ;;  %s3352_s23 = sshll.u32 %s2718_s17, 9 }
  0x1b   : > { %s3351_s25 = sshll.u32 %s2857_s22, 5  ;;  %p2864_p7 = pnand %p2424_p6, %p99_p3 }
  0x1c   : > { %s2861_s24 = scalar_select %p88_p5, %s2710_s15, %s90_s20  }
  0x1d   : > { %s3387_s26 = scalar_select %p2864_p7, 1, 0 }
  0x1e   : > { %3386 = sst [smem:[#allocation22_spill]] %s2861_s24  ;;  %s498_s27 = sand.u32 1, %s2722_s18  }
  0x1f   : > { %s3388_s2 = sld [smem:[#allocation26_spill]]  ;;  %s502_s20 = scalar_lea.vmem [#allocation8], %s3351_s25 }
  0x20   : > { %s510_s24 = sshll.u32 %s502_s20, 4  ;;  %s2880_s14 = scalar_lea.sflag [#allocation9], %s498_s27  ;;  %s2878_s24 = int_to_ptr.vmem [resolvable:$true] %s510_s24 }
  0x21   : > { %p2886_p9 = pneg %p2864_p7 }
  0x23   : > { %s3389_s12 = scalar_select %p2886_p9, 1, 0 }
  0x25   : > { %s2874_s21 = scalar_lea.hbm %s3388_s2, %s3352_s23  ;;  %s2519_s25 = scalar_lea.hbm %s3388_s2, 1024 }
  0x26   : > { %s2514_s13 = scalar_lea.hbm %s2874_s21, 512  ;;  %p2520_p12 = scmp.lt.u32.totalorder %s2874_s21, %s3388_s2 }
  0x27   : > { %p2515_p8 = scmp.ne.s32.totalorder %s2874_s21, %s2514_s13  ;;  %p2521_p13 = scmp.lt.u32.totalorder %s2519_s25, %s2514_s13 }
  0x28   : > { %p2523_p2 = scmp.lt.u32.totalorder %s2514_s13, %s2874_s21 }
  0x29   : > { %p2517_p10 = pnand %p2886_p9, %p2515_p8  ;;  %p2522_p0 = por %p2521_p13, %p2520_p12 }
  0x2b   : > { %p2518_p11 = pneg %p2517_p10  ;;  %p2524_p3 = por %p2523_p2, %p2522_p0 }
  0x2d   : > { %p2525_p5 = pnand %p2524_p3, %p2518_p11 }
  0x2f   : > { %2528 = shalt.err (!%p2525_p5)
}
  0x30   : > { %s2529_s27 = scalar_lea.vmem %s2878_s24, 512  ;;  %s2724_s19 = smov [#allocation8]  }
  0x31   : > { %p2530_p6 = scmp.ne.s32.totalorder %s2878_s24, %s2529_s27  ;;  %s2534_s28 = sshll.u32 %s2724_s19, 4  ;;  %s2535_s28 = int_to_ptr.vmem [resolvable:$false] %s2534_s28 }
  0x32   : > { %s2536_s23 = scalar_lea.vmem %s2535_s28, 1024  ;;  %p2537_p4 = scmp.lt.s32.totalorder %s2878_s24, %s2535_s28 }
  0x33   : > { %p2532_p8 = pnand %p2530_p6, %p2886_p9  ;;  %p2538_p1 = scmp.lt.s32.totalorder %s2536_s23, %s2529_s27 }
  0x35   : > { %p2533_p10 = pneg %p2532_p8  ;;  %p2539_p12 = por %p2538_p1, %p2537_p4 }
  0x37   : > { %p2540_p13 = pnand %p2539_p12, %p2533_p10 }
  0x39   : > { %2543 = shalt.err (!%p2540_p13)
}
  0x3a   : > { %s3354_s13 = smov 128   ;;  %s3356_s25 = smov 8  }
  0x3b   : > { %2415 = dma.hbm_to_vmem [thread:$0]  (!%p2864_p7), %s2874_s21, 512, %s2878_s24, %s2880_s14, %s3354_s13, %s3354_s13, %s3356_s25  }
  0x3c   : > { %s2914_s20 = sadd.s32 4294967295, %s2722_s18   ;;  %s2196_s27 = sadd.s32 4294967294, %s2722_s18  }
  0x3d   : > { %p103_p1 = scmp.ne.s32.totalorder %s2706_s30, %s2702_s29  ;;  %p3365_p4 = scmp.eq.s32.totalorder %s2914_s20, 0 }
  0x3e   : > { %p402_p11 = scmp.eq.s32.totalorder %s2914_s20, 1  ;;  %p408_p0 = scmp.eq.s32.totalorder %s2196_s27, 1 }
  0x3f   : > { %p2197_p2 = scmp.ge.s32.totalorder %s2722_s18, 1  ;;  %p2924_p3 = por %p3365_p4, %p103_p1 }
  0x40   : > { %p3391_p5 = scmp.ne.s32.totalorder %s2710_s15, %s2706_s30  ;;  %p2935_p8 = por %p408_p0, %p103_p1 }
  0x41   : > { %s3390_s19 = scalar_select %p2924_p3, 1, 0 }
  0x42   : > { %p2931_p6 = por %p402_p11, %p3391_p5  ;;  %p415_p10 = scmp.lt.s32.totalorder %s2722_s18, 3 }
  0x43   : > { %s3394_s21 = scalar_select %p2935_p8, 1, 0 }
  0x44   : > { %s3392_s24 = scalar_select %p2931_p6, 1, 0 }
  0x45   : > { %3395 = sst [smem:[#allocation24_spill]] %s3394_s21  ;;  %p2940_p12 = pnand %p2197_p2, %p415_p10 }
  0x46   : > { %3393 = sst [smem:[#allocation23_spill]] %s3392_s24  ;;  %s2727_s23 = smov [#allocation11]  }
  0x47   : > { %s3396_s28 = scalar_select %p2940_p12, 1, 0 }
  0x48   : > { %s430_s27 = sshll.u32 %s2727_s23, 4  ;;  %p2405_p13 = pneg %p2940_p12  ;;  %s2944_s27 = int_to_ptr.vmem [resolvable:$true] %s430_s27 }
  0x49   : > { %s3397_s13 = sshll.u32 %s2718_s17, 9  ;;  %s3398_s1 = sld [smem:[#allocation25_spill]] }
  0x4a   : > { %s3399_s29 = sshll.u32 %s2857_s22, 5  ;;  %p2959_p1 = pnand %p2405_p13, %p3365_p4 }
  0x4b   : > { %s480_s18 = scalar_lea.vmem [#allocation5], %s3399_s29  ;;  %s477_s24 = scalar_lea.sflag [#allocation6], %s2857_s22 }
  0x4c   : > { %s488_s21 = sshll.u32 %s480_s18, 4  ;;  %s2963_s21 = int_to_ptr.vmem [resolvable:$true] %s488_s21 }
  0x4d   : > { %s3400_s23 = scalar_select %p2959_p1, 1, 0 }
  0x4f   : > { %s2953_s15 = scalar_lea.hbm %s3398_s1, %s3397_s13  ;;  %s2549_s25 = scalar_lea.hbm %s3398_s1, 1024 }
  0x50   : > { %s2544_s9 = scalar_lea.hbm %s2953_s15, 512  ;;  %p2550_p5 = scmp.lt.u32.totalorder %s2953_s15, %s3398_s1 }
  0x51   : > { %p2545_p11 = scmp.ne.s32.totalorder %s2953_s15, %s2544_s9  ;;  %p2551_p10 = scmp.lt.u32.totalorder %s2549_s25, %s2544_s9 }
  0x52   : > { %p2553_p4 = scmp.lt.u32.totalorder %s2544_s9, %s2953_s15 }
  0x53   : > { %p2547_p0 = pnand %p2545_p11, %p2886_p9  ;;  %p2552_p13 = por %p2551_p10, %p2550_p5 }
  0x55   : > { %p2548_p2 = pneg %p2547_p0  ;;  %p2554_p8 = por %p2553_p4, %p2552_p13 }
  0x57   : > { %p2555_p6 = pnand %p2554_p8, %p2548_p2 }
  0x59   : > { %2558 = shalt.err (!%p2555_p6)
}
  0x5a   : > { %s2559_s18 = scalar_lea.vmem %s2963_s21, 512  ;;  %s2728_s2 = smov [#allocation5]  }
  0x5b   : > { %p2560_p11 = scmp.ne.s32.totalorder %s2963_s21, %s2559_s18  ;;  %s2564_s13 = sshll.u32 %s2728_s2, 4  ;;  %s2565_s13 = int_to_ptr.vmem [resolvable:$false] %s2564_s13 }
  0x5c   : > { %s2566_s7 = scalar_lea.vmem %s2565_s13, 1024  ;;  %p2567_p12 = scmp.lt.s32.totalorder %s2963_s21, %s2565_s13 }
  0x5d   : > { %p2562_p0 = pnand %p2560_p11, %p2886_p9  ;;  %p2568_p1 = scmp.lt.s32.totalorder %s2566_s7, %s2559_s18 }
  0x5f   : > { %p2563_p3 = pneg %p2562_p0  ;;  %p2569_p5 = por %p2568_p1, %p2567_p12 }
  0x61   : > { %p2570_p10 = pnand %p2569_p5, %p2563_p3 }
  0x63   : > { %2573 = shalt.err (!%p2570_p10)
}
  0x64   : > { %s3401_s9 = smov 8   ;;  %s3402_s25 = smov 128  }
  0x65   : > { %2412 = dma.hbm_to_vmem [thread:$0]  (!%p2864_p7), %s2953_s15, 512, %s2963_s21, %s477_s24, %s3402_s25, %s3402_s25, %s3401_s9  }
  0x66   : > { %s2206_s29 = sshll.u32 %s2857_s22, 3  ;;  %s2574_s18 = scalar_lea.hbm %s3340_s6, 512 }
  0x67   : > { %p2575_p4 = scmp.ne.s32.totalorder %s3340_s6, %s2574_s18  ;;  %p3403_p3 = scmp.ne.s32.totalorder %s3400_s23, 0 }
  0x68   : > { %p2581_p1 = scmp.lt.u32.totalorder %s2574_s18, %s3340_s6 }
  0x69   : > { %p2576_p6 = pneg %p3403_p3 }
  0x6b   : > { %p2577_p8 = pnand %p2576_p6, %p2575_p4 }
  0x6d   : > { %p2578_p12 = pneg %p2577_p8 }
  0x6f   : > { %p2583_p2 = pnand %p2581_p1, %p2578_p12 }
  0x71   : > { %2586 = shalt.err (!%p2583_p2)
}
  0x72   : > { %s2587_s15 = scalar_lea.vmem %s2944_s27, 512  ;;  %p2595_p5 = scmp.lt.s32.totalorder %s2944_s27, %s2944_s27 }
  0x73   : > { %p2588_p13 = scmp.ne.s32.totalorder %s2944_s27, %s2587_s15  ;;  %p2596_p10 = scmp.lt.s32.totalorder %s2587_s15, %s2587_s15 }
  0x75   : > { %p2590_p11 = pnand %p2588_p13, %p2576_p6  ;;  %p2597_p7 = por %p2596_p10, %p2595_p5 }
  0x77   : > { %p2591_p0 = pneg %p2590_p11 }
  0x79   : > { %p2598_p9 = pnand %p2597_p7, %p2591_p0 }
  0x7b   : > { %2601 = shalt.err (!%p2598_p9)
}
  0x7c   : > { %2408 = dma.hbm_to_vmem [thread:$0]  (!%p3403_p3), %s3340_s6, 512, %s2944_s27, [#allocation12], %s3402_s25, %s3402_s25, %s3401_s9  }
  0x7d   : > { %s2207_s11 = sshll.u32 %s2718_s17, 7  ;;  %s524_s23 = scalar_lea.vmem [#allocation10], %s2206_s29 }
  0x7e   : > { %s3021_s21 = scalar_lea.hbm %s3337_s3, %s2207_s11  ;;  %s532_s2 = sshll.u32 %s524_s23, 4  ;;  %s533_s2 = int_to_ptr.vmem [resolvable:$true] %s532_s2 }
  0x7f   : > { %s2602_s18 = scalar_lea.hbm %s3021_s21, 128  ;;  %p3404_p9 = scmp.ne.s32.totalorder %s3389_s12, 0 }
  0x80   : > { %p2603_p7 = scmp.ne.s32.totalorder %s3021_s21, %s2602_s18  ;;  %s2607_s9 = scalar_lea.hbm %s3337_s3, 256 }
  0x81   : > { %p2608_p3 = scmp.lt.u32.totalorder %s3021_s21, %s3337_s3  ;;  %p2609_p8 = scmp.lt.u32.totalorder %s2607_s9, %s2602_s18 }
  0x82   : > { %p2605_p4 = pnand %p2603_p7, %p3404_p9  ;;  %p2611_p1 = scmp.lt.u32.totalorder %s2602_s18, %s3021_s21 }
  0x83   : > { %p2610_p12 = por %p2609_p8, %p2608_p3 }
  0x84   : > { %p2606_p6 = pneg %p2605_p4 }
  0x85   : > { %p2612_p2 = por %p2611_p1, %p2610_p12 }
  0x87   : > { %p2613_p13 = pnand %p2612_p2, %p2606_p6 }
  0x89   : > { %2616 = shalt.err (!%p2613_p13)
}
  0x8a   : > { %s2617_s29 = scalar_lea.vmem %s533_s2, 128  ;;  %s2729_s15 = smov [#allocation10]  }
  0x8b   : > { %p2618_p11 = scmp.ne.s32.totalorder %s533_s2, %s2617_s29  ;;  %s2622_s1 = sshll.u32 %s2729_s15, 4  ;;  %s2623_s1 = int_to_ptr.vmem [resolvable:$false] %s2622_s1 }
  0x8c   : > { %s2624_s10 = scalar_lea.vmem %s2623_s1, 256  ;;  %p2625_p10 = scmp.lt.s32.totalorder %s533_s2, %s2623_s1 }
  0x8d   : > { %p2620_p0 = pnand %p2618_p11, %p3404_p9  ;;  %p2626_p7 = scmp.lt.s32.totalorder %s2624_s10, %s2617_s29 }
  0x8f   : > { %p2621_p5 = pneg %p2620_p0  ;;  %p2627_p4 = por %p2626_p7, %p2625_p10 }
  0x91   : > { %p2628_p3 = pnand %p2627_p4, %p2621_p5 }
  0x93   : > { %2631 = shalt.err (!%p2628_p3)
}
  0x94   : > { %p3405_p8 = scmp.ne.s32.totalorder %s3387_s26, 0  ;;  %p3406_p6 = scmp.ne.s32.totalorder %s3396_s28, 0 }
  0x95   : > { %s3044_s12 = sand.u32 (!%p3406_p6), 1, %s2706_s30   ;;  %p3407_p9 = scmp.ne.s32.totalorder (!%p3406_p6), %s3390_s19, 0 }
  0x96   : > { %2418 = dma.hbm_to_vmem [thread:$0]  (!%p3405_p8), %s3021_s21, 128, %s533_s2, %s2880_s14  }
  0x97   : > { %550 = sbr.rel (%p3406_p6) target bundleno = 2269 (0x8dd), region = 76  ;;  %s2209_s11 = sshll.u32 (!%p3406_p6), %s3044_s12, 5 }
  0x98   : > { %s553_s22 = scalar_lea.sflag (!%p3406_p6), [#allocation6], %s3044_s12  ;;  %s3048_s24 = scalar_lea.vmem (!%p3406_p6), [#allocation5], %s2209_s11 }
  0x9e   : > { %2685 = dma.done.wait (%p3407_p9), %s553_s22, 512  }
  0x9f   : > { %2687 = vsyncadd (%p3407_p9), %s553_s22, 4294966784  ;;  %s561_s14 = sand.u32 1, %s2914_s20   ;;  %s3055_s28 = scalar_lea.vmem [#allocation8], %s2209_s11 }
  0xa0   : > { %s562_s26 = scalar_lea.sflag [#allocation9], %s561_s14 }
  0xa1   : > { %2689 = dma.done.wait (%p3407_p9), %s562_s26, 640  }
  0xa2   : > { %2691 = vsyncadd (%p3407_p9), %s562_s26, 4294966656  ;;  %s2211_s21 = sshll.u32 %s3044_s12, 3  ;;  %p3408_p12 = scmp.eq.s32.totalorder %s2914_s20, 0 }
  0xa3   : > { %s3064_s23 = scalar_lea.vmem [#allocation10], %s2211_s21 }
  0xa4   : > { %2693 = dma.done.wait (%p3408_p12), [#allocation12], 512   ;;  %p3409_p1 = pmov %p3408_p12 }
  0xa5   : > { %vm674_vm0 = vcmask 64512   ;;  %p647_p2 = scmp.lt.s32.totalorder %s2714_s16, 1  ;;  %v2730_v0 = vmov 0.0   ;;  %vm2731_vm1 = vmmov 0   ;;  %v683_v1 = vld [vmem:[%s3048_s24] sm:$0xff]  ;;  %v684_v3 = vld [vmem:[%s3048_s24 + $0x8] sm:$0xff]  ;;  %v695_v10 = vlaneseq }
  0xa6   : > { %2695 = vsyncadd (%p3409_p1), [#allocation12], 4294966784  ;;  %2285 = vmatprep.subr.mxu0 %v2730_v0  ;;  %675 = vst.msk [vmem:[#allocation4] sm:$0xff] %vm674_vm0, %v2730_v0  ;;  %2287 = vmatprep.mubr.msk.f32.mxu0 %vm2731_vm1, %v2730_v0  ;;  %v686_v4 = vld [vmem:[%s3048_s24 + $0x18] sm:$0xff]  ;;  %v685_v7 = vld [vmem:[%s3048_s24 + $0x10] sm:$0xff]  ;;  %vm665_vm2 = vcmask 7168  }
  0xa7   : > { %676 = vst.msk [vmem:[#allocation4 + $0x8] sm:$0xff] %vm674_vm0, %v2730_v0  ;;  %677 = vst.msk [vmem:[#allocation4 + $0x10] sm:$0xff] %vm674_vm0, %v2730_v0  ;;  %s3083_s20 = scalar_select %p647_p2, %s2714_s16, 1  ;;  %2300 = vmatprep.subr.mxu1 %v2730_v0  ;;  %2302 = vmatprep.mubr.msk.f32.mxu1 %vm2731_vm1, %v2730_v0  ;;  %v2732_v9 = vmov -inf   ;;  %v696_v12 = vshrl.u32 %v695_v10, 7  ;;  %v2734_v33 = vmov 0  }
  0xa8   : > { %678 = vst.msk [vmem:[#allocation4 + $0x18] sm:$0xff] %vm674_vm0, %v2730_v0  ;;  %2286 = vmatpush3.xpose.msk.msra.mxu0 %vm674_vm0, %v683_v1  ;;  %2301 = vmatpush3.xpose.msk.msra.mxu1 %vm674_vm0, %v686_v4  ;;  %v2733_v14 = vmov -1e+30   ;;  %v687_v50 = vld [vmem:[%s3055_s28] sm:$0xff]  ;;  %v688_v51 = vld [vmem:[%s3055_s28 + $0x8] sm:$0xff]  ;;  %v689_v63 = vld [vmem:[%s3055_s28 + $0x10] sm:$0xff] }
  0xa9   : > { %s2246_s19 = sshll.u32 %s3083_s20, 5  ;;  %2290 = vmatprep.subr.mxu0 %v2730_v0  ;;  %2310 = vmatprep.subr.mxu1 %v2730_v0  ;;  %666 = vst.msk [vmem:[#allocation2] sm:$0xff] %vm665_vm2, %v2732_v9  ;;  %667 = vst.msk [vmem:[#allocation2 + $0x8] sm:$0xff] %vm665_vm2, %v2732_v9  ;;  %s660_s25 = scalar_lea.vmem %s3338_s4, %s3083_s20  ;;  %v697_v13 = vsub.s32 0, %v696_v12  ;;  %v690_v4 = vld [vmem:[%s3055_s28 + $0x18] sm:$0xff]  ;;  %vm1765_vm4 = vcmask 261120  }
  0xaa   : > { %s654_s13 = scalar_lea.vmem %s3334_s0, %s2246_s19  ;;  %668 = vst.msk [vmem:[#allocation2 + $0x10] sm:$0xff] %vm665_vm2, %v2732_v9  ;;  %669 = vst.msk [vmem:[#allocation2 + $0x18] sm:$0xff] %vm665_vm2, %v2732_v9  ;;  %v691_v11 = vld [vmem:[%s660_s25] sm:$0x1]  ;;  %2484 = vset.pattern.permute.xlu0 %v2734_v33  ;;  %2485 = vset.pattern.permute.xlu1 %v2734_v33  ;;  %s3410_s15 = sld [smem:[#allocation29_spill]]  ;;  %vm1905_vm5 = vcmask 523264  }
  0xab   : > { %v679_v2 = vld [vmem:[%s654_s13] sm:$0xff]  ;;  %v682_v5 = vld [vmem:[%s654_s13 + $0x18] sm:$0xff]  ;;  %v680_v6 = vld [vmem:[%s654_s13 + $0x8] sm:$0xff]  ;;  %670 = vst.msk [vmem:[#allocation3] sm:$0xff] %vm665_vm2, %v2730_v0  ;;  %vm692_vm3 = vcmp.gt.f32.partialorder %v691_v11, 0.5  ;;  %s3411_s11 = sld [smem:[#allocation30_spill]] }
  0xac   : > { %2288 = vmatmul.mubr.msk.f32.vlgmr.msra.gmra.mrb[0].mxu0 %vm674_vm0, %v679_v2  ;;  %2303 = vmatmul.mubr.msk.f32.vlgmr.msra.gmra.mrb[0].mxu1 %vm674_vm0, %v682_v5  ;;  %v681_v8 = vld [vmem:[%s654_s13 + $0x10] sm:$0xff]  ;;  %671 = vst.msk [vmem:[#allocation3 + $0x8] sm:$0xff] %vm665_vm2, %v2730_v0  ;;  %672 = vst.msk [vmem:[#allocation3 + $0x10] sm:$0xff] %vm665_vm2, %v2730_v0  ;;  %v693_v15 = vsel %vm692_vm3, 0.0, %v2733_v14  ;;  %s3412_s20 = sld [smem:[#allocation27_spill]]  ;;  %s3413_s18 = sld [smem:[#allocation28_spill]] }
  0xad   : > { %2291 = vmatpush3.xpose.msk.msra.mxu0 %vm674_vm0, %v684_v3  ;;  %2292 = vmatprep.mubr.msk.f32.mxu0 %vm2731_vm1, %v2730_v0  ;;  %673 = vst.msk [vmem:[#allocation3 + $0x18] sm:$0xff] %vm665_vm2, %v2730_v0  ;;  %v698_v16 = vrot.slane %v693_v15, %v697_v13  ;;  %s3414_s13 = sld [smem:[#allocation23_spill]]  ;;  %s2241_s1 = sshll.u32 %s2714_s16, 7 }
  0xae   : > { %2295 = vmatprep.subr.mxu0 %v2730_v0  ;;  %2312 = vmatprep.mubr.msk.f32.mxu1 %vm2731_vm1, %v2730_v0  ;;  %s3415_s25 = sld [smem:[#allocation31_spill]]  ;;  %s646_s10 = scalar_lea.vmem [#allocation13], %s2211_s21 }
  0xaf   : > { %2311 = vmatpush3.msra.mxu1 %v688_v51  ;;  %s3417_s14 = sld [smem:[#allocation33_spill]]  ;;  %s2011_s28 = scalar_lea.sflag [#allocation7], %s3044_s12 }
  0xb0   : > { %2293 = vmatmul.mubr.msk.f32.vlgmr.msra.gmra.mrb[2].mxu0 %vm674_vm0, %v680_v6  ;;  %v3139_v34 = vld [vmem:[#allocation2] sm:$0xff]  ;;  %v3144_v37 = vld [vmem:[#allocation2 + $0x8] sm:$0xff]  ;;  %2320 = vmatprep.subr.mxu1 %v2730_v0  ;;  %s2736_s16 = smov [#allocation13]  }
  0xb1   : > { %2296 = vmatpush3.xpose.msk.msra.mxu0 %vm674_vm0, %v685_v7  ;;  %2297 = vmatprep.mubr.msk.f32.mxu0 %vm2731_vm1, %v2730_v0  ;;  %v3152_v41 = vld [vmem:[#allocation2 + $0x10] sm:$0xff]  ;;  %v3157_v45 = vld [vmem:[#allocation2 + $0x18] sm:$0xff]  ;;  %s2636_s21 = sshll.u32 %s2736_s16, 4  ;;  %s2637_s21 = int_to_ptr.vmem [resolvable:$false] %s2636_s21 }
  0xb2   : > { %2305 = vmatprep.subr.mxu0 %v2730_v0 }
  0xb3   : > { %p3418_p11 = scmp.ne.s32.totalorder %s3414_s13, 0 }
  0xb4   : > { %2298 = vmatmul.mubr.msk.f32.vlgmr.msra.gmra.mrb[4].mxu0 %vm674_vm0, %v681_v8 }
  0xb5   : > { %2307 = vmatprep.mubr.msk.f32.mxu0 %vm2731_vm1, %v2730_v0  ;;  %2306 = vmatpush3.msra.mxu0 %v687_v50  ;;  %s3284_s26 = scalar_lea.hbm %s3417_s14, %s2241_s1 }
  0xb6   : > { %2315 = vmatprep.subr.mxu0 %v2730_v0 }
 0x17f   : > { %v773_v17 = vpop.f32.mrb[0].mxu0  ;;  %v1001_v20 = vpop.f32.mrb[0].mxu1 }
 0x180   : > { %v774_v18 = vadd.f32 %v773_v17, %v698_v16  ;;  %v2289_v19 = vpop.f32.mrb[1].mxu0  ;;  %v3133_v22 = vadd.f32 %v1001_v20, %v698_v16  ;;  %v2304_v23 = vpop.f32.mrb[1].mxu1 }
 0x181   : > { %v1069_v19 = vld [vmem:[#allocation3] sm:$0xff] }
 0x182   : > { %v1009_v21 = vsel %vm674_vm0, %v774_v18, -inf  ;;  %v1018_v32 = vsel %vm674_vm0, %v3133_v22, -inf }
 0x183   : > { %1010 = vmax.xlane.f32.xlu0 %v1009_v21  ;;  %v849_v24 = vpop.f32.mrb[2].mxu0 }
 0x184   : > { %v850_v25 = vadd.f32 %v849_v24, %v698_v16  ;;  %v2294_v26 = vpop.f32.mrb[3].mxu0 }
 0x185   : > { %v1071_v26 = vld [vmem:[#allocation3 + $0x10] sm:$0xff] }
 0x186   : > { %v1012_v27 = vsel %vm674_vm0, %v850_v25, -inf }
 0x187   : > { %1013 = vmax.xlane.f32.xlu0 %v1012_v27  ;;  %v925_v28 = vpop.f32.mrb[4].mxu0 }
 0x188   : > { %v926_v29 = vadd.f32 %v925_v28, %v698_v16  ;;  %v2299_v30 = vpop.f32.mrb[5].mxu0 }
 0x189   : > { %v1072_v30 = vld [vmem:[#allocation3 + $0x18] sm:$0xff] }
 0x18a   : > { %v1015_v31 = vsel %vm674_vm0, %v926_v29, -inf }
 0x18b   : > { %1016 = vmax.xlane.f32.xlu1 %v1015_v31 }
 0x18f   : > { %1019 = vmax.xlane.f32.xlu1 %v1018_v32 }
 0x210   : > { %v1011_v35 = vpop.xlane.xlu0 %1010 }
 0x211   : > { %v3142_v36 = vmax.f32 %v3139_v34, %v1011_v35 }
 0x213   : > { %v1025_v38 = vsub.f32 %v3139_v34, %v3142_v36  ;;  %1426 = vst.msk [vmem:[#allocation2] sm:$0xff] %vm665_vm2, %v3142_v36  ;;  %1039 = vperm.xlu0 %2484, %v3142_v36  }
 0x214   : > { %v1014_v39 = vpop.xlane.xlu0 %1013 }
 0x215   : > { %v1022_v40 = vmax.f32 %v3144_v37, %v1014_v39  ;;  %v1029_v12 = vmul.f32 1.442695, %v1025_v38 }
 0x217   : > { %v1026_v42 = vsub.f32 %v3144_v37, %v1022_v40  ;;  %1427 = vst.msk [vmem:[#allocation2 + $0x8] sm:$0xff] %vm665_vm2, %v1022_v40  ;;  %1044 = vperm.xlu1 %2485, %v1022_v40   ;;  %v1469_v40 = vld [vmem:[%s3339_s5] sm:$0xff] }
 0x218   : > { %v1017_v43 = vpop.xlane.xlu1 %1016 }
 0x219   : > { %v1023_v44 = vmax.f32 %v3152_v41, %v1017_v43  ;;  %v1031_v10 = vmul.f32 1.442695, %v1026_v42  ;;  %v1470_v42 = vld [vmem:[%s3339_s5 + $0x8] sm:$0xff] }
 0x21b   : > { %v1027_v46 = vsub.f32 %v3152_v41, %v1023_v44  ;;  %1428 = vst.msk [vmem:[#allocation2 + $0x10] sm:$0xff] %vm665_vm2, %v1023_v44  ;;  %1049 = vperm.xlu1 %2485, %v1023_v44  }
 0x21c   : > { %v1020_v47 = vpop.xlane.xlu1 %1019 }
 0x21d   : > { %v1024_v48 = vmax.f32 %v3157_v45, %v1020_v47  ;;  %v1033_v13 = vmul.f32 1.442695, %v1027_v46 }
 0x21f   : > { %v1028_v49 = vsub.f32 %v3157_v45, %v1024_v48  ;;  %1429 = vst.msk [vmem:[#allocation2 + $0x18] sm:$0xff] %vm665_vm2, %v1024_v48  ;;  %1054 = vperm.xlu1 %2485, %v1024_v48   ;;  %v1098_v45 = vld [vmem:[#allocation4] sm:$0xff]  ;;  %v1099_v48 = vld [vmem:[#allocation4 + $0x8] sm:$0xff] }
 0x221   : > { %v1035_v14 = vmul.f32 1.442695, %v1028_v49 }
 0x292   : > { %v1040_v52 = vpop.permute.xlu0 %1039 }
 0x293   : > { %v1057_v53 = vsub.f32 %v774_v18, %v1040_v52 }
 0x295   : > { %v1061_v54 = vmul.f32 1.442695, %v1057_v53 }
 0x296   : > { %v1045_v55 = vpop.permute.xlu1 %1044 }
 0x297   : > { %2486 = vpow2.f32 %v1061_v54  ;;  %v1058_v56 = vsub.f32 %v850_v25, %v1045_v55  ;;  %v1100_v55 = vld [vmem:[#allocation4 + $0x10] sm:$0xff] }
 0x299   : > { %v1063_v57 = vmul.f32 1.442695, %v1058_v56 }
 0x29a   : > { %v1050_v58 = vpop.permute.xlu1 %1049 }
 0x29b   : > { %2488 = vpow2.f32 %v1063_v57  ;;  %v1059_v59 = vsub.f32 %v926_v29, %v1050_v58 }
 0x29d   : > { %v1065_v60 = vmul.f32 1.442695, %v1059_v59 }
 0x29e   : > { %v1055_v61 = vpop.permute.xlu1 %1054 }
 0x29f   : > { %2490 = vpow2.f32 %v1065_v60  ;;  %v1060_v62 = vsub.f32 %v3133_v22, %v1055_v61  ;;  %v1070_v22 = vld [vmem:[#allocation3 + $0x8] sm:$0xff]  ;;  %v1101_v60 = vld [vmem:[#allocation4 + $0x18] sm:$0xff] }
 0x2a1   : > { %v2487_v1 = vpop.eup %2486  ;;  %v1067_v2 = vmul.f32 1.442695, %v1060_v62 }
 0x2a2   : > { %2308 = vmatmul.mubr.msk.f32.vlgmr.msra.gmra.mrb[6].mxu0 %vm674_vm0, %v2487_v1  ;;  %v1077_v3 = vsel %vm674_vm0, %v2487_v1, 0.0 }
 0x2a3   : > { %2492 = vpow2.f32 %v1067_v2  ;;  %1078 = vadd.xlane.f32.xlu1 %v1077_v3  ;;  %2316 = vmatpush3.msra.mxu0 %v689_v63 }
 0x2a4   : > { %2317 = vmatprep.mubr.msk.f32.mxu0 %vm2731_vm1, %v2730_v0  ;;  %2325 = vmatprep.subr.mxu0 %v2730_v0  ;;  %2494 = vpow2.f32 %v1031_v10 }
 0x2a5   : > { %v2489_v5 = vpop.eup %2488  ;;  %2496 = vpow2.f32 %v1029_v12 }
 0x2a6   : > { %2313 = vmatmul.mubr.msk.f32.vlgmr.msra.gmra.mrb[2].mxu1 %vm674_vm0, %v2489_v5  ;;  %v1080_v6 = vsel %vm674_vm0, %v2489_v5, 0.0  ;;  %2498 = vpow2.f32 %v1033_v13  ;;  %v1472_v13 = vld [vmem:[%s3339_s5 + $0x18] sm:$0xff] }
 0x2a7   : > { %1081 = vadd.xlane.f32.xlu0 %v1080_v6  ;;  %2321 = vmatpush3.msra.mxu1 %v690_v4  ;;  %2500 = vpow2.f32 %v1035_v14 }
 0x2a8   : > { %2322 = vmatprep.mubr.msk.f32.mxu1 %vm2731_vm1, %v2730_v0  ;;  %2330 = vmatprep.subr.mxu1 %v2730_v0 }
 0x2a9   : > { %v2491_v7 = vpop.eup %2490 }
 0x2aa   : > { %2318 = vmatmul.mubr.msk.f32.vlgmr.msra.gmra.mrb[8].mxu0 %vm674_vm0, %v2491_v7  ;;  %v1083_v8 = vsel %vm674_vm0, %v2491_v7, 0.0 }
 0x2ab   : > { %1084 = vadd.xlane.f32.xlu1 %v1083_v8  ;;  %2327 = vmatprep.mubr.msk.f32.mxu0 %vm2731_vm1, %v2730_v0 }
 0x2ac   : > { %2326 = vmatpush3.msra.mxu0 %v1469_v40 }
 0x2ad   : > { %v2493_v9 = vpop.eup %2492  ;;  %2335 = vmatprep.subr.mxu0 %v2730_v0 }
 0x2ae   : > { %2323 = vmatmul.mubr.msk.f32.vlgmr.msra.gmra.mrb[4].mxu1 %vm674_vm0, %v2493_v9  ;;  %v1086_v11 = vsel %vm674_vm0, %v2493_v9, 0.0  ;;  %v2495_v15 = vpop.eup %2494  ;;  %v1471_v9 = vld [vmem:[%s3339_s5 + $0x10] sm:$0xff] }
 0x2af   : > { %1087 = vadd.xlane.f32.xlu1 %v1086_v11  ;;  %2332 = vmatprep.mubr.msk.f32.mxu1 %vm2731_vm1, %v2730_v0  ;;  %v2497_v16 = vpop.eup %2496  ;;  %v1074_v24 = vmul.f32 %v2495_v15, %v1070_v22 }
 0x2b0   : > { %v2499_v17 = vpop.eup %2498  ;;  %v1073_v20 = vmul.f32 %v2497_v16, %v1069_v19  ;;  %2331 = vmatpush3.msra.mxu1 %v1470_v42  ;;  %v1805_v42 = vld [vmem:[#allocation11] sm:$0xff] }
 0x2b1   : > { %v2501_v18 = vpop.eup %2500  ;;  %v1075_v28 = vmul.f32 %v2499_v17, %v1071_v26  ;;  %2340 = vmatprep.subr.mxu1 %v2730_v0 }
 0x2b2   : > { %v1076_v33 = vmul.f32 %v2501_v18, %v1072_v30 }
 0x2bd   : > { %1109 = vperm.xlu0 %2484, %v2495_v15  }
 0x2c0   : > { %1104 = vperm.xlu1 %2485, %v2497_v16  }
 0x2c4   : > { %1114 = vperm.xlu1 %2485, %v2499_v17  }
 0x2c8   : > { %1119 = vperm.xlu1 %2485, %v2501_v18  }
 0x330   : > { %v1079_v21 = vpop.xlane.xlu1 %1078 }
 0x331   : > { %v1089_v23 = vadd.f32 %v1079_v21, %v1073_v20 }
 0x333   : > { %1094 = vst.msk [vmem:[#allocation3] sm:$0xff] %vm665_vm2, %v1089_v23 }
 0x334   : > { %v1082_v25 = vpop.xlane.xlu0 %1081 }
 0x335   : > { %v1090_v27 = vadd.f32 %v1082_v25, %v1074_v24 }
 0x337   : > { %1095 = vst.msk [vmem:[#allocation3 + $0x8] sm:$0xff] %vm665_vm2, %v1090_v27 }
 0x338   : > { %v1085_v29 = vpop.xlane.xlu1 %1084 }
 0x339   : > { %v1091_v31 = vadd.f32 %v1085_v29, %v1075_v28 }
 0x33a   : > { %v1433_v32 = vld [vmem:[#allocation3] sm:$0xff] }
 0x33b   : > { %1096 = vst.msk [vmem:[#allocation3 + $0x10] sm:$0xff] %vm665_vm2, %v1091_v31  ;;  %2502 = vrcp.f32 %v1433_v32 }
 0x33c   : > { %v1088_v34 = vpop.xlane.xlu1 %1087  ;;  %v1110_v49 = vpop.permute.xlu0 %1109 }
 0x33d   : > { %v1092_v35 = vadd.f32 %v1088_v34, %v1076_v33  ;;  %v1123_v54 = vmul.f32 %v1110_v49, %v1099_v48  ;;  %v1773_v33 = vld [vmem:[%s3064_s23] sm:$0xff] }
 0x33e   : > { %v1434_v36 = vld [vmem:[#allocation3 + $0x8] sm:$0xff]  ;;  %v1890_v49 = vld [vmem:[%s3342_s8] sm:$0xff] }
 0x33f   : > { %1097 = vst.msk [vmem:[#allocation3 + $0x18] sm:$0xff] %vm665_vm2, %v1092_v35  ;;  %2504 = vrcp.f32 %v1434_v36 }
 0x340   : > { %v1105_v46 = vpop.permute.xlu1 %1104 }
 0x341   : > { %v1122_v47 = vmul.f32 %v1105_v46, %v1098_v45  ;;  %v2735_v45 = vmov 0.0|0.0   ;;  %v1807_v46 = vld [vmem:[#allocation11 + $0x10] sm:$0xff] }
 0x342   : > { %v1435_v37 = vld [vmem:[#allocation3 + $0x10] sm:$0xff] }
 0x343   : > { %2506 = vrcp.f32 %v1435_v37 }
 0x344   : > { %v1115_v53 = vpop.permute.xlu1 %1114 }
 0x345   : > { %v2503_v38 = vpop.eup %2502  ;;  %v1124_v59 = vmul.f32 %v1115_v53, %v1100_v55  ;;  %v1893_v53 = vld [vmem:[%s3342_s8 + $0x18] sm:$0xff]  ;;  %v1894_v55 = vld [vmem:[%s3342_s8 + $0x20] sm:$0xff] }
 0x346   : > { %1447 = vperm.xlu1 %2485, %v2503_v38   ;;  %v1436_v39 = vld [vmem:[#allocation3 + $0x18] sm:$0xff] }
 0x347   : > { %2508 = vrcp.f32 %v1436_v39 }
 0x348   : > { %v1120_v61 = vpop.permute.xlu1 %1119 }
 0x349   : > { %v2505_v41 = vpop.eup %2504  ;;  %v1125_v2 = vmul.f32 %v1120_v61, %v1101_v60 }
 0x34a   : > { %1452 = vperm.xlu0 %2484, %v2505_v41  }
 0x34d   : > { %v2507_v43 = vpop.eup %2506 }
 0x34e   : > { %1457 = vperm.xlu1 %2485, %v2507_v43   ;;  %v1806_v43 = vld [vmem:[#allocation11 + $0x8] sm:$0xff] }
 0x351   : > { %v2509_v44 = vpop.eup %2508 }
 0x352   : > { %1462 = vperm.xlu0 %2484, %v2509_v44   ;;  %v2376_v44 = vpack.c.bf16 %v1806_v43, %v1805_v42 }
 0x375   : > { %v1195_v50 = vpop.f32.mrb[6].mxu0 }
 0x376   : > { %v1418_v51 = vadd.f32 %v1195_v50, %v1122_v47  ;;  %v2309_v52 = vpop.f32.mrb[7].mxu0  ;;  %v1808_v47 = vld [vmem:[#allocation11 + $0x18] sm:$0xff] }
 0x377   : > { %v2379_v48 = vpack.c.bf16 %v1808_v47, %v1807_v46  ;;  %v1891_v50 = vld [vmem:[%s3342_s8 + $0x8] sm:$0xff] }
 0x378   : > { %1422 = vst.msk [vmem:[#allocation4] sm:$0xff] %vm674_vm0, %v1418_v51  ;;  %v1892_v51 = vld [vmem:[%s3342_s8 + $0x10] sm:$0xff]  ;;  %v2382_v52 = vpack.c.bf16 %v1891_v50, %v1890_v49 }
 0x379   : > { %v1268_v56 = vpop.f32.mrb[2].mxu1 }
 0x37a   : > { %v1419_v57 = vadd.f32 %v1268_v56, %v1123_v54  ;;  %v2314_v58 = vpop.f32.mrb[3].mxu1  ;;  %v2385_v54 = vpack.c.bf16 %v1893_v53, %v1892_v51  ;;  %v1895_v56 = vld [vmem:[%s3342_s8 + $0x28] sm:$0xff] }
 0x37c   : > { %1423 = vst.msk [vmem:[#allocation4 + $0x8] sm:$0xff] %vm674_vm0, %v1419_v57  ;;  %v2388_v57 = vpack.c.bf16 %v1895_v56, %v1894_v55 }
 0x37d   : > { %v1341_v62 = vpop.f32.mrb[8].mxu0 }
 0x37e   : > { %v1420_v63 = vadd.f32 %v1341_v62, %v1124_v59  ;;  %v2319_v1 = vpop.f32.mrb[9].mxu0  ;;  %v2232_v62 = vld [vmem:[%s3410_s15] ss:$0 sm:$0xff]  ;;  %s3416_s15 = sld [smem:[#allocation32_spill]] }
 0x37f   : > { %v1441_v6 = vld [vmem:[#allocation4] sm:$0xff] }
 0x380   : > { %1424 = vst.msk [vmem:[#allocation4 + $0x10] sm:$0xff] %vm674_vm0, %v1420_v63  ;;  %v2233_v1 = vld [vmem:[%s3411_s11] ss:$0 sm:$0xff]  ;;  %s2025_s11 = sshll.u32 %s646_s10, 4  ;;  %s3286_s11 = int_to_ptr.vmem [resolvable:$true] %s2025_s11 }
 0x381   : > { %v1414_v3 = vpop.f32.mrb[4].mxu1  ;;  %s2632_s23 = scalar_lea.vmem %s3286_s11, 128  ;;  %p2639_p10 = scmp.lt.s32.totalorder %s3286_s11, %s2637_s21 }
 0x382   : > { %v1421_v4 = vadd.f32 %v1414_v3, %v1125_v2  ;;  %v2324_v5 = vpop.f32.mrb[5].mxu1  ;;  %p2633_p13 = scmp.ne.s32.totalorder %s3286_s11, %s2632_s23 }
 0x383   : > { %v1442_v10 = vld [vmem:[#allocation4 + $0x8] sm:$0xff]  ;;  %v1897_v5 = vld [vmem:[%s3342_s8 + $0x38] sm:$0xff] }
 0x384   : > { %1425 = vst.msk [vmem:[#allocation4 + $0x18] sm:$0xff] %vm674_vm0, %v1421_v4  ;;  %v1896_v4 = vld [vmem:[%s3342_s8 + $0x30] sm:$0xff]  ;;  %p2634_p0 = pnand %p2633_p13, %p3418_p11 }
 0x386   : > { %p2635_p5 = pneg %p2634_p0 }
 0x387   : > { %v1443_v14 = vld [vmem:[#allocation4 + $0x10] sm:$0xff] }
 0x38b   : > { %v1444_v18 = vld [vmem:[#allocation4 + $0x18] sm:$0xff] }
 0x3c5   : > { %v1448_v7 = vpop.permute.xlu1 %1447 }
 0x3c6   : > { %v1465_v8 = vmul.f32 %v1448_v7, %v1441_v6  ;;  %v2391_v6 = vpack.c.bf16 %v1897_v5, %v1896_v4  ;;  %v2234_v7 = vld [vmem:[%s3412_s20] ss:$0 sm:$0xff]  ;;  %s2638_s20 = scalar_lea.vmem %s2637_s21, 256 }
 0x3c7   : > { %p2640_p7 = scmp.lt.s32.totalorder %s2638_s20, %s2632_s23 }
 0x3c8   : > { %2328 = vmatmul.mubr.msk.f32.vlgmr.msra.gmra.mrb[10].mxu0 %vm674_vm0, %v1465_v8 }
 0x3c9   : > { %v1453_v11 = vpop.permute.xlu0 %1452  ;;  %2336 = vmatpush3.msra.mxu0 %v1471_v9  ;;  %2337 = vmatprep.mubr.msk.f32.mxu0 %vm2731_vm1, %v2730_v0  ;;  %p2641_p4 = por %p2640_p7, %p2639_p10 }
 0x3ca   : > { %v1466_v12 = vmul.f32 %v1453_v11, %v1442_v10  ;;  %2375 = vmatprep.subr.bf16.mxu0 %v2735_v45 }
 0x3cb   : > { %p2642_p3 = pnand %p2641_p4, %p2635_p5 }
 0x3cc   : > { %2333 = vmatmul.mubr.msk.f32.vlgmr.msra.gmra.mrb[6].mxu1 %vm674_vm0, %v1466_v12  ;;  %v2236_v12 = vld [vmem:[%s3413_s18] ss:$0 sm:$0xff] }
 0x3cd   : > { %v1458_v15 = vpop.permute.xlu1 %1457  ;;  %2341 = vmatpush3.msra.mxu1 %v1472_v13  ;;  %2342 = vmatprep.mubr.msk.f32.mxu1 %vm2731_vm1, %v2730_v0 }
 0x3ce   : > { %v1467_v16 = vmul.f32 %v1458_v15, %v1443_v14  ;;  %2381 = vmatprep.subr.bf16.mxu1 %v2735_v45 }
 0x3d0   : > { %2338 = vmatmul.mubr.msk.f32.vlgmr.msra.gmra.mrb[12].mxu0 %vm674_vm0, %v1467_v16 }
 0x3d1   : > { %v1463_v17 = vpop.permute.xlu0 %1462  ;;  %2353 = vmatprep.mubr.msk.f32.mxu0 %vm2731_vm1, %v2730_v0  ;;  %2377 = vmatpush3.bf16.msra.mxu0 %v2376_v44 }
 0x3d2   : > { %v1468_v19 = vmul.f32 %v1463_v17, %v1444_v18  ;;  %2378 = vmatprep.subr.bf16.mxu0 %v2735_v45 }
 0x3d4   : > { %2343 = vmatmul.mubr.msk.f32.vlgmr.msra.gmra.mrb[8].mxu1 %vm674_vm0, %v1468_v19 }
 0x3d5   : > { %2372 = vmatprep.mubr.msk.f32.mxu1 %vm2731_vm1, %v2730_v0  ;;  %2380 = vmatpush3.bf16.msra.mxu0 %v2379_v48 }
 0x3d6   : > { %2383 = vmatpush3.bf16.msra.mxu1 %v2382_v52 }
 0x3d7   : > { %2384 = vmatprep.subr.bf16.mxu1 %v2735_v45 }
 0x3da   : > { %2386 = vmatpush3.bf16.msra.mxu1 %v2385_v54 }
 0x3db   : > { %2387 = vmatprep.subr.bf16.mxu1 %v2735_v45 }
 0x3de   : > { %2389 = vmatpush3.bf16.msra.mxu1 %v2388_v57 }
 0x3df   : > { %2390 = vmatprep.subr.bf16.mxu1 %v2735_v45 }
 0x3e2   : > { %2392 = vmatpush3.bf16.msra.mxu1 %v2391_v6 }
 0x49b   : > { %v1542_v20 = vpop.f32.mrb[10].mxu0 }
 0x49c   : > { %v2329_v21 = vpop.f32.mrb[11].mxu0  ;;  %v1766_v23 = vsel %vm1765_vm4, %v1542_v20, 0.0 }
 0x49f   : > { %v1615_v22 = vpop.f32.mrb[6].mxu1 }
 0x4a0   : > { %v1767_v24 = vsel %vm1765_vm4, %v1615_v22, 0.0  ;;  %v2334_v25 = vpop.f32.mrb[7].mxu1 }
 0x4a1   : > { %v1768_v26 = vadd.f32 %v1767_v24, %v1766_v23 }
 0x4a3   : > { %v1688_v27 = vpop.f32.mrb[12].mxu0 }
 0x4a4   : > { %v1769_v28 = vsel %vm1765_vm4, %v1688_v27, 0.0  ;;  %v2339_v29 = vpop.f32.mrb[13].mxu0  ;;  %v2238_v27 = vld [vmem:[%s3415_s25] ss:$0 sm:$0xff] }
 0x4a5   : > { %v1770_v30 = vadd.f32 %v1769_v28, %v1768_v26  ;;  %v2239_v29 = vld [vmem:[%s3416_s15] ss:$0 sm:$0xff] }
 0x4a7   : > { %v1761_v31 = vpop.f32.mrb[8].mxu1 }
 0x4a8   : > { %v1771_v32 = vsel %vm1765_vm4, %v1761_v31, 0.0  ;;  %v2344_v0 = vpop.f32.mrb[9].mxu1 }
 0x4a9   : > { %v1772_v34 = vadd.f32 %v1771_v32, %v1770_v30 }
 0x4ab   : > { %v1774_v35 = vadd.f32 %v1773_v33, %v1772_v34 }
 0x4ad   : > { %v1775_v36 = vsel %vm1765_vm4, %v1774_v35, 0.0 }
 0x4ae   : > { %1776 = vadd.xlane.f32.xlu1 %v1775_v36 }
 0x53b   : > { %v1777_v37 = vpop.xlane.xlu1 %1776 }
 0x53c   : > { %v1779_v38 = vmul.f32 0.03125, %v1777_v37 }
 0x53e   : > { %v1780_v39 = vsub.f32 %v1774_v35, %v1779_v38 }
 0x540   : > { %v1781_v40 = vmul.f32 %v1780_v39, %v1780_v39 }
 0x542   : > { %v1782_v41 = vsel %vm1765_vm4, %v1781_v40, 0.0 }
 0x543   : > { %1783 = vadd.xlane.f32.xlu0 %v1782_v41 }
 0x5d0   : > { %v1784_v58 = vpop.xlane.xlu0 %1783 }
 0x5d1   : > { %v1785_v59 = vmul.f32 0.03125, %v1784_v58 }
 0x5d3   : > { %v1786_v60 = vadd.f32 1e-05, %v1785_v59 }
 0x5d5   : > { %2510 = vrsqrt.f32 %v1786_v60 }
 0x5df   : > { %v2511_v61 = vpop.eup %2510 }
 0x5e0   : > { %v1788_v63 = vmul.f32 %v2511_v61, %v1780_v39 }
 0x5e2   : > { %v1796_v2 = vmul.f32 %v2232_v62, %v1788_v63 }
 0x5e4   : > { %v1804_v3 = vadd.f32 %v2233_v1, %v1796_v2 }
 0x5e6   : > { %2354 = vmatmul.mubr.msk.f32.vlgmr.msra.gmra.mrb[14].mxu0 %vm1765_vm4, %v1804_v3 }
 0x6b9   : > { %v1885_v8 = vpop.f32.mrb[14].mxu0 }
 0x6ba   : > { %v1886_v9 = vadd.f32 %v2234_v7, %v1885_v8  ;;  %v2355_v10 = vpop.f32.mrb[15].mxu0 }
 0x6bc   : > { %v1889_v11 = vmax.f32 %v1886_v9, 0.0 }
 0x6be   : > { %2373 = vmatmul.mubr.msk.f32.vlgmr.msra.gmra.mrb[10].mxu1 %vm1905_vm5, %v1889_v11 }
 0x791   : > { %v1975_v13 = vpop.f32.mrb[10].mxu1 }
 0x792   : > { %v1976_v14 = vadd.f32 %v2236_v12, %v1975_v13  ;;  %v2374_v15 = vpop.f32.mrb[11].mxu1 }
 0x794   : > { %v1979_v16 = vadd.f32 %v1976_v14, %v1804_v3 }
 0x796   : > { %v1980_v17 = vsel %vm1765_vm4, %v1979_v16, 0.0 }
 0x797   : > { %1981 = vadd.xlane.f32.xlu0 %v1980_v17 }
 0x824   : > { %v1982_v18 = vpop.xlane.xlu0 %1981 }
 0x825   : > { %v1983_v19 = vmul.f32 0.03125, %v1982_v18 }
 0x827   : > { %v1984_v20 = vsub.f32 %v1979_v16, %v1983_v19 }
 0x829   : > { %v1985_v21 = vmul.f32 %v1984_v20, %v1984_v20 }
 0x82b   : > { %v1986_v22 = vsel %vm1765_vm4, %v1985_v21, 0.0 }
 0x82c   : > { %1987 = vadd.xlane.f32.xlu1 %v1986_v22 }
 0x8b9   : > { %v1988_v23 = vpop.xlane.xlu1 %1987 }
 0x8ba   : > { %v1989_v24 = vmul.f32 0.03125, %v1988_v23 }
 0x8bc   : > { %v1990_v25 = vadd.f32 1e-05, %v1989_v24 }
 0x8be   : > { %2512 = vrsqrt.f32 %v1990_v25 }
 0x8c8   : > { %v2513_v26 = vpop.eup %2512 }
 0x8c9   : > { %v1992_v28 = vmul.f32 %v2513_v26, %v1984_v20 }
 0x8cb   : > { %v2000_v30 = vmul.f32 %v2238_v27, %v1992_v28 }
 0x8cd   : > { %v2008_v31 = vadd.f32 %v2239_v29, %v2000_v30 }
 0x8cf   : > { %2009 = vst.msk [vmem:[%s646_s10] sm:$0xff] %vm1765_vm4, %v2008_v31 }
 0x8d0   : > { %2645 = shalt.err (!%p2642_p3)
}
 0x8d1   : > { %s2646_s12 = scalar_lea.hbm %s3284_s26, 128  ;;  %s2650_s18 = scalar_lea.hbm %s3417_s14, 256 }
 0x8d2   : > { %p2647_p8 = scmp.ne.s32.totalorder %s3284_s26, %s2646_s12  ;;  %p2651_p12 = scmp.lt.u32.totalorder %s3284_s26, %s3417_s14 }
 0x8d3   : > { %p2652_p1 = scmp.lt.u32.totalorder %s2650_s18, %s2646_s12  ;;  %p2654_p13 = scmp.lt.u32.totalorder %s2646_s12, %s3284_s26 }
 0x8d4   : > { %p2648_p6 = pnand %p2647_p8, %p3418_p11 }
 0x8d5   : > { %p2653_p2 = por %p2652_p1, %p2651_p12 }
 0x8d6   : > { %p2649_p9 = pneg %p2648_p6 }
 0x8d7   : > { %p2655_p0 = por %p2654_p13, %p2653_p2 }
 0x8d9   : > { %p2656_p5 = pnand %p2655_p0, %p2649_p9 }
 0x8db   : > { %2659 = shalt.err (!%p2656_p5)
}
 0x8dc   : > { %2403 = dma.vmem_to_hbm [thread:$0]  (%p3418_p11), %s3286_s11, 128, %s3284_s26, %s2011_s28  }
 0x8dd PF: > { %s3419_s25 = sld [smem:[#allocation18_spill]]  ;;  %s3420_s7 = sld [smem:[#allocation24_spill]] }
 0x8de   : > { %s3421_s29 = sld [smem:[#allocation20_spill]] }
 0x8e3   : > { %s2037_s15 = sand.u32 1, %s3419_s25   ;;  %p3422_p10 = scmp.ne.s32.totalorder %s3420_s7, 0 }
 0x8e4   : > { %p3423_p7 = scmp.ge.s32.totalorder %s3421_s29, 2  ;;  %s2038_s1 = scalar_lea.sflag [#allocation7], %s2037_s15 }
 0x8e6   : > { %p2420_p4 = pnand %p3423_p7, %p3422_p10 }
 0x8e8   : > { %2697 = dma.done.wait (!%p2420_p4), %s2038_s1, 128  }
 0x8e9   : > { %2699 = vsyncadd (!%p2420_p4), %s2038_s1, 4294967168  ;;  %s34_s18 = sadd.s32 1, %s3421_s29   ;;  %s3424_s10 = sld [smem:[#allocation19_spill]] }
 0x8ea   : > { %p31_p3 = scmp.ge.s32.totalorder %s34_s18, 4   ;;  %s3425_s15 = sld [smem:[#allocation22_spill]] }
 0x8eb   : > { %s3426_s13 = sld [smem:[#allocation21_spill]]  ;;  %s3427_s29 = smov %s2706_s30 }
 0x8ec   : > { %s3429_s16 = smov %s2718_s17  ;;  %33 = sbr.rel (!%p31_p3) target bundleno = 19 (0x13), region = 163 }
 0x8ef   : > { %s3428_s30 = smov %s3424_s10 }
 0x8f1   : > { %s3430_s17 = smov %s3426_s13 }
 0x8f3   :  { %2043 = vsyncpa [#allocation6], 1 }
 0x8f4   :  { %2045 = vsyncpa [#allocation6 + $0x1], 1 }
 0x8f5   :  { %2046 = vsyncpa [#allocation9], 1 }
 0x8f6   :  { %2048 = vsyncpa [#allocation9 + $0x1], 1 }
 0x8f7   :  { %2049 = vsyncpa [#allocation12], 1 }
 0x8f8   :  { %2050 = vsyncpa [#allocation7], 1 }
 0x8f9   :  { %2052 = vsyncpa [#allocation7 + $0x1], 1 }

</bundles_post_ra>
